<compile_context>
chip_gen: v7x
topology: tpu7x:2x2x1
jax: 0.10.0
libtpu: 0.0.40
codegen_flags: <defaults>
</compile_context>

<pallas_src>
import functools
import math

import jax
import jax.numpy as jnp
from jax.experimental import pallas as pl
from jax.experimental.pallas import tpu as pltpu


# ----------------------------- in-kernel helpers -----------------------------

def _layernorm(x, gamma, beta, eps=1e-5):
    # Independent reductions (var = E[x^2] - mean^2): breaks the serial
    # reduce -> sub -> square -> reduce chain so the two lane-reductions overlap.
    mean = jnp.mean(x, axis=-1, keepdims=True)
    mean_sq = jnp.mean(x * x, axis=-1, keepdims=True)
    var = mean_sq - mean * mean
    return (x - mean) * jax.lax.rsqrt(var + eps) * gamma + beta


def _gelu(x):
    # TODO(synk): PyTorch F.gelu defaults to the exact erf form; the Mosaic-safe
    # tanh approximation is used here (difference is O(1e-3)).
    return 0.5 * x * (1.0 + jnp.tanh(0.7978845608028654 * (x + 0.044715 * x * x * x)))


def _dot(a, b):  # plain a @ b on the MXU, f32 accumulation
    return jnp.dot(a, b, preferred_element_type=jnp.float32)


# --------------------------------- kernel ------------------------------------

def _mixer_kernel(x_ref,
                  g1_ref, b1_ref, g2_ref, b2_ref,
                  wt1t_ref, bt1_ref, wt2t_ref, bt2_ref,
                  wc1_ref, bc1_ref, wc2_ref, bc2_ref,
                  o_ref, xmid_ref, *, block_b):
    bf16 = jnp.bfloat16
    x = x_ref[...]                                      # (Bt, l, c) f32

    # ---- token mixing: x = x + permute(fc2(gelu(fc1(permute(norm1(x)))))) ----
    y = _layernorm(x, g1_ref[...], b1_ref[...])         # (Bt, l, c)
    # Plain matmuls, weights pre-transposed on the host -> no transposed
    # contractions, both intermediates lane-dense (last dim = c).
    for bi in range(block_b):                           # short static unroll
        yb = y[bi].astype(bf16)                         # (l, c)
        hT = _dot(wt1t_ref[...], yb) + bt1_ref[...]     # (DS, c)  fc1 in permuted frame
        hT = _gelu(hT)
        ytok = _dot(wt2t_ref[...], hT.astype(bf16)) + bt2_ref[...]   # (l, c) fc2 + permute back
        xmid_ref[bi] = x[bi] + ytok                     # residual off pre-norm x

    # ---- channel mixing: x = x + fc2(gelu(fc1(norm2(x)))) ---------------------
    xm = xmid_ref[...]                                  # (Bt, l, c)
    z = _layernorm(xm, g2_ref[...], b2_ref[...])        # (Bt, l, c)
    bt, l, c = xm.shape
    zf = z.reshape(bt * l, c)                           # leading-dim merge (layout-free)
    h2 = _gelu(_dot(zf.astype(bf16), wc1_ref[...]) + bc1_ref[...])   # (Bt*l, mlp)
    out = _dot(h2.astype(bf16), wc2_ref[...]) + bc2_ref[...]         # (Bt*l, c)
    o_ref[...] = xm + out.reshape(bt, l, c)             # residual off pre-norm x


# --------------------------------- wrapper ------------------------------------

def _rep_spec(shape):
    nd = len(shape)
    # NOTE: at real Mixer dims add pipeline_mode=pl.Buffered(1) here — the block
    # index never changes, so double-buffering these weights only wastes VMEM.
    return pl.BlockSpec(shape, lambda i, _n=nd: (0,) * _n)   # same block every step


def mixer_block(x, p, *, block_b=None):
    b, l, c = x.shape
    ds = p["wt1t"].shape[0]
    mlp = p["wc1"].shape[1]
    if block_b is None:
        # >= 2 parallel blocks so both v7x TensorCores get work; on single-TC
        # v5e/v6e this is 2 cheap serial steps of a fat block.
        block_b = b // 2 if (b >= 2 and b % 2 == 0) else b
    assert b % block_b == 0
    nblk = b // block_b

    kernel = functools.partial(_mixer_kernel, block_b=block_b)
    return pl.pallas_call(
        kernel,
        out_shape=jax.ShapeDtypeStruct((b, l, c), jnp.float32),
        grid=(nblk,),
        in_specs=[
            pl.BlockSpec((block_b, l, c), lambda i: (i, 0, 0)),  # x (block of batch)
            _rep_spec((1, c)), _rep_spec((1, c)),                # norm1 gamma/beta
            _rep_spec((1, c)), _rep_spec((1, c)),                # norm2 gamma/beta
            _rep_spec((ds, l)), _rep_spec((ds, 1)),              # token fc1 W^T, b (col)
            _rep_spec((l, ds)), _rep_spec((l, 1)),               # token fc2 W^T, b (col)
            _rep_spec((c, mlp)), _rep_spec((1, mlp)),            # channel fc1 W, b
            _rep_spec((mlp, c)), _rep_spec((1, c)),              # channel fc2 W, b
        ],
        out_specs=pl.BlockSpec((block_b, l, c), lambda i: (i, 0, 0)),
        scratch_shapes=[pltpu.VMEM((block_b, l, c), jnp.float32)],  # x after token-mixing
        compiler_params=pltpu.CompilerParams(
            dimension_semantics=("parallel",)),
    )(x,
      p["g1"], p["b1"], p["g2"], p["b2"],
      p["wt1t"], p["bt1"], p["wt2t"], p["bt2"],
      p["wc1"], p["bc1"], p["wc2"], p["bc2"])


# ------------------------------ parameter init --------------------------------

def init_params(key, *, num_token, emb_dim, ds, mlp_dim):
    def lin(k, fan_in, fan_out):
        kw, kb = jax.random.split(k)
        limit = math.sqrt(1.0 / fan_in)     # PyTorch nn.Linear-style uniform init
        w = jax.random.uniform(kw, (fan_in, fan_out), jnp.float32, -limit, limit)
        bias = jax.random.uniform(kb, (fan_out,), jnp.float32, -limit, limit)
        return w, bias

    ks = jax.random.split(key, 4)
    wt1, bt1 = lin(ks[0], num_token, ds)        # token_mixing.fc1
    wt2, bt2 = lin(ks[1], ds, num_token)        # token_mixing.fc2
    wc1, bc1 = lin(ks[2], emb_dim, mlp_dim)     # channel_mixing.fc1
    wc2, bc2 = lin(ks[3], mlp_dim, emb_dim)     # channel_mixing.fc2

    bf16 = jnp.bfloat16
    return dict(
        g1=jnp.ones((1, emb_dim), jnp.float32),
        b1=jnp.zeros((1, emb_dim), jnp.float32),
        g2=jnp.ones((1, emb_dim), jnp.float32),
        b2=jnp.zeros((1, emb_dim), jnp.float32),
        # MXU operands stored as bf16 (f32 accumulation inside the kernel).
        wt1t=wt1.T.astype(bf16),                 # (DS, num_token)  pre-transposed
        bt1=bt1.reshape(ds, 1),                  # column bias (broadcast over channels)
        wt2t=wt2.T.astype(bf16),                 # (num_token, DS) == PyTorch (out,in)
        bt2=bt2.reshape(num_token, 1),           # column bias (broadcast over channels)
        wc1=wc1.astype(bf16), bc1=bc1.reshape(1, mlp_dim),
        wc2=wc2.astype(bf16), bc2=bc2.reshape(1, emb_dim),
    )


# ------------------------ pure-JAX reference (for checking) -------------------

def mixer_block_ref(x, p):
    bf16 = jnp.bfloat16
    f32 = jnp.float32

    def ln(v, g, b, eps=1e-5):
        m = jnp.mean(v, axis=-1, keepdims=True)
        var = jnp.mean((v - m) ** 2, axis=-1, keepdims=True)
        return (v - m) * jax.lax.rsqrt(var + eps) * g.reshape(-1) + b.reshape(-1)

    wt1 = p["wt1t"].T                                   # (l, DS)  bf16
    wt2 = p["wt2t"].T                                   # (DS, l)  bf16

    y = ln(x, p["g1"], p["b1"])
    yp = jnp.transpose(y, (0, 2, 1))                    # (B, c, l)
    h = jnp.einsum("bcl,ld->bcd", yp.astype(bf16), wt1,
                   preferred_element_type=f32) + p["bt1"].reshape(-1)
    h = _gelu(h)
    yt = jnp.einsum("bcd,dl->bcl", h.astype(bf16), wt2,
                    preferred_element_type=f32) + p["bt2"].reshape(-1)
    x = x + jnp.transpose(yt, (0, 2, 1))
    z = ln(x, p["g2"], p["b2"])
    h2 = _gelu(jnp.einsum("blc,cm->blm", z.astype(bf16), p["wc1"],
                          preferred_element_type=f32) + p["bc1"].reshape(-1))
    out = jnp.einsum("blm,mc->blc", h2.astype(bf16), p["wc2"],
                     preferred_element_type=f32) + p["bc2"].reshape(-1)
    return x + out


# ----------------------------------- main --------------------------------------

if __name__ == "__main__":
    B = 8              # batch (2 grid blocks of 4 -> fat steps, both v7x TCs used)
    NUM_TOKEN = 64     # l  (token / sequence dim)
    EMB_DIM = 128      # c  (lane-dense: multiple of 128 -> unmasked stores)
    DS = 64            # token-mixing hidden dim
    MLP_DIM = 256      # channel-mixing hidden dim

    key = jax.random.PRNGKey(0)
    kx, kp = jax.random.split(key)
    x = jax.random.normal(kx, (B, NUM_TOKEN, EMB_DIM), jnp.float32)
    params = init_params(kp, num_token=NUM_TOKEN, emb_dim=EMB_DIM,
                         ds=DS, mlp_dim=MLP_DIM)

    out = mixer_block(x, params)
    out = jax.block_until_ready(out)
    assert out.shape == (B, NUM_TOKEN, EMB_DIM) and out.dtype == jnp.float32
    assert bool(jnp.all(jnp.isfinite(out)))

    ref = jax.block_until_ready(mixer_block_ref(x, params))
    rel_err = float(jnp.max(jnp.abs(out - ref)) / (jnp.max(jnp.abs(ref)) + 1e-6))
    assert rel_err < 5e-3, f"mismatch vs reference: rel_err={rel_err}"
    print("KERNEL_OK")
</pallas_src>

<mosaic_0001>
module attributes {stable_mosaic.version = 11 : i64} {
  func.func @_mixer_kernel(%arg0: i32, %arg1: memref<4x64x128xf32, #tpu.memory_space<vmem>>, %arg2: memref<1x128xf32, #tpu.memory_space<vmem>>, %arg3: memref<1x128xf32, #tpu.memory_space<vmem>>, %arg4: memref<1x128xf32, #tpu.memory_space<vmem>>, %arg5: memref<1x128xf32, #tpu.memory_space<vmem>>, %arg6: memref<64x64xbf16, #tpu.memory_space<vmem>>, %arg7: memref<64x1xf32, #tpu.memory_space<vmem>>, %arg8: memref<64x64xbf16, #tpu.memory_space<vmem>>, %arg9: memref<64x1xf32, #tpu.memory_space<vmem>>, %arg10: memref<128x256xbf16, #tpu.memory_space<vmem>>, %arg11: memref<1x256xf32, #tpu.memory_space<vmem>>, %arg12: memref<256x128xbf16, #tpu.memory_space<vmem>>, %arg13: memref<1x128xf32, #tpu.memory_space<vmem>>, %arg14: memref<4x64x128xf32, #tpu.memory_space<vmem>>, %arg15: memref<4x64x128xf32, #tpu.memory_space<vmem>>) attributes {dimension_semantics = [#tpu.dimension_semantics<parallel>], iteration_bounds = array<i64: 2>, scalar_prefetch = 0 : i64, scratch_operands = 1 : i64, tpu.core_type = #tpu.core_type<tc>, window_params = [{transform_indices = @transform_0, window_bounds = array<i64: 4, 64, 128>}, {pipeline_mode = #tpu.pipeline_mode<synchronous>, transform_indices = @transform_1, window_bounds = array<i64: 1, 128>}, {pipeline_mode = #tpu.pipeline_mode<synchronous>, transform_indices = @transform_2, window_bounds = array<i64: 1, 128>}, {pipeline_mode = #tpu.pipeline_mode<synchronous>, transform_indices = @transform_3, window_bounds = array<i64: 1, 128>}, {pipeline_mode = #tpu.pipeline_mode<synchronous>, transform_indices = @transform_4, window_bounds = array<i64: 1, 128>}, {pipeline_mode = #tpu.pipeline_mode<synchronous>, transform_indices = @transform_5, window_bounds = array<i64: 64, 64>}, {pipeline_mode = #tpu.pipeline_mode<synchronous>, transform_indices = @transform_6, window_bounds = array<i64: 64, 1>}, {pipeline_mode = #tpu.pipeline_mode<synchronous>, transform_indices = @transform_7, window_bounds = array<i64: 64, 64>}, {pipeline_mode = #tpu.pipeline_mode<synchronous>, transform_indices = @transform_8, window_bounds = array<i64: 64, 1>}, {pipeline_mode = #tpu.pipeline_mode<synchronous>, transform_indices = @transform_9, window_bounds = array<i64: 128, 256>}, {pipeline_mode = #tpu.pipeline_mode<synchronous>, transform_indices = @transform_10, window_bounds = array<i64: 1, 256>}, {pipeline_mode = #tpu.pipeline_mode<synchronous>, transform_indices = @transform_11, window_bounds = array<i64: 256, 128>}, {pipeline_mode = #tpu.pipeline_mode<synchronous>, transform_indices = @transform_12, window_bounds = array<i64: 1, 128>}, {transform_indices = @transform_13, window_bounds = array<i64: 4, 64, 128>}]} {
    %c0 = arith.constant 0 : index
    %c0_0 = arith.constant 0 : index
    %c0_1 = arith.constant 0 : index
    %0 = vector.load %arg1[%c0, %c0_0, %c0_1] : memref<4x64x128xf32, #tpu.memory_space<vmem>>, vector<4x64x128xf32>
    %c0_2 = arith.constant 0 : index
    %c0_3 = arith.constant 0 : index
    %1 = vector.load %arg2[%c0_2, %c0_3] : memref<1x128xf32, #tpu.memory_space<vmem>>, vector<1x128xf32>
    %c0_4 = arith.constant 0 : index
    %c0_5 = arith.constant 0 : index
    %2 = vector.load %arg3[%c0_4, %c0_5] : memref<1x128xf32, #tpu.memory_space<vmem>>, vector<1x128xf32>
    %cst = arith.constant dense<0.000000e+00> : vector<4x64xf32>
    %3 = vector.multi_reduction <add>, %0, %cst [2] : vector<4x64x128xf32> to vector<4x64xf32>
    %4 = vector.shape_cast %3 : vector<4x64xf32> to vector<4x64x1xf32>
    %cst_6 = arith.constant 1.280000e+02 : f32
    %5 = vector.broadcast %cst_6 : f32 to vector<4x64x1xf32>
    %6 = arith.divf %4, %5 : vector<4x64x1xf32>
    %7 = arith.mulf %0, %0 : vector<4x64x128xf32>
    %cst_7 = arith.constant dense<0.000000e+00> : vector<4x64xf32>
    %8 = vector.multi_reduction <add>, %7, %cst_7 [2] : vector<4x64x128xf32> to vector<4x64xf32>
    %9 = vector.shape_cast %8 : vector<4x64xf32> to vector<4x64x1xf32>
    %cst_8 = arith.constant 1.280000e+02 : f32
    %10 = vector.broadcast %cst_8 : f32 to vector<4x64x1xf32>
    %11 = arith.divf %9, %10 : vector<4x64x1xf32>
    %12 = arith.mulf %6, %6 : vector<4x64x1xf32>
    %13 = arith.subf %11, %12 : vector<4x64x1xf32>
    %14 = vector.broadcast %6 : vector<4x64x1xf32> to vector<4x64x128xf32>
    %15 = arith.subf %0, %14 : vector<4x64x128xf32>
    %cst_9 = arith.constant 9.99999974E-6 : f32
    %16 = vector.broadcast %cst_9 : f32 to vector<4x64x1xf32>
    %17 = arith.addf %13, %16 : vector<4x64x1xf32>
    %18 = math.rsqrt %17 : vector<4x64x1xf32>
    %19 = vector.broadcast %18 : vector<4x64x1xf32> to vector<4x64x128xf32>
    %20 = arith.mulf %15, %19 : vector<4x64x128xf32>
    %21 = vector.shape_cast %1 : vector<1x128xf32> to vector<1x1x128xf32>
    %22 = vector.broadcast %21 : vector<1x1x128xf32> to vector<4x64x128xf32>
    %23 = arith.mulf %20, %22 : vector<4x64x128xf32>
    %24 = vector.shape_cast %2 : vector<1x128xf32> to vector<1x1x128xf32>
    %25 = vector.broadcast %24 : vector<1x1x128xf32> to vector<4x64x128xf32>
    %26 = arith.addf %23, %25 : vector<4x64x128xf32>
    %27 = vector.extract_strided_slice %26 {offsets = [0, 0, 0], sizes = [1, 64, 128], strides = [1, 1, 1]} : vector<4x64x128xf32> to vector<1x64x128xf32>
    %28 = vector.shape_cast %27 : vector<1x64x128xf32> to vector<64x128xf32>
    %29 = arith.truncf %28 : vector<64x128xf32> to vector<64x128xbf16>
    %c0_10 = arith.constant 0 : index
    %c0_11 = arith.constant 0 : index
    %30 = vector.load %arg6[%c0_10, %c0_11] : memref<64x64xbf16, #tpu.memory_space<vmem>>, vector<64x64xbf16>
    %cst_12 = arith.constant dense<0.000000e+00> : vector<64x128xf32>
    %31 = tpu.matmul %30, %29, %cst_12 {dimension_numbers = #tpu.dot_dimension_numbers<[1], [0], [0], [1], [0, 0, 1, 1], [], []>} : vector<64x64xbf16>, vector<64x128xbf16>, vector<64x128xf32> -> vector<64x128xf32>
    %c0_13 = arith.constant 0 : index
    %c0_14 = arith.constant 0 : index
    %32 = vector.load %arg7[%c0_13, %c0_14] : memref<64x1xf32, #tpu.memory_space<vmem>>, vector<64x1xf32>
    %33 = vector.broadcast %32 : vector<64x1xf32> to vector<64x128xf32>
    %34 = arith.addf %31, %33 : vector<64x128xf32>
    %cst_15 = arith.constant 5.000000e-01 : f32
    %35 = vector.broadcast %cst_15 : f32 to vector<64x128xf32>
    %36 = arith.mulf %35, %34 : vector<64x128xf32>
    %cst_16 = arith.constant 4.471500e-02 : f32
    %37 = vector.broadcast %cst_16 : f32 to vector<64x128xf32>
    %38 = arith.mulf %37, %34 : vector<64x128xf32>
    %39 = arith.mulf %38, %34 : vector<64x128xf32>
    %40 = arith.mulf %39, %34 : vector<64x128xf32>
    %41 = arith.addf %34, %40 : vector<64x128xf32>
    %cst_17 = arith.constant 0.797884583 : f32
    %42 = vector.broadcast %cst_17 : f32 to vector<64x128xf32>
    %43 = arith.mulf %42, %41 : vector<64x128xf32>
    %44 = math.tanh %43 : vector<64x128xf32>
    %cst_18 = arith.constant 1.000000e+00 : f32
    %45 = vector.broadcast %cst_18 : f32 to vector<64x128xf32>
    %46 = arith.addf %45, %44 : vector<64x128xf32>
    %47 = arith.mulf %36, %46 : vector<64x128xf32>
    %c0_19 = arith.constant 0 : index
    %c0_20 = arith.constant 0 : index
    %48 = vector.load %arg8[%c0_19, %c0_20] : memref<64x64xbf16, #tpu.memory_space<vmem>>, vector<64x64xbf16>
    %49 = arith.truncf %47 : vector<64x128xf32> to vector<64x128xbf16>
    %cst_21 = arith.constant dense<0.000000e+00> : vector<64x128xf32>
    %50 = tpu.matmul %48, %49, %cst_21 {dimension_numbers = #tpu.dot_dimension_numbers<[1], [0], [0], [1], [0, 0, 1, 1], [], []>} : vector<64x64xbf16>, vector<64x128xbf16>, vector<64x128xf32> -> vector<64x128xf32>
    %c0_22 = arith.constant 0 : index
    %c0_23 = arith.constant 0 : index
    %51 = vector.load %arg9[%c0_22, %c0_23] : memref<64x1xf32, #tpu.memory_space<vmem>>, vector<64x1xf32>
    %52 = vector.broadcast %51 : vector<64x1xf32> to vector<64x128xf32>
    %53 = arith.addf %50, %52 : vector<64x128xf32>
    %54 = vector.extract_strided_slice %0 {offsets = [0, 0, 0], sizes = [1, 64, 128], strides = [1, 1, 1]} : vector<4x64x128xf32> to vector<1x64x128xf32>
    %55 = vector.shape_cast %54 : vector<1x64x128xf32> to vector<64x128xf32>
    %56 = arith.addf %55, %53 : vector<64x128xf32>
    %c0_24 = arith.constant 0 : index
    %c0_25 = arith.constant 0 : index
    %c0_26 = arith.constant 0 : index
    %57 = vector.load %arg15[%c0_24, %c0_25, %c0_26] : memref<4x64x128xf32, #tpu.memory_space<vmem>>, vector<1x64x128xf32>
    %58 = vector.shape_cast %57 : vector<1x64x128xf32> to vector<64x128xf32>
    %59 = vector.shape_cast %56 : vector<64x128xf32> to vector<1x64x128xf32>
    tpu.vector_store %arg15[%c0_24, %c0_25, %c0_26], %59 {strides = array<i32>} : memref<4x64x128xf32, #tpu.memory_space<vmem>>, vector<1x64x128xf32>,
    %60 = vector.extract_strided_slice %26 {offsets = [1, 0, 0], sizes = [1, 64, 128], strides = [1, 1, 1]} : vector<4x64x128xf32> to vector<1x64x128xf32>
    %61 = vector.shape_cast %60 : vector<1x64x128xf32> to vector<64x128xf32>
    %62 = arith.truncf %61 : vector<64x128xf32> to vector<64x128xbf16>
    %c0_27 = arith.constant 0 : index
    %c0_28 = arith.constant 0 : index
    %63 = vector.load %arg6[%c0_27, %c0_28] : memref<64x64xbf16, #tpu.memory_space<vmem>>, vector<64x64xbf16>
    %cst_29 = arith.constant dense<0.000000e+00> : vector<64x128xf32>
    %64 = tpu.matmul %63, %62, %cst_29 {dimension_numbers = #tpu.dot_dimension_numbers<[1], [0], [0], [1], [0, 0, 1, 1], [], []>} : vector<64x64xbf16>, vector<64x128xbf16>, vector<64x128xf32> -> vector<64x128xf32>
    %c0_30 = arith.constant 0 : index
    %c0_31 = arith.constant 0 : index
    %65 = vector.load %arg7[%c0_30, %c0_31] : memref<64x1xf32, #tpu.memory_space<vmem>>, vector<64x1xf32>
    %66 = vector.broadcast %65 : vector<64x1xf32> to vector<64x128xf32>
    %67 = arith.addf %64, %66 : vector<64x128xf32>
    %cst_32 = arith.constant 5.000000e-01 : f32
    %68 = vector.broadcast %cst_32 : f32 to vector<64x128xf32>
    %69 = arith.mulf %68, %67 : vector<64x128xf32>
    %cst_33 = arith.constant 4.471500e-02 : f32
    %70 = vector.broadcast %cst_33 : f32 to vector<64x128xf32>
    %71 = arith.mulf %70, %67 : vector<64x128xf32>
    %72 = arith.mulf %71, %67 : vector<64x128xf32>
    %73 = arith.mulf %72, %67 : vector<64x128xf32>
    %74 = arith.addf %67, %73 : vector<64x128xf32>
    %cst_34 = arith.constant 0.797884583 : f32
    %75 = vector.broadcast %cst_34 : f32 to vector<64x128xf32>
    %76 = arith.mulf %75, %74 : vector<64x128xf32>
    %77 = math.tanh %76 : vector<64x128xf32>
    %cst_35 = arith.constant 1.000000e+00 : f32
    %78 = vector.broadcast %cst_35 : f32 to vector<64x128xf32>
    %79 = arith.addf %78, %77 : vector<64x128xf32>
    %80 = arith.mulf %69, %79 : vector<64x128xf32>
    %c0_36 = arith.constant 0 : index
    %c0_37 = arith.constant 0 : index
    %81 = vector.load %arg8[%c0_36, %c0_37] : memref<64x64xbf16, #tpu.memory_space<vmem>>, vector<64x64xbf16>
    %82 = arith.truncf %80 : vector<64x128xf32> to vector<64x128xbf16>
    %cst_38 = arith.constant dense<0.000000e+00> : vector<64x128xf32>
    %83 = tpu.matmul %81, %82, %cst_38 {dimension_numbers = #tpu.dot_dimension_numbers<[1], [0], [0], [1], [0, 0, 1, 1], [], []>} : vector<64x64xbf16>, vector<64x128xbf16>, vector<64x128xf32> -> vector<64x128xf32>
    %c0_39 = arith.constant 0 : index
    %c0_40 = arith.constant 0 : index
    %84 = vector.load %arg9[%c0_39, %c0_40] : memref<64x1xf32, #tpu.memory_space<vmem>>, vector<64x1xf32>
    %85 = vector.broadcast %84 : vector<64x1xf32> to vector<64x128xf32>
    %86 = arith.addf %83, %85 : vector<64x128xf32>
    %87 = vector.extract_strided_slice %0 {offsets = [1, 0, 0], sizes = [1, 64, 128], strides = [1, 1, 1]} : vector<4x64x128xf32> to vector<1x64x128xf32>
    %88 = vector.shape_cast %87 : vector<1x64x128xf32> to vector<64x128xf32>
    %89 = arith.addf %88, %86 : vector<64x128xf32>
    %c1 = arith.constant 1 : index
    %c0_41 = arith.constant 0 : index
    %c0_42 = arith.constant 0 : index
    %90 = vector.load %arg15[%c1, %c0_41, %c0_42] : memref<4x64x128xf32, #tpu.memory_space<vmem>>, vector<1x64x128xf32>
    %91 = vector.shape_cast %90 : vector<1x64x128xf32> to vector<64x128xf32>
    %92 = vector.shape_cast %89 : vector<64x128xf32> to vector<1x64x128xf32>
    tpu.vector_store %arg15[%c1, %c0_41, %c0_42], %92 {strides = array<i32>} : memref<4x64x128xf32, #tpu.memory_space<vmem>>, vector<1x64x128xf32>,
    %93 = vector.extract_strided_slice %26 {offsets = [2, 0, 0], sizes = [1, 64, 128], strides = [1, 1, 1]} : vector<4x64x128xf32> to vector<1x64x128xf32>
    %94 = vector.shape_cast %93 : vector<1x64x128xf32> to vector<64x128xf32>
    %95 = arith.truncf %94 : vector<64x128xf32> to vector<64x128xbf16>
    %c0_43 = arith.constant 0 : index
    %c0_44 = arith.constant 0 : index
    %96 = vector.load %arg6[%c0_43, %c0_44] : memref<64x64xbf16, #tpu.memory_space<vmem>>, vector<64x64xbf16>
    %cst_45 = arith.constant dense<0.000000e+00> : vector<64x128xf32>
    %97 = tpu.matmul %96, %95, %cst_45 {dimension_numbers = #tpu.dot_dimension_numbers<[1], [0], [0], [1], [0, 0, 1, 1], [], []>} : vector<64x64xbf16>, vector<64x128xbf16>, vector<64x128xf32> -> vector<64x128xf32>
    %c0_46 = arith.constant 0 : index
    %c0_47 = arith.constant 0 : index
    %98 = vector.load %arg7[%c0_46, %c0_47] : memref<64x1xf32, #tpu.memory_space<vmem>>, vector<64x1xf32>
    %99 = vector.broadcast %98 : vector<64x1xf32> to vector<64x128xf32>
    %100 = arith.addf %97, %99 : vector<64x128xf32>
    %cst_48 = arith.constant 5.000000e-01 : f32
    %101 = vector.broadcast %cst_48 : f32 to vector<64x128xf32>
    %102 = arith.mulf %101, %100 : vector<64x128xf32>
    %cst_49 = arith.constant 4.471500e-02 : f32
    %103 = vector.broadcast %cst_49 : f32 to vector<64x128xf32>
    %104 = arith.mulf %103, %100 : vector<64x128xf32>
    %105 = arith.mulf %104, %100 : vector<64x128xf32>
    %106 = arith.mulf %105, %100 : vector<64x128xf32>
    %107 = arith.addf %100, %106 : vector<64x128xf32>
    %cst_50 = arith.constant 0.797884583 : f32
    %108 = vector.broadcast %cst_50 : f32 to vector<64x128xf32>
    %109 = arith.mulf %108, %107 : vector<64x128xf32>
    %110 = math.tanh %109 : vector<64x128xf32>
    %cst_51 = arith.constant 1.000000e+00 : f32
    %111 = vector.broadcast %cst_51 : f32 to vector<64x128xf32>
    %112 = arith.addf %111, %110 : vector<64x128xf32>
    %113 = arith.mulf %102, %112 : vector<64x128xf32>
    %c0_52 = arith.constant 0 : index
    %c0_53 = arith.constant 0 : index
    %114 = vector.load %arg8[%c0_52, %c0_53] : memref<64x64xbf16, #tpu.memory_space<vmem>>, vector<64x64xbf16>
    %115 = arith.truncf %113 : vector<64x128xf32> to vector<64x128xbf16>
    %cst_54 = arith.constant dense<0.000000e+00> : vector<64x128xf32>
    %116 = tpu.matmul %114, %115, %cst_54 {dimension_numbers = #tpu.dot_dimension_numbers<[1], [0], [0], [1], [0, 0, 1, 1], [], []>} : vector<64x64xbf16>, vector<64x128xbf16>, vector<64x128xf32> -> vector<64x128xf32>
    %c0_55 = arith.constant 0 : index
    %c0_56 = arith.constant 0 : index
    %117 = vector.load %arg9[%c0_55, %c0_56] : memref<64x1xf32, #tpu.memory_space<vmem>>, vector<64x1xf32>
    %118 = vector.broadcast %117 : vector<64x1xf32> to vector<64x128xf32>
    %119 = arith.addf %116, %118 : vector<64x128xf32>
    %120 = vector.extract_strided_slice %0 {offsets = [2, 0, 0], sizes = [1, 64, 128], strides = [1, 1, 1]} : vector<4x64x128xf32> to vector<1x64x128xf32>
    %121 = vector.shape_cast %120 : vector<1x64x128xf32> to vector<64x128xf32>
    %122 = arith.addf %121, %119 : vector<64x128xf32>
    %c2 = arith.constant 2 : index
    %c0_57 = arith.constant 0 : index
    %c0_58 = arith.constant 0 : index
    %123 = vector.load %arg15[%c2, %c0_57, %c0_58] : memref<4x64x128xf32, #tpu.memory_space<vmem>>, vector<1x64x128xf32>
    %124 = vector.shape_cast %123 : vector<1x64x128xf32> to vector<64x128xf32>
    %125 = vector.shape_cast %122 : vector<64x128xf32> to vector<1x64x128xf32>
    tpu.vector_store %arg15[%c2, %c0_57, %c0_58], %125 {strides = array<i32>} : memref<4x64x128xf32, #tpu.memory_space<vmem>>, vector<1x64x128xf32>,
    %126 = vector.extract_strided_slice %26 {offsets = [3, 0, 0], sizes = [1, 64, 128], strides = [1, 1, 1]} : vector<4x64x128xf32> to vector<1x64x128xf32>
    %127 = vector.shape_cast %126 : vector<1x64x128xf32> to vector<64x128xf32>
    %128 = arith.truncf %127 : vector<64x128xf32> to vector<64x128xbf16>
    %c0_59 = arith.constant 0 : index
    %c0_60 = arith.constant 0 : index
    %129 = vector.load %arg6[%c0_59, %c0_60] : memref<64x64xbf16, #tpu.memory_space<vmem>>, vector<64x64xbf16>
    %cst_61 = arith.constant dense<0.000000e+00> : vector<64x128xf32>
    %130 = tpu.matmul %129, %128, %cst_61 {dimension_numbers = #tpu.dot_dimension_numbers<[1], [0], [0], [1], [0, 0, 1, 1], [], []>} : vector<64x64xbf16>, vector<64x128xbf16>, vector<64x128xf32> -> vector<64x128xf32>
    %c0_62 = arith.constant 0 : index
    %c0_63 = arith.constant 0 : index
    %131 = vector.load %arg7[%c0_62, %c0_63] : memref<64x1xf32, #tpu.memory_space<vmem>>, vector<64x1xf32>
    %132 = vector.broadcast %131 : vector<64x1xf32> to vector<64x128xf32>
    %133 = arith.addf %130, %132 : vector<64x128xf32>
    %cst_64 = arith.constant 5.000000e-01 : f32
    %134 = vector.broadcast %cst_64 : f32 to vector<64x128xf32>
    %135 = arith.mulf %134, %133 : vector<64x128xf32>
    %cst_65 = arith.constant 4.471500e-02 : f32
    %136 = vector.broadcast %cst_65 : f32 to vector<64x128xf32>
    %137 = arith.mulf %136, %133 : vector<64x128xf32>
    %138 = arith.mulf %137, %133 : vector<64x128xf32>
    %139 = arith.mulf %138, %133 : vector<64x128xf32>
    %140 = arith.addf %133, %139 : vector<64x128xf32>
    %cst_66 = arith.constant 0.797884583 : f32
    %141 = vector.broadcast %cst_66 : f32 to vector<64x128xf32>
    %142 = arith.mulf %141, %140 : vector<64x128xf32>
    %143 = math.tanh %142 : vector<64x128xf32>
    %cst_67 = arith.constant 1.000000e+00 : f32
    %144 = vector.broadcast %cst_67 : f32 to vector<64x128xf32>
    %145 = arith.addf %144, %143 : vector<64x128xf32>
    %146 = arith.mulf %135, %145 : vector<64x128xf32>
    %c0_68 = arith.constant 0 : index
    %c0_69 = arith.constant 0 : index
    %147 = vector.load %arg8[%c0_68, %c0_69] : memref<64x64xbf16, #tpu.memory_space<vmem>>, vector<64x64xbf16>
    %148 = arith.truncf %146 : vector<64x128xf32> to vector<64x128xbf16>
    %cst_70 = arith.constant dense<0.000000e+00> : vector<64x128xf32>
    %149 = tpu.matmul %147, %148, %cst_70 {dimension_numbers = #tpu.dot_dimension_numbers<[1], [0], [0], [1], [0, 0, 1, 1], [], []>} : vector<64x64xbf16>, vector<64x128xbf16>, vector<64x128xf32> -> vector<64x128xf32>
    %c0_71 = arith.constant 0 : index
    %c0_72 = arith.constant 0 : index
    %150 = vector.load %arg9[%c0_71, %c0_72] : memref<64x1xf32, #tpu.memory_space<vmem>>, vector<64x1xf32>
    %151 = vector.broadcast %150 : vector<64x1xf32> to vector<64x128xf32>
    %152 = arith.addf %149, %151 : vector<64x128xf32>
    %153 = vector.extract_strided_slice %0 {offsets = [3, 0, 0], sizes = [1, 64, 128], strides = [1, 1, 1]} : vector<4x64x128xf32> to vector<1x64x128xf32>
    %154 = vector.shape_cast %153 : vector<1x64x128xf32> to vector<64x128xf32>
    %155 = arith.addf %154, %152 : vector<64x128xf32>
    %c3 = arith.constant 3 : index
    %c0_73 = arith.constant 0 : index
    %c0_74 = arith.constant 0 : index
    %156 = vector.load %arg15[%c3, %c0_73, %c0_74] : memref<4x64x128xf32, #tpu.memory_space<vmem>>, vector<1x64x128xf32>
    %157 = vector.shape_cast %156 : vector<1x64x128xf32> to vector<64x128xf32>
    %158 = vector.shape_cast %155 : vector<64x128xf32> to vector<1x64x128xf32>
    tpu.vector_store %arg15[%c3, %c0_73, %c0_74], %158 {strides = array<i32>} : memref<4x64x128xf32, #tpu.memory_space<vmem>>, vector<1x64x128xf32>,
    %c0_75 = arith.constant 0 : index
    %c0_76 = arith.constant 0 : index
    %c0_77 = arith.constant 0 : index
    %159 = vector.load %arg15[%c0_75, %c0_76, %c0_77] : memref<4x64x128xf32, #tpu.memory_space<vmem>>, vector<4x64x128xf32>
    %c0_78 = arith.constant 0 : index
    %c0_79 = arith.constant 0 : index
    %160 = vector.load %arg4[%c0_78, %c0_79] : memref<1x128xf32, #tpu.memory_space<vmem>>, vector<1x128xf32>
    %c0_80 = arith.constant 0 : index
    %c0_81 = arith.constant 0 : index
    %161 = vector.load %arg5[%c0_80, %c0_81] : memref<1x128xf32, #tpu.memory_space<vmem>>, vector<1x128xf32>
    %cst_82 = arith.constant dense<0.000000e+00> : vector<4x64xf32>
    %162 = vector.multi_reduction <add>, %159, %cst_82 [2] : vector<4x64x128xf32> to vector<4x64xf32>
    %163 = vector.shape_cast %162 : vector<4x64xf32> to vector<4x64x1xf32>
    %cst_83 = arith.constant 1.280000e+02 : f32
    %164 = vector.broadcast %cst_83 : f32 to vector<4x64x1xf32>
    %165 = arith.divf %163, %164 : vector<4x64x1xf32>
    %166 = arith.mulf %159, %159 : vector<4x64x128xf32>
    %cst_84 = arith.constant dense<0.000000e+00> : vector<4x64xf32>
    %167 = vector.multi_reduction <add>, %166, %cst_84 [2] : vector<4x64x128xf32> to vector<4x64xf32>
    %168 = vector.shape_cast %167 : vector<4x64xf32> to vector<4x64x1xf32>
    %cst_85 = arith.constant 1.280000e+02 : f32
    %169 = vector.broadcast %cst_85 : f32 to vector<4x64x1xf32>
    %170 = arith.divf %168, %169 : vector<4x64x1xf32>
    %171 = arith.mulf %165, %165 : vector<4x64x1xf32>
    %172 = arith.subf %170, %171 : vector<4x64x1xf32>
    %173 = vector.broadcast %165 : vector<4x64x1xf32> to vector<4x64x128xf32>
    %174 = arith.subf %159, %173 : vector<4x64x128xf32>
    %cst_86 = arith.constant 9.99999974E-6 : f32
    %175 = vector.broadcast %cst_86 : f32 to vector<4x64x1xf32>
    %176 = arith.addf %172, %175 : vector<4x64x1xf32>
    %177 = math.rsqrt %176 : vector<4x64x1xf32>
    %178 = vector.broadcast %177 : vector<4x64x1xf32> to vector<4x64x128xf32>
    %179 = arith.mulf %174, %178 : vector<4x64x128xf32>
    %180 = vector.shape_cast %160 : vector<1x128xf32> to vector<1x1x128xf32>
    %181 = vector.broadcast %180 : vector<1x1x128xf32> to vector<4x64x128xf32>
    %182 = arith.mulf %179, %181 : vector<4x64x128xf32>
    %183 = vector.shape_cast %161 : vector<1x128xf32> to vector<1x1x128xf32>
    %184 = vector.broadcast %183 : vector<1x1x128xf32> to vector<4x64x128xf32>
    %185 = arith.addf %182, %184 : vector<4x64x128xf32>
    %186 = vector.shape_cast %185 : vector<4x64x128xf32> to vector<256x128xf32>
    %187 = arith.truncf %186 : vector<256x128xf32> to vector<256x128xbf16>
    %c0_87 = arith.constant 0 : index
    %c0_88 = arith.constant 0 : index
    %188 = vector.load %arg10[%c0_87, %c0_88] : memref<128x256xbf16, #tpu.memory_space<vmem>>, vector<128x256xbf16>
    %cst_89 = arith.constant dense<0.000000e+00> : vector<256x256xf32>
    %189 = tpu.matmul %187, %188, %cst_89 {dimension_numbers = #tpu.dot_dimension_numbers<[1], [0], [0], [1], [0, 0, 1, 1], [], []>} : vector<256x128xbf16>, vector<128x256xbf16>, vector<256x256xf32> -> vector<256x256xf32>
    %c0_90 = arith.constant 0 : index
    %c0_91 = arith.constant 0 : index
    %190 = vector.load %arg11[%c0_90, %c0_91] : memref<1x256xf32, #tpu.memory_space<vmem>>, vector<1x256xf32>
    %191 = vector.broadcast %190 : vector<1x256xf32> to vector<256x256xf32>
    %192 = arith.addf %189, %191 : vector<256x256xf32>
    %cst_92 = arith.constant 5.000000e-01 : f32
    %193 = vector.broadcast %cst_92 : f32 to vector<256x256xf32>
    %194 = arith.mulf %193, %192 : vector<256x256xf32>
    %cst_93 = arith.constant 4.471500e-02 : f32
    %195 = vector.broadcast %cst_93 : f32 to vector<256x256xf32>
    %196 = arith.mulf %195, %192 : vector<256x256xf32>
    %197 = arith.mulf %196, %192 : vector<256x256xf32>
    %198 = arith.mulf %197, %192 : vector<256x256xf32>
    %199 = arith.addf %192, %198 : vector<256x256xf32>
    %cst_94 = arith.constant 0.797884583 : f32
    %200 = vector.broadcast %cst_94 : f32 to vector<256x256xf32>
    %201 = arith.mulf %200, %199 : vector<256x256xf32>
    %202 = math.tanh %201 : vector<256x256xf32>
    %cst_95 = arith.constant 1.000000e+00 : f32
    %203 = vector.broadcast %cst_95 : f32 to vector<256x256xf32>
    %204 = arith.addf %203, %202 : vector<256x256xf32>
    %205 = arith.mulf %194, %204 : vector<256x256xf32>
    %206 = arith.truncf %205 : vector<256x256xf32> to vector<256x256xbf16>
    %c0_96 = arith.constant 0 : index
    %c0_97 = arith.constant 0 : index
    %207 = vector.load %arg12[%c0_96, %c0_97] : memref<256x128xbf16, #tpu.memory_space<vmem>>, vector<256x128xbf16>
    %cst_98 = arith.constant dense<0.000000e+00> : vector<256x128xf32>
    %208 = tpu.matmul %206, %207, %cst_98 {dimension_numbers = #tpu.dot_dimension_numbers<[1], [0], [0], [1], [0, 0, 1, 1], [], []>} : vector<256x256xbf16>, vector<256x128xbf16>, vector<256x128xf32> -> vector<256x128xf32>
    %c0_99 = arith.constant 0 : index
    %c0_100 = arith.constant 0 : index
    %209 = vector.load %arg13[%c0_99, %c0_100] : memref<1x128xf32, #tpu.memory_space<vmem>>, vector<1x128xf32>
    %210 = vector.broadcast %209 : vector<1x128xf32> to vector<256x128xf32>
    %211 = arith.addf %208, %210 : vector<256x128xf32>
    %212 = vector.shape_cast %211 : vector<256x128xf32> to vector<4x64x128xf32>
    %213 = arith.addf %159, %212 : vector<4x64x128xf32>
    %c0_101 = arith.constant 0 : index
    %c0_102 = arith.constant 0 : index
    %c0_103 = arith.constant 0 : index
    %214 = vector.load %arg14[%c0_101, %c0_102, %c0_103] : memref<4x64x128xf32, #tpu.memory_space<vmem>>, vector<4x64x128xf32>
    tpu.vector_store %arg14[%c0_101, %c0_102, %c0_103], %213 {strides = array<i32>} : memref<4x64x128xf32, #tpu.memory_space<vmem>>, vector<4x64x128xf32>,
    return
  }
  func.func @transform_0(%arg0: i32) -> (i32, i32, i32) {
    %c0_i32 = arith.constant 0 : i32
    %c0_i32_0 = arith.constant 0 : i32
    %c0_i32_1 = arith.constant 0 : i32
    return %arg0, %c0_i32, %c0_i32_0 : i32, i32, i32
  }
  func.func @transform_1(%arg0: i32) -> (i32, i32) {
    %c0_i32 = arith.constant 0 : i32
    %c0_i32_0 = arith.constant 0 : i32
    %c0_i32_1 = arith.constant 0 : i32
    return %c0_i32, %c0_i32_0 : i32, i32
  }
  func.func @transform_2(%arg0: i32) -> (i32, i32) {
    %c0_i32 = arith.constant 0 : i32
    %c0_i32_0 = arith.constant 0 : i32
    %c0_i32_1 = arith.constant 0 : i32
    return %c0_i32, %c0_i32_0 : i32, i32
  }
  func.func @transform_3(%arg0: i32) -> (i32, i32) {
    %c0_i32 = arith.constant 0 : i32
    %c0_i32_0 = arith.constant 0 : i32
    %c0_i32_1 = arith.constant 0 : i32
    return %c0_i32, %c0_i32_0 : i32, i32
  }
  func.func @transform_4(%arg0: i32) -> (i32, i32) {
    %c0_i32 = arith.constant 0 : i32
    %c0_i32_0 = arith.constant 0 : i32
    %c0_i32_1 = arith.constant 0 : i32
    return %c0_i32, %c0_i32_0 : i32, i32
  }
  func.func @transform_5(%arg0: i32) -> (i32, i32) {
    %c0_i32 = arith.constant 0 : i32
    %c0_i32_0 = arith.constant 0 : i32
    %c0_i32_1 = arith.constant 0 : i32
    return %c0_i32, %c0_i32_0 : i32, i32
  }
  func.func @transform_6(%arg0: i32) -> (i32, i32) {
    %c0_i32 = arith.constant 0 : i32
    %c0_i32_0 = arith.constant 0 : i32
    %c0_i32_1 = arith.constant 0 : i32
    return %c0_i32, %c0_i32_0 : i32, i32
  }
  func.func @transform_7(%arg0: i32) -> (i32, i32) {
    %c0_i32 = arith.constant 0 : i32
    %c0_i32_0 = arith.constant 0 : i32
    %c0_i32_1 = arith.constant 0 : i32
    return %c0_i32, %c0_i32_0 : i32, i32
  }
  func.func @transform_8(%arg0: i32) -> (i32, i32) {
    %c0_i32 = arith.constant 0 : i32
    %c0_i32_0 = arith.constant 0 : i32
    %c0_i32_1 = arith.constant 0 : i32
    return %c0_i32, %c0_i32_0 : i32, i32
  }
  func.func @transform_9(%arg0: i32) -> (i32, i32) {
    %c0_i32 = arith.constant 0 : i32
    %c0_i32_0 = arith.constant 0 : i32
    %c0_i32_1 = arith.constant 0 : i32
    return %c0_i32, %c0_i32_0 : i32, i32
  }
  func.func @transform_10(%arg0: i32) -> (i32, i32) {
    %c0_i32 = arith.constant 0 : i32
    %c0_i32_0 = arith.constant 0 : i32
    %c0_i32_1 = arith.constant 0 : i32
    return %c0_i32, %c0_i32_0 : i32, i32
  }
  func.func @transform_11(%arg0: i32) -> (i32, i32) {
    %c0_i32 = arith.constant 0 : i32
    %c0_i32_0 = arith.constant 0 : i32
    %c0_i32_1 = arith.constant 0 : i32
    return %c0_i32, %c0_i32_0 : i32, i32
  }
  func.func @transform_12(%arg0: i32) -> (i32, i32) {
    %c0_i32 = arith.constant 0 : i32
    %c0_i32_0 = arith.constant 0 : i32
    %c0_i32_1 = arith.constant 0 : i32
    return %c0_i32, %c0_i32_0 : i32, i32
  }
  func.func @transform_13(%arg0: i32) -> (i32, i32, i32) {
    %c0_i32 = arith.constant 0 : i32
    %c0_i32_0 = arith.constant 0 : i32
    %c0_i32_1 = arith.constant 0 : i32
    return %arg0, %c0_i32, %c0_i32_0 : i32, i32, i32
  }
}

</mosaic_0001>

<bundles_post_ra>
// kernel: tpu_custom_call.1
= control target key start
LH: loop header
LB: loop body
LE: loop exit
PB: predicated region body
PF: predicated region fallthrough
CT: control target
= control target key end

     0   :  { %s8133_s0 = inlined_call_operand.hbm [shape: f32[8,64,128], index: 0, kind: input, shape index: {}]   ;;  %s8134_s1 = inlined_call_operand.vmem [shape: f32[1,128], index: 1, kind: input, shape index: {}]   ;;  %s8135_s2 = inlined_call_operand.vmem [shape: f32[1,128], index: 2, kind: input, shape index: {}]   ;;  %s8136_s3 = inlined_call_operand.hbm [shape: f32[1,128], index: 3, kind: input, shape index: {}]   ;;  %s8137_s4 = inlined_call_operand.hbm [shape: f32[1,128], index: 4, kind: input, shape index: {}]   ;;  %s8138_s5 = inlined_call_operand.vmem [shape: bf16[64,64], index: 5, kind: input, shape index: {}]   ;;  %s8139_s6 = inlined_call_operand.vmem [shape: f32[64,1], index: 6, kind: input, shape index: {}]   ;;  %s8140_s7 = inlined_call_operand.hbm [shape: bf16[64,64], index: 7, kind: input, shape index: {}]   ;;  %s8141_s8 = inlined_call_operand.vmem [shape: f32[64,1], index: 8, kind: input, shape index: {}]   ;;  %s8142_s9 = inlined_call_operand.vmem [shape: bf16[128,256], index: 9, kind: input, shape index: {}]   ;;  %s8143_s10 = inlined_call_operand.vmem [shape: f32[1,256], index: 10, kind: input, shape index: {}]   ;;  %s8144_s11 = inlined_call_operand.hbm [shape: bf16[256,128], index: 11, kind: input, shape index: {}]   ;;  %s8145_s12 = inlined_call_operand.vmem [shape: f32[1,128], index: 12, kind: input, shape index: {}]   ;;  %s8146_s13 = inlined_call_operand.hbm [shape: f32[8,64,128], index: 13, kind: output, shape index: {}]  }
   0x1   :  { %8173 = sst [smem:[#allocation36_spill]] %s8136_s3 }
   0x2   :  { %8174 = sst [smem:[#allocation37_spill]] %s8143_s10 }
   0x3   :  { %8175 = sst [smem:[#allocation38_spill]] %s8145_s12 }
   0x4   :  { %8176 = sst [smem:[#allocation39_spill]] %s8146_s13 }
   0x5   :  { %18 = vsyncpa [#allocation4], 0 }
   0x6   :  { %20 = vsyncpa [#allocation4 + $0x1], 0 }
   0x7   :  { %21 = vsyncpa [#allocation7], 0 }
   0x8   :  { %22 = vsyncpa [#allocation10], 0 }
   0x9   :  { %23 = vsyncpa [#allocation5], 0 }
   0xa   :  { %25 = vsyncpa [#allocation5 + $0x1], 0  ;;  %s5853_s25 = smov 0   ;;  %s5855_s26 = smov 0  }
   0xb   :  { %s5857_s27 = smov 0   ;;  %s5859_s28 = smov 0  }
   0xc LB: > { %8177 = sst [smem:[#allocation17_spill]] %s5756_s25  ;;  %s5874_s29 = sadd.s32 4294967295, %s5768_s28   ;;  %s5768_s28 = sphi %s5859_s28, %s8240_s28   ;;  %s5764_s27 = sphi %s5857_s27, %s8239_s27   ;;  %s5760_s26 = sphi %s5855_s26, %s8238_s26   ;;  %s5756_s25 = sphi %s5853_s25, %s8237_s25  }
   0xd   : > { %s4593_s30 = sadd.s32 4294967294, %s5768_s28   ;;  %p51_p0 = scmp.ne.s32.totalorder %s5760_s26, %s5756_s25 }
   0xe   : > { %p8150_p1 = scmp.eq.s32.totalorder %s5874_s29, 0  ;;  %p333_p3 = scmp.eq.s32.totalorder %s4593_s30, 1 }
   0xf   : > { %p4594_p5 = scmp.ge.s32.totalorder %s5768_s28, 1  ;;  %p340_p7 = scmp.lt.s32.totalorder %s5768_s28, 3 }
  0x10   : > { %p5883_p4 = por %p8150_p1, %p51_p0  ;;  %p5888_p6 = por %p333_p3, %p51_p0 }
  0x11   : > { %p5893_p8 = pnand %p4594_p5, %p340_p7  ;;  %s5770_s17 = smov [#allocation6]  }
  0x12   : > { %s8178_s14 = scalar_select %p5883_p4, 1, 0 }
  0x13   : > { %s8179_s15 = scalar_select %p5888_p6, 1, 0 }
  0x14   : > { %s8181_s16 = scalar_select %p5893_p8, 1, 0 }
  0x15   : > { %8180 = sst [smem:[#allocation18_spill]] %s8179_s15  ;;  %s359_s18 = sshll.u32 %s5770_s17, 4  ;;  %s360_s18 = int_to_ptr.vmem [resolvable:$true] %s359_s18 }
  0x16   : > { %p5046_p10 = pneg %p5893_p8  ;;  %s5771_s19 = smov [#allocation9]  }
  0x17   : > { %s386_s20 = sshll.u32 %s5771_s19, 4  ;;  %s5772_s22 = smov [#allocation8]   ;;  %s5906_s20 = int_to_ptr.vmem [resolvable:$true] %s386_s20 }
  0x18   : > { %p5902_p11 = pnand %p5046_p10, %p8150_p1  ;;  %s5908_s23 = sshll.u32 %s5772_s22, 4  ;;  %s371_s23 = int_to_ptr.vmem [resolvable:$true] %s5908_s23 }
  0x19   : > { %s8183_s3 = sld [smem:[#allocation36_spill]] }
  0x1a   : > { %p5918_p13 = pneg %p5902_p11 }
  0x1f   : > { %s5552_s17 = scalar_lea.hbm %s8183_s3, 16 }
  0x20   : > { %p5553_p12 = scmp.ne.s32.totalorder %s8183_s3, %s5552_s17  ;;  %p5559_p5 = scmp.lt.u32.totalorder %s5552_s17, %s8183_s3 }
  0x22   : > { %p5555_p0 = pnand %p5918_p13, %p5553_p12 }
  0x24   : > { %p5556_p3 = pneg %p5555_p0 }
  0x26   : > { %p5561_p7 = pnand %p5559_p5, %p5556_p3 }
  0x28   : > { %5564 = shalt.err (!%p5561_p7)
}
  0x29   : > { %s5565_s24 = scalar_lea.vmem %s360_s18, 16  ;;  %s5572_s25 = scalar_lea.vmem %s360_s18, 32 }
  0x2a   : > { %p5566_p10 = scmp.ne.s32.totalorder %s360_s18, %s5565_s24  ;;  %p5573_p2 = scmp.lt.s32.totalorder %s360_s18, %s360_s18 }
  0x2b   : > { %p5574_p6 = scmp.lt.s32.totalorder %s5572_s25, %s5565_s24 }
  0x2c   : > { %p5568_p9 = pnand %p5566_p10, %p5918_p13 }
  0x2d   : > { %p5575_p4 = por %p5574_p6, %p5573_p2 }
  0x2e   : > { %p5569_p1 = pneg %p5568_p9 }
  0x30   : > { %p5576_p8 = pnand %p5575_p4, %p5569_p1 }
  0x32   : > { %5579 = shalt.err (!%p5576_p8)
}
  0x33   : > { %5049 = dma.hbm_to_vmem [thread:$0]  (!%p5902_p11), %s8183_s3, 16, %s360_s18, [#allocation7]  }
  0x34   : > { %s5580_s22 = scalar_lea.hbm %s8140_s7, 512 }
  0x35   : > { %p5581_p9 = scmp.ne.s32.totalorder %s8140_s7, %s5580_s22  ;;  %p5587_p1 = scmp.lt.u32.totalorder %s5580_s22, %s8140_s7 }
  0x37   : > { %p5583_p12 = pnand %p5581_p9, %p5918_p13 }
  0x39   : > { %p5584_p2 = pneg %p5583_p12 }
  0x3b   : > { %p5589_p4 = pnand %p5587_p1, %p5584_p2 }
  0x3d   : > { %5592 = shalt.err (!%p5589_p4)
}
  0x3e   : > { %s5593_s18 = scalar_lea.vmem %s5906_s20, 512  ;;  %p5601_p3 = scmp.lt.s32.totalorder %s5906_s20, %s5906_s20 }
  0x3f   : > { %p5594_p6 = scmp.ne.s32.totalorder %s5906_s20, %s5593_s18  ;;  %p5602_p5 = scmp.lt.s32.totalorder %s5593_s18, %s5593_s18 }
  0x41   : > { %p5596_p8 = pnand %p5594_p6, %p5918_p13  ;;  %p5603_p7 = por %p5602_p5, %p5601_p3 }
  0x43   : > { %p5597_p0 = pneg %p5596_p8 }
  0x45   : > { %p5604_p10 = pnand %p5603_p7, %p5597_p0 }
  0x47   : > { %5607 = shalt.err (!%p5604_p10)
}
  0x48   : > { %s8153_s10 = smov 64   ;;  %s5774_s12 = smov 4  }
  0x49   : > { %5055 = dma.hbm_to_vmem [thread:$0]  (!%p5902_p11), %s8140_s7, 512, %s5906_s20, [#allocation10], %s8153_s10, %s8153_s10, %s5774_s12  }
  0x4a   : > { %s5608_s22 = scalar_lea.hbm %s8137_s4, 16 }
  0x4b   : > { %p5609_p9 = scmp.ne.s32.totalorder %s8137_s4, %s5608_s22  ;;  %p5615_p1 = scmp.lt.u32.totalorder %s5608_s22, %s8137_s4 }
  0x4d   : > { %p5611_p12 = pnand %p5609_p9, %p5918_p13 }
  0x4f   : > { %p5612_p2 = pneg %p5611_p12 }
  0x51   : > { %p5617_p4 = pnand %p5615_p1, %p5612_p2 }
  0x53   : > { %5620 = shalt.err (!%p5617_p4)
}
  0x54   : > { %s5621_s15 = scalar_lea.vmem %s371_s23, 16  ;;  %s5628_s20 = scalar_lea.vmem %s371_s23, 32 }
  0x55   : > { %p5622_p6 = scmp.ne.s32.totalorder %s371_s23, %s5621_s15  ;;  %p5629_p3 = scmp.lt.s32.totalorder %s371_s23, %s371_s23 }
  0x56   : > { %p5630_p5 = scmp.lt.s32.totalorder %s5628_s20, %s5621_s15 }
  0x57   : > { %p5624_p8 = pnand %p5622_p6, %p5918_p13 }
  0x58   : > { %p5631_p7 = por %p5630_p5, %p5629_p3 }
  0x59   : > { %p5625_p0 = pneg %p5624_p8 }
  0x5b   : > { %p5632_p10 = pnand %p5631_p7, %p5625_p0 }
  0x5d   : > { %5635 = shalt.err (!%p5632_p10)
}
  0x5e   : > { %5052 = dma.hbm_to_vmem [thread:$0]  (!%p5902_p11), %s8137_s4, 16, %s371_s23, [#allocation7]  }
  0x5f   : > { %s5775_s3 = smov [#allocation11]   ;;  %s5636_s25 = scalar_lea.hbm %s8144_s11, 2048 }
  0x60   : > { %s408_s17 = sshll.u32 %s5775_s3, 4  ;;  %p5637_p9 = scmp.ne.s32.totalorder %s8144_s11, %s5636_s25  ;;  %s409_s17 = int_to_ptr.vmem [resolvable:$true] %s408_s17 }
  0x61   : > { %p5643_p1 = scmp.lt.u32.totalorder %s5636_s25, %s8144_s11 }
  0x62   : > { %p5639_p12 = pnand %p5637_p9, %p5918_p13 }
  0x64   : > { %p5640_p2 = pneg %p5639_p12 }
  0x66   : > { %p5645_p4 = pnand %p5643_p1, %p5640_p2 }
  0x68   : > { %5648 = shalt.err (!%p5645_p4)
}
  0x69   : > { %s5649_s23 = scalar_lea.vmem %s409_s17, 2048  ;;  %p5657_p3 = scmp.lt.s32.totalorder %s409_s17, %s409_s17 }
  0x6a   : > { %p5650_p6 = scmp.ne.s32.totalorder %s409_s17, %s5649_s23  ;;  %p5658_p5 = scmp.lt.s32.totalorder %s5649_s23, %s5649_s23 }
  0x6c   : > { %p5652_p8 = pnand %p5650_p6, %p5918_p13  ;;  %p5659_p7 = por %p5658_p5, %p5657_p3 }
  0x6e   : > { %p5653_p0 = pneg %p5652_p8 }
  0x70   : > { %p5660_p10 = pnand %p5659_p7, %p5653_p0 }
  0x72   : > { %5663 = shalt.err (!%p5660_p10)
}
  0x73   : > { %s8185_s10 = smov 64   ;;  %s6001_s19 = sadd.s32 1, %s5768_s28  }
  0x74   : > { %5058 = dma.hbm_to_vmem [thread:$0]  (!%p5902_p11), %s8144_s11, 2048, %s409_s17, [#allocation10], %s8185_s10, %s8185_s10, %s5774_s12  }
  0x75   : > { %s38_s21 = sadd.s32 1, %s5764_s27  ;;  %s35_s3 = ssub.s32 %s5768_s28, %s6001_s19 }
  0x76   : > { %p45_p13 = scmp.ne.s32.totalorder %s5764_s27, %s5760_s26  ;;  %p36_p9 = scmp.eq.s32.totalorder %s35_s3, 0 }
  0x77   : > { %p46_p12 = scmp.eq.s32.totalorder %s5768_s28, 0  ;;  %p8186_p2 = scmp.eq.s32.totalorder %s5874_s29, 1 }
  0x78   : > { %p5071_p4 = scmp.lt.s32.totalorder %s5768_s28, 2  ;;  %s425_s25 = sand.u32 1, %s5764_s27  }
  0x79   : > { %p6011_p1 = por %p8186_p2, %p45_p13  ;;  %p47_p6 = por %p46_p12, %p45_p13 }
  0x7a   : > { %s6017_s24 = scalar_select %p36_p9, %s5764_s27, %s38_s21  }
  0x7b   : > { %s4600_s18 = sshll.u32 %s425_s25, 8  ;;  %s4719_s12 = sshll.u32 %s5768_s28, 12 }
  0x7c   : > { %s6024_s20 = scalar_lea.hbm %s8133_s0, %s4719_s12  ;;  %s429_s23 = scalar_lea.vmem [#allocation3], %s4600_s18 }
  0x7d   : > { %s437_s10 = sshll.u32 %s429_s23, 4  ;;  %p6028_p11 = pnand %p5071_p4, %p47_p6  ;;  %s6026_s10 = int_to_ptr.vmem [resolvable:$true] %s437_s10 }
  0x7e   : > { %s6032_s13 = scalar_lea.sflag [#allocation4], %s425_s25  ;;  %s5664_s21 = scalar_lea.hbm %s6024_s20, 4096 }
  0x7f   : > { %p5665_p8 = scmp.ne.s32.totalorder %s6024_s20, %s5664_s21  ;;  %p5666_p0 = pneg %p6028_p11 }
  0x80   : > { %s5669_s12 = scalar_lea.hbm %s8133_s0, 8192  ;;  %p5670_p7 = scmp.lt.u32.totalorder %s6024_s20, %s8133_s0 }
  0x81   : > { %p5667_p3 = pnand %p5666_p0, %p5665_p8  ;;  %p5671_p10 = scmp.lt.u32.totalorder %s5669_s12, %s5664_s21 }
  0x82   : > { %p5673_p9 = scmp.lt.u32.totalorder %s5664_s21, %s6024_s20 }
  0x83   : > { %p5668_p5 = pneg %p5667_p3  ;;  %p5672_p13 = por %p5671_p10, %p5670_p7 }
  0x85   : > { %p5674_p12 = por %p5673_p9, %p5672_p13 }
  0x87   : > { %p5675_p2 = pnand %p5674_p12, %p5668_p5 }
  0x89   : > { %5678 = shalt.err (!%p5675_p2)
}
  0x8a   : > { %s5679_s25 = scalar_lea.vmem %s6026_s10, 4096  ;;  %s5776_s23 = smov [#allocation3]  }
  0x8b   : > { %p5680_p4 = scmp.ne.s32.totalorder %s6026_s10, %s5679_s25  ;;  %s5684_s3 = sshll.u32 %s5776_s23, 4  ;;  %s5685_s3 = int_to_ptr.vmem [resolvable:$false] %s5684_s3 }
  0x8c   : > { %s5686_s18 = scalar_lea.vmem %s5685_s3, 8192  ;;  %p5687_p3 = scmp.lt.s32.totalorder %s6026_s10, %s5685_s3 }
  0x8d   : > { %p5682_p6 = pnand %p5680_p4, %p5666_p0  ;;  %p5688_p7 = scmp.lt.s32.totalorder %s5686_s18, %s5679_s25 }
  0x8f   : > { %p5683_p8 = pneg %p5682_p6  ;;  %p5689_p10 = por %p5688_p7, %p5687_p3 }
  0x91   : > { %p5690_p13 = pnand %p5689_p10, %p5683_p8 }
  0x93   : > { %5693 = shalt.err (!%p5690_p13)
}
  0x94   : > { %s5777_s21 = smov 128   ;;  %s5778_s12 = smov 8  }
  0x95   : > { %5062 = dma.hbm_to_vmem [thread:$0]  (!%p6028_p11), %s6024_s20, 4096, %s6026_s10, %s6032_s13, %s5777_s21, %s5777_s21, %s5778_s12  }
  0x96   : > { %p8189_p0 = scmp.ne.s32.totalorder %s8181_s16, 0 }
  0x98   : > { %449 = sbr.rel (%p8189_p0) target bundleno = 1700 (0x6a4), region = 72 }
  0x9f   : > { %s6063_s17 = sand.u32 1, %s5760_s26   ;;  %p8190_p5 = scmp.ne.s32.totalorder %s8178_s14, 0 }
  0xa0   : > { %s4605_s15 = sshll.u32 %s6063_s17, 8  ;;  %s452_s25 = scalar_lea.sflag [#allocation4], %s6063_s17 }
  0xa1   : > { %s6069_s23 = scalar_lea.vmem [#allocation3], %s4605_s15 }
  0xa2   : > { %5739 = dma.done.wait (%p8190_p5), %s452_s25, 4096  }
  0xa3   : > { %5741 = vsyncadd (%p8190_p5), %s452_s25, 4294963200  ;;  %p8191_p11 = scmp.eq.s32.totalorder %s5874_s29, 0 }
  0xa5   : > { %5743 = dma.done.wait (%p8191_p11), [#allocation7], 32   ;;  %p8192_p9 = pmov %p8191_p11 }
  0xa7   : > { %5745 = vsyncadd (%p8192_p9), [#allocation7], 4294967264  ;;  %p8193_p12 = pmov %p8192_p9 }
  0xa8   : > { %p8194_p2 = pmov %p8192_p9 }
  0xa9   : > { %5747 = dma.done.wait (%p8193_p12), [#allocation10], 2560  }
  0xaa   : > { %5749 = vsyncadd (%p8194_p2), [#allocation10], 4294964736  ;;  %v6084_v0 = vld [vmem:[%s6069_s23 + $0x18] sm:$0xff]  ;;  %v6087_v1 = vld [vmem:[%s6069_s23] sm:$0xff]  ;;  %v8154_v10 = vmov 0   ;;  %vm1124_vm0 = vcmask 523264  }
  0xab   : > { %557 = vadd.xlane.f32.xlu1 %v6084_v0  ;;  %551 = vadd.xlane.f32.xlu0 %v6087_v1  ;;  %v648_v2 = vmul.f32 %v6087_v1, %v6087_v1  ;;  %v6094_v3 = vld [vmem:[%s6069_s23 + $0x8] sm:$0xff]  ;;  %v6100_v5 = vld [vmem:[%s6069_s23 + $0x10] sm:$0xff]  ;;  %v651_v7 = vmul.f32 %v6084_v0, %v6084_v0  ;;  %v6108_v8 = vld [vmem:[%s6069_s23 + $0x20] sm:$0xff]  ;;  %s8213_s3 = sld [smem:[#allocation37_spill]]  ;;  %s8214_s12 = sld [smem:[#allocation38_spill]] }
  0xac   : > { %v649_v4 = vmul.f32 %v6094_v3, %v6094_v3  ;;  %v650_v6 = vmul.f32 %v6100_v5, %v6100_v5  ;;  %v6111_v9 = vld [vmem:[%s6069_s23 + $0x28] sm:$0xff]  ;;  %5121 = vset.pattern.permute.xlu1 %v8154_v10  ;;  %5120 = vset.pattern.permute.xlu0 %v8154_v10  ;;  %v652_v11 = vmul.f32 %v6108_v8, %v6108_v8  ;;  %v6122_v13 = vld [vmem:[%s6069_s23 + $0x30] sm:$0xff]  ;;  %v6125_v14 = vld [vmem:[%s6069_s23 + $0x38] sm:$0xff]  ;;  %s7987_s25 = scalar_lea.vmem [#allocation12], %s4605_s15  ;;  %s4721_s15 = sshll.u32 %s5874_s29, 12 }
  0xad   : > { %v653_v12 = vmul.f32 %v6111_v9, %v6111_v9  ;;  %v654_v15 = vmul.f32 %v6122_v13, %v6122_v13  ;;  %v655_v16 = vmul.f32 %v6125_v14, %v6125_v14  ;;  %v6134_v17 = vld [vmem:[%s6069_s23 + $0x40] sm:$0xff]  ;;  %v6137_v18 = vld [vmem:[%s6069_s23 + $0x48] sm:$0xff]  ;;  %v6146_v21 = vld [vmem:[%s6069_s23 + $0x50] sm:$0xff]  ;;  %s4482_s14 = sshll.u32 %s7987_s25, 4  ;;  %s8231_s10 = sld [smem:[#allocation39_spill]]  ;;  %s8086_s14 = int_to_ptr.vmem [resolvable:$true] %s4482_s14 }
  0xae   : > { %v656_v19 = vmul.f32 %v6134_v17, %v6134_v17  ;;  %v657_v20 = vmul.f32 %v6137_v18, %v6137_v18  ;;  %v6149_v22 = vld [vmem:[%s6069_s23 + $0x58] sm:$0xff]  ;;  %v658_v23 = vmul.f32 %v6146_v21, %v6146_v21  ;;  %v6158_v25 = vld [vmem:[%s6069_s23 + $0x60] sm:$0xff]  ;;  %v6161_v26 = vld [vmem:[%s6069_s23 + $0x68] sm:$0xff]  ;;  %s4468_s29 = scalar_lea.sflag [#allocation5], %s6063_s17  ;;  %s5780_s13 = smov [#allocation12]  }
  0xaf   : > { %553 = vadd.xlane.f32.xlu0 %v6094_v3  ;;  %680 = vadd.xlane.f32.xlu1 %v648_v2  ;;  %v659_v24 = vmul.f32 %v6149_v22, %v6149_v22  ;;  %v660_v27 = vmul.f32 %v6158_v25, %v6158_v25  ;;  %v661_v28 = vmul.f32 %v6161_v26, %v6161_v26  ;;  %v6170_v29 = vld [vmem:[%s6069_s23 + $0x70] sm:$0xff]  ;;  %v6173_v30 = vld [vmem:[%s6069_s23 + $0x78] sm:$0xff]  ;;  %v6182_v33 = vld [vmem:[%s6069_s23 + $0x80] sm:$0xff] }
  0xb0   : > { %v662_v31 = vmul.f32 %v6170_v29, %v6170_v29  ;;  %v663_v32 = vmul.f32 %v6173_v30, %v6173_v30  ;;  %v6185_v34 = vld [vmem:[%s6069_s23 + $0x88] sm:$0xff]  ;;  %v664_v35 = vmul.f32 %v6182_v33, %v6182_v33  ;;  %v6194_v37 = vld [vmem:[%s6069_s23 + $0x90] sm:$0xff]  ;;  %v6197_v38 = vld [vmem:[%s6069_s23 + $0x98] sm:$0xff] }
  0xb1   : > { %v665_v36 = vmul.f32 %v6185_v34, %v6185_v34  ;;  %v5122_v39 = vld [vmem:[%s8138_s5] sm:$0xff]   ;;  %v666_v40 = vmul.f32 %v6194_v37, %v6194_v37  ;;  %v667_v41 = vmul.f32 %v6197_v38, %v6197_v38  ;;  %v6213_v43 = vld [vmem:[%s6069_s23 + $0xa8] sm:$0xff]  ;;  %v6222_v46 = vld [vmem:[%s6069_s23 + $0xb0] sm:$0xff] }
  0xb2   : > { %4906 = vmatprep.mubr.msk.bf16.mxu0 %vm1124_vm0, %v5122_v39  ;;  %v6210_v42 = vld [vmem:[%s6069_s23 + $0xa0] sm:$0xff]  ;;  %v669_v45 = vmul.f32 %v6213_v43, %v6213_v43  ;;  %v6225_v47 = vld [vmem:[%s6069_s23 + $0xb8] sm:$0xff]  ;;  %v670_v48 = vmul.f32 %v6222_v46, %v6222_v46  ;;  %v6237_v51 = vld [vmem:[%s6069_s23 + $0xc8] sm:$0xff] }
  0xb3   : > { %555 = vadd.xlane.f32.xlu0 %v6100_v5  ;;  %682 = vadd.xlane.f32.xlu1 %v649_v4  ;;  %v668_v44 = vmul.f32 %v6210_v42, %v6210_v42  ;;  %v671_v49 = vmul.f32 %v6225_v47, %v6225_v47  ;;  %v6234_v50 = vld [vmem:[%s6069_s23 + $0xc0] sm:$0xff]  ;;  %v673_v53 = vmul.f32 %v6237_v51, %v6237_v51  ;;  %v543_v54 = vld [vmem:[%s6069_s23 + $0xd0] sm:$0xff]  ;;  %v544_v55 = vld [vmem:[%s6069_s23 + $0xd8] sm:$0xff]  ;;  %s8084_s30 = scalar_lea.hbm %s8231_s10, %s4721_s15 }
  0xb4   : > { %v672_v52 = vmul.f32 %v6234_v50, %v6234_v50  ;;  %v674_v56 = vmul.f32 %v543_v54, %v543_v54  ;;  %v675_v57 = vmul.f32 %v544_v55, %v544_v55  ;;  %v545_v58 = vld [vmem:[%s6069_s23 + $0xe0] sm:$0xff]  ;;  %v546_v59 = vld [vmem:[%s6069_s23 + $0xe8] sm:$0xff]  ;;  %v547_v62 = vld [vmem:[%s6069_s23 + $0xf0] sm:$0xff] }
  0xb5   : > { %v676_v60 = vmul.f32 %v545_v58, %v545_v58  ;;  %v677_v61 = vmul.f32 %v546_v59, %v546_v59  ;;  %v548_v63 = vld [vmem:[%s6069_s23 + $0xf8] sm:$0xff]  ;;  %v678_v2 = vmul.f32 %v547_v62, %v547_v62 }
  0xb6   : > { %v679_v4 = vmul.f32 %v548_v63, %v548_v63 }
  0xb7   : > { %684 = vadd.xlane.f32.xlu0 %v650_v6  ;;  %686 = vadd.xlane.f32.xlu1 %v651_v7  ;;  %v6254_v6 = vld [vmem:[%s8139_s6 + $0x8] sm:$0xff] }
  0xbb   : > { %559 = vadd.xlane.f32.xlu0 %v6108_v8  ;;  %561 = vadd.xlane.f32.xlu1 %v6111_v9 }
  0xbf   : > { %688 = vadd.xlane.f32.xlu0 %v652_v11  ;;  %690 = vadd.xlane.f32.xlu1 %v653_v12 }
  0xc3   : > { %563 = vadd.xlane.f32.xlu0 %v6122_v13  ;;  %565 = vadd.xlane.f32.xlu1 %v6125_v14 }
  0xc7   : > { %692 = vadd.xlane.f32.xlu0 %v654_v15  ;;  %694 = vadd.xlane.f32.xlu1 %v655_v16  ;;  %v6260_v15 = vld [vmem:[%s8139_s6 + $0x10] sm:$0xff] }
  0xcb   : > { %567 = vadd.xlane.f32.xlu0 %v6134_v17  ;;  %569 = vadd.xlane.f32.xlu1 %v6137_v18 }
  0xcf   : > { %696 = vadd.xlane.f32.xlu0 %v656_v19  ;;  %698 = vadd.xlane.f32.xlu1 %v657_v20  ;;  %v6266_v20 = vld [vmem:[%s8139_s6] sm:$0xff] }
  0xd3   : > { %571 = vadd.xlane.f32.xlu0 %v6146_v21  ;;  %573 = vadd.xlane.f32.xlu1 %v6149_v22 }
  0xd7   : > { %700 = vadd.xlane.f32.xlu0 %v658_v23  ;;  %702 = vadd.xlane.f32.xlu1 %v659_v24 }
  0xdb   : > { %575 = vadd.xlane.f32.xlu0 %v6158_v25  ;;  %577 = vadd.xlane.f32.xlu1 %v6161_v26 }
  0xdf   : > { %704 = vadd.xlane.f32.xlu0 %v660_v27  ;;  %706 = vadd.xlane.f32.xlu1 %v661_v28  ;;  %v6273_v28 = vld [vmem:[%s8139_s6 + $0x18] sm:$0xff] }
  0xe3   : > { %579 = vadd.xlane.f32.xlu0 %v6170_v29  ;;  %581 = vadd.xlane.f32.xlu1 %v6173_v30 }
  0xe7   : > { %708 = vadd.xlane.f32.xlu0 %v662_v31  ;;  %710 = vadd.xlane.f32.xlu1 %v663_v32 }
  0xeb   : > { %583 = vadd.xlane.f32.xlu0 %v6182_v33  ;;  %585 = vadd.xlane.f32.xlu1 %v6185_v34 }
  0xef   : > { %712 = vadd.xlane.f32.xlu0 %v664_v35  ;;  %714 = vadd.xlane.f32.xlu1 %v665_v36 }
  0xf3   : > { %587 = vadd.xlane.f32.xlu0 %v6194_v37  ;;  %589 = vadd.xlane.f32.xlu1 %v6197_v38 }
  0xf7   : > { %716 = vadd.xlane.f32.xlu0 %v666_v40  ;;  %718 = vadd.xlane.f32.xlu1 %v667_v41 }
  0xfb   : > { %591 = vadd.xlane.f32.xlu0 %v6210_v42  ;;  %593 = vadd.xlane.f32.xlu1 %v6213_v43 }
  0xff   : > { %720 = vadd.xlane.f32.xlu0 %v668_v44  ;;  %722 = vadd.xlane.f32.xlu1 %v669_v45  ;;  %v6286_v45 = vld [vmem:[%s8139_s6 + $0x20] sm:$0xff] }
 0x103   : > { %595 = vadd.xlane.f32.xlu0 %v6222_v46  ;;  %597 = vadd.xlane.f32.xlu1 %v6225_v47 }
 0x107   : > { %724 = vadd.xlane.f32.xlu0 %v670_v48  ;;  %726 = vadd.xlane.f32.xlu1 %v671_v49 }
 0x10b   : > { %599 = vadd.xlane.f32.xlu0 %v6234_v50  ;;  %601 = vadd.xlane.f32.xlu1 %v6237_v51 }
 0x10f   : > { %728 = vadd.xlane.f32.xlu0 %v672_v52  ;;  %730 = vadd.xlane.f32.xlu1 %v673_v53 }
 0x113   : > { %603 = vadd.xlane.f32.xlu0 %v543_v54  ;;  %605 = vadd.xlane.f32.xlu1 %v544_v55 }
 0x117   : > { %732 = vadd.xlane.f32.xlu0 %v674_v56  ;;  %734 = vadd.xlane.f32.xlu1 %v675_v57 }
 0x11b   : > { %607 = vadd.xlane.f32.xlu0 %v545_v58  ;;  %609 = vadd.xlane.f32.xlu1 %v546_v59  ;;  %v6297_v58 = vld [vmem:[%s8139_s6 + $0x28] sm:$0xff] }
 0x11f   : > { %736 = vadd.xlane.f32.xlu0 %v676_v60  ;;  %738 = vadd.xlane.f32.xlu1 %v677_v61 }
 0x123   : > { %611 = vadd.xlane.f32.xlu0 %v547_v62  ;;  %613 = vadd.xlane.f32.xlu1 %v548_v63  ;;  %v6304_v63 = vld [vmem:[%s8139_s6 + $0x30] sm:$0xff] }
 0x127   : > { %740 = vadd.xlane.f32.xlu0 %v678_v2  ;;  %742 = vadd.xlane.f32.xlu1 %v679_v4 }
 0x138   : > { %v558_v7 = vpop.xlane.xlu1 %557  ;;  %v552_v11 = vpop.xlane.xlu0 %551  ;;  %1071 = vperm.xlu1 %5121, %v6254_v6  }
 0x139   : > { %v616_v12 = vmul.f32 0.0078125, %v552_v11  ;;  %v6276_v32 = vmul.f32 0.0078125, %v558_v7 }
 0x13b   : > { %v776_v23 = vmul.f32 %v616_v12, %v616_v12  ;;  %v779_v49 = vmul.f32 %v6276_v32, %v6276_v32 }
 0x13c   : > { %v554_v16 = vpop.xlane.xlu0 %553  ;;  %v681_v19 = vpop.xlane.xlu1 %680  ;;  %1076 = vperm.xlu1 %5121, %v6260_v15  }
 0x13d   : > { %v6268_v24 = vmul.f32 0.0078125, %v554_v16  ;;  %v744_v27 = vmul.f32 0.0078125, %v681_v19  ;;  %1066 = vperm.xlu0 %5120, %v6266_v20   ;;  %v840_v16 = vsub.f32 %v6087_v1, %v616_v12 }
 0x13f   : > { %v808_v31 = vsub.f32 %v744_v27, %v776_v23  ;;  %v777_v39 = vmul.f32 %v6268_v24, %v6268_v24  ;;  %v6316_v27 = vld [vmem:[%s8139_s6 + $0x38] sm:$0xff] }
 0x140   : > { %v556_v35 = vpop.xlane.xlu0 %555  ;;  %v683_v36 = vpop.xlane.xlu1 %682  ;;  %1081 = vperm.xlu1 %5121, %v6273_v28  }
 0x141   : > { %v872_v40 = vadd.f32 1e-05, %v808_v31  ;;  %v6281_v41 = vmul.f32 0.0078125, %v556_v35  ;;  %v745_v44 = vmul.f32 0.0078125, %v683_v36  ;;  %1474 = vperm.xlu0 %5120, %v6254_v6  }
 0x143   : > { %5194 = vrsqrt.f32 %v872_v40  ;;  %v809_v48 = vsub.f32 %v745_v44, %v777_v39  ;;  %v778_v54 = vmul.f32 %v6281_v41, %v6281_v41 }
 0x144   : > { %v685_v52 = vpop.xlane.xlu0 %684  ;;  %v687_v53 = vpop.xlane.xlu1 %686  ;;  %1086 = vperm.xlu1 %5121, %v6286_v45  }
 0x145   : > { %v873_v55 = vadd.f32 1e-05, %v809_v48  ;;  %v746_v56 = vmul.f32 0.0078125, %v685_v52  ;;  %v747_v57 = vmul.f32 0.0078125, %v687_v53  ;;  %1484 = vperm.xlu0 %5120, %v6273_v28   ;;  %v6326_v48 = vld [vmem:[%s8134_s1] ss:$0 sm:$0xff] }
 0x147   : > { %5196 = vrsqrt.f32 %v873_v55  ;;  %v810_v59 = vsub.f32 %v746_v56, %v778_v54  ;;  %v811_v60 = vsub.f32 %v747_v57, %v779_v49  ;;  %v841_v49 = vsub.f32 %v6094_v3, %v6268_v24  ;;  %v6340_v3 = vld [vmem:[%s8135_s2] ss:$0 sm:$0xff] }
 0x148   : > { %v560_v61 = vpop.xlane.xlu0 %559  ;;  %v562_v62 = vpop.xlane.xlu1 %561  ;;  %1091 = vperm.xlu1 %5121, %v6297_v58   ;;  %v843_v24 = vsub.f32 %v6084_v0, %v6276_v32 }
 0x149   : > { %v874_v2 = vadd.f32 1e-05, %v810_v59  ;;  %v875_v4 = vadd.f32 1e-05, %v811_v60  ;;  %v6306_v7 = vmul.f32 0.0078125, %v560_v61  ;;  %v6308_v11 = vmul.f32 0.0078125, %v562_v62  ;;  %1494 = vperm.xlu0 %5120, %v6297_v58  }
 0x14a   : > { %v842_v62 = vsub.f32 %v6100_v5, %v6281_v41 }
 0x14b   : > { %5198 = vrsqrt.f32 %v874_v2  ;;  %v780_v35 = vmul.f32 %v6306_v7, %v6306_v7  ;;  %v781_v36 = vmul.f32 %v6308_v11, %v6308_v11 }
 0x14c   : > { %5200 = vrsqrt.f32 %v875_v4  ;;  %v689_v19 = vpop.xlane.xlu0 %688  ;;  %v691_v23 = vpop.xlane.xlu1 %690  ;;  %1096 = vperm.xlu1 %5121, %v6304_v63  }
 0x14d   : > { %v5195_v31 = vpop.eup %5194  ;;  %v748_v39 = vmul.f32 0.0078125, %v689_v19  ;;  %v749_v40 = vmul.f32 0.0078125, %v691_v23  ;;  %1504 = vperm.xlu0 %5120, %v6316_v27  }
 0x14e   : > { %v936_v1 = vmul.f32 %v5195_v31, %v840_v16 }
 0x14f   : > { %v812_v12 = vsub.f32 %v748_v39, %v780_v35  ;;  %v813_v44 = vsub.f32 %v749_v40, %v781_v36 }
 0x150   : > { %v564_v52 = vpop.xlane.xlu0 %563  ;;  %v566_v53 = vpop.xlane.xlu1 %565  ;;  %1101 = vperm.xlu1 %5121, %v6316_v27   ;;  %v974_v61 = vmul.f32 %v6326_v48, %v936_v1 }
 0x151   : > { %v5197_v54 = vpop.eup %5196  ;;  %v876_v55 = vadd.f32 1e-05, %v812_v12  ;;  %v877_v56 = vadd.f32 1e-05, %v813_v44  ;;  %v6331_v57 = vmul.f32 0.0078125, %v564_v52  ;;  %v6333_v59 = vmul.f32 0.0078125, %v566_v53  ;;  %1877 = vperm.xlu0 %5120, %v6254_v6  }
 0x152   : > { %v937_v60 = vmul.f32 %v5197_v54, %v841_v49  ;;  %v1012_v5 = vadd.f32 %v6340_v3, %v974_v61 }
 0x153   : > { %5202 = vrsqrt.f32 %v876_v55  ;;  %v782_v23 = vmul.f32 %v6331_v57, %v6331_v57  ;;  %v783_v31 = vmul.f32 %v6333_v59, %v6333_v59 }
 0x154   : > { %5204 = vrsqrt.f32 %v877_v56  ;;  %v693_v2 = vpop.xlane.xlu0 %692  ;;  %v695_v4 = vpop.xlane.xlu1 %694  ;;  %1469 = vperm.xlu1 %5121, %v6266_v20   ;;  %v975_v16 = vmul.f32 %v6326_v48, %v937_v60 }
 0x155   : > { %v5199_v19 = vpop.eup %5198  ;;  %v750_v35 = vmul.f32 0.0078125, %v693_v2  ;;  %v751_v36 = vmul.f32 0.0078125, %v695_v4  ;;  %1887 = vperm.xlu0 %5120, %v6273_v28  }
 0x156   : > { %v5201_v0 = vpop.eup %5200  ;;  %v1013_v32 = vadd.f32 %v6340_v3, %v975_v16  ;;  %v938_v41 = vmul.f32 %v5199_v19, %v842_v62  ;;  %v845_v62 = vsub.f32 %v6111_v9, %v6308_v11 }
 0x157   : > { %v814_v39 = vsub.f32 %v750_v35, %v782_v23  ;;  %v815_v40 = vsub.f32 %v751_v36, %v783_v31  ;;  %v939_v1 = vmul.f32 %v5201_v0, %v843_v24  ;;  %v844_v24 = vsub.f32 %v6108_v8, %v6306_v7 }
 0x158   : > { %v568_v12 = vpop.xlane.xlu0 %567  ;;  %v570_v44 = vpop.xlane.xlu1 %569  ;;  %1479 = vperm.xlu1 %5121, %v6260_v15   ;;  %v1044_v49 = vpack.c.bf16 %v1013_v32, %v1012_v5  ;;  %v976_v52 = vmul.f32 %v6326_v48, %v938_v41 }
 0x159   : > { %v878_v53 = vadd.f32 1e-05, %v814_v39  ;;  %v879_v54 = vadd.f32 1e-05, %v815_v40  ;;  %v6357_v55 = vmul.f32 0.0078125, %v568_v12  ;;  %v6359_v56 = vmul.f32 0.0078125, %v570_v44  ;;  %1897 = vperm.xlu0 %5120, %v6297_v58  }
 0x15a   : > { %4898 = vmatprep.subr.bf16.mxu0 %v1044_v49  ;;  %v977_v60 = vmul.f32 %v6326_v48, %v939_v1  ;;  %v1014_v61 = vadd.f32 %v6340_v3, %v976_v52 }
 0x15b   : > { %5206 = vrsqrt.f32 %v878_v53  ;;  %4899 = vmatpush3.bf16.msra.mxu0 %v1044_v49  ;;  %v784_v23 = vmul.f32 %v6357_v55, %v6357_v55  ;;  %v785_v31 = vmul.f32 %v6359_v56, %v6359_v56  ;;  %v846_v53 = vsub.f32 %v6122_v13, %v6331_v57 }
 0x15c   : > { %5208 = vrsqrt.f32 %v879_v54  ;;  %v697_v2 = vpop.xlane.xlu0 %696  ;;  %v699_v4 = vpop.xlane.xlu1 %698  ;;  %1489 = vperm.xlu1 %5121, %v6286_v45   ;;  %v1015_v16 = vadd.f32 %v6340_v3, %v977_v60  ;;  %v847_v54 = vsub.f32 %v6125_v14, %v6333_v59 }
 0x15d   : > { %v5203_v19 = vpop.eup %5202  ;;  %v752_v35 = vmul.f32 0.0078125, %v697_v2  ;;  %v753_v36 = vmul.f32 0.0078125, %v699_v4  ;;  %1907 = vperm.xlu0 %5120, %v6316_v27  }
 0x15e   : > { %v5205_v8 = vpop.eup %5204  ;;  %v1045_v9 = vpack.c.bf16 %v1015_v16, %v1014_v61  ;;  %v940_v7 = vmul.f32 %v5203_v19, %v844_v24 }
 0x15f   : > { %v816_v11 = vsub.f32 %v752_v35, %v784_v23  ;;  %v817_v0 = vsub.f32 %v753_v36, %v785_v31  ;;  %v941_v5 = vmul.f32 %v5205_v8, %v845_v62 }
 0x160   : > { %4900 = vmatprep.subr.bf16.mxu0 %v1045_v9  ;;  %v572_v32 = vpop.xlane.xlu0 %571  ;;  %v574_v41 = vpop.xlane.xlu1 %573  ;;  %1499 = vperm.xlu1 %5121, %v6304_v63   ;;  %v978_v39 = vmul.f32 %v6326_v48, %v940_v7 }
 0x161   : > { %v880_v40 = vadd.f32 1e-05, %v816_v11  ;;  %v881_v1 = vadd.f32 1e-05, %v817_v0  ;;  %4901 = vmatpush3.bf16.msra.mxu0 %v1045_v9  ;;  %v6377_v12 = vmul.f32 0.0078125, %v572_v32  ;;  %v6379_v44 = vmul.f32 0.0078125, %v574_v41  ;;  %2280 = vperm.xlu0 %5120, %v6254_v6  }
 0x162   : > { %v979_v49 = vmul.f32 %v6326_v48, %v941_v5  ;;  %v1016_v52 = vadd.f32 %v6340_v3, %v978_v39  ;;  %v848_v5 = vsub.f32 %v6134_v17, %v6357_v55  ;;  %v849_v32 = vsub.f32 %v6137_v18, %v6359_v56  ;;  %v6418_v56 = vld [vmem:[%s8141_s8 + $0x8] sm:$0xff] }
 0x163   : > { %5210 = vrsqrt.f32 %v880_v40  ;;  %v786_v6 = vmul.f32 %v6377_v12, %v6377_v12  ;;  %v787_v2 = vmul.f32 %v6379_v44, %v6379_v44 }
 0x164   : > { %5212 = vrsqrt.f32 %v881_v1  ;;  %v701_v60 = vpop.xlane.xlu0 %700  ;;  %v703_v61 = vpop.xlane.xlu1 %702  ;;  %1872 = vperm.xlu1 %5121, %v6266_v20   ;;  %v1017_v24 = vadd.f32 %v6340_v3, %v979_v49 }
 0x165   : > { %v5207_v62 = vpop.eup %5206  ;;  %v754_v4 = vmul.f32 0.0078125, %v701_v60  ;;  %v755_v16 = vmul.f32 0.0078125, %v703_v61  ;;  %2290 = vperm.xlu0 %5120, %v6273_v28  }
 0x166   : > { %v5209_v13 = vpop.eup %5208  ;;  %v1046_v14 = vpack.c.bf16 %v1017_v24, %v1016_v52  ;;  %v942_v57 = vmul.f32 %v5207_v62, %v846_v53 }
 0x167   : > { %v818_v59 = vsub.f32 %v754_v4, %v786_v6  ;;  %v819_v19 = vsub.f32 %v755_v16, %v787_v2  ;;  %v943_v23 = vmul.f32 %v5209_v13, %v847_v54  ;;  %v5124_v2 = vld [vmem:[%s8138_s5 + $0x10] sm:$0xff]  }
 0x168   : > { %4902 = vmatprep.subr.bf16.mxu0 %v1046_v14  ;;  %v576_v31 = vpop.xlane.xlu0 %575  ;;  %v578_v35 = vpop.xlane.xlu1 %577  ;;  %1882 = vperm.xlu1 %5121, %v6260_v15   ;;  %v980_v36 = vmul.f32 %v6326_v48, %v942_v57 }
 0x169   : > { %v882_v8 = vadd.f32 1e-05, %v818_v59  ;;  %v883_v9 = vadd.f32 1e-05, %v819_v19  ;;  %4903 = vmatpush3.bf16.msra.mxu0 %v1046_v14  ;;  %v6397_v7 = vmul.f32 0.0078125, %v576_v31  ;;  %v6399_v11 = vmul.f32 0.0078125, %v578_v35  ;;  %2300 = vperm.xlu0 %5120, %v6297_v58  }
 0x16a   : > { %v981_v28 = vmul.f32 %v6326_v48, %v943_v23  ;;  %v1018_v0 = vadd.f32 %v6340_v3, %v980_v36  ;;  %v6438_v19 = vld [vmem:[%s8141_s8 + $0x18] sm:$0xff]  ;;  %v850_v23 = vsub.f32 %v6146_v21, %v6377_v12  ;;  %v851_v31 = vsub.f32 %v6149_v22, %v6379_v44 }
 0x16b   : > { %5214 = vrsqrt.f32 %v882_v8  ;;  %v788_v58 = vmul.f32 %v6397_v7, %v6397_v7  ;;  %v789_v49 = vmul.f32 %v6399_v11, %v6399_v11 }
 0x16c   : > { %5216 = vrsqrt.f32 %v883_v9  ;;  %v705_v41 = vpop.xlane.xlu0 %704  ;;  %v707_v39 = vpop.xlane.xlu1 %706  ;;  %1892 = vperm.xlu1 %5121, %v6286_v45   ;;  %v1019_v40 = vadd.f32 %v6340_v3, %v981_v28 }
 0x16d   : > { %v5211_v1 = vpop.eup %5210  ;;  %v756_v52 = vmul.f32 0.0078125, %v705_v41  ;;  %v757_v53 = vmul.f32 0.0078125, %v707_v39  ;;  %2310 = vperm.xlu0 %5120, %v6316_v27   ;;  %v5123_v27 = vld [vmem:[%s8138_s5 + $0x8] sm:$0xff]  }
 0x16e   : > { %v5213_v17 = vpop.eup %5212  ;;  %v1047_v18 = vpack.c.bf16 %v1019_v40, %v1018_v0  ;;  %v944_v55 = vmul.f32 %v5211_v1, %v848_v5 }
 0x16f   : > { %v820_v54 = vsub.f32 %v756_v52, %v788_v58  ;;  %v821_v60 = vsub.f32 %v757_v53, %v789_v49  ;;  %v945_v61 = vmul.f32 %v5213_v17, %v849_v32  ;;  %v5125_v58 = vld [vmem:[%s8138_s5 + $0x18] sm:$0xff]   ;;  %v5126_v52 = vld [vmem:[%s8138_s5] sm:$0xff]  }
 0x170   : > { %4904 = vmatprep.subr.bf16.mxu0 %v1047_v18  ;;  %v580_v24 = vpop.xlane.xlu0 %579  ;;  %v582_v62 = vpop.xlane.xlu1 %581  ;;  %1902 = vperm.xlu1 %5121, %v6304_v63   ;;  %v982_v6 = vmul.f32 %v6326_v48, %v944_v55 }
 0x171   : > { %v884_v4 = vadd.f32 1e-05, %v820_v54  ;;  %v885_v16 = vadd.f32 1e-05, %v821_v60  ;;  %4905 = vmatpush3.bf16.msra.mxu0 %v1047_v18  ;;  %v6428_v13 = vmul.f32 0.0078125, %v580_v24  ;;  %v6430_v14 = vmul.f32 0.0078125, %v582_v62  ;;  %1301 = vperm.xlu0 %5120, %v6418_v56  }
 0x172   : > { %v983_v57 = vmul.f32 %v6326_v48, %v945_v61  ;;  %v1020_v59 = vadd.f32 %v6340_v3, %v982_v6  ;;  %v6476_v60 = vld [vmem:[%s8141_s8 + $0x38] sm:$0xff]  ;;  %v852_v62 = vsub.f32 %v6158_v25, %v6397_v7 }
 0x173   : > { %5218 = vrsqrt.f32 %v884_v4  ;;  %v790_v28 = vmul.f32 %v6428_v13, %v6428_v13  ;;  %v791_v0 = vmul.f32 %v6430_v14, %v6430_v14 }
 0x174   : > { %5220 = vrsqrt.f32 %v885_v16  ;;  %4907 = vmatmul.mubr.msk.bf16.vlgmr.msra.gmra.mrb[0].mxu0 %vm1124_vm0, %v5123_v27  ;;  %v709_v35 = vpop.xlane.xlu0 %708  ;;  %v711_v36 = vpop.xlane.xlu1 %710  ;;  %2275 = vperm.xlu1 %5121, %v6266_v20   ;;  %v1021_v8 = vadd.f32 %v6340_v3, %v983_v57  ;;  %v6456_v20 = vld [vmem:[%s8141_s8 + $0x28] sm:$0xff]  ;;  %v853_v16 = vsub.f32 %v6161_v26, %v6399_v11  ;;  %v6495_v26 = vld [vmem:[%s8141_s8] sm:$0xff] }
 0x175   : > { %v5215_v9 = vpop.eup %5214  ;;  %v758_v21 = vmul.f32 0.0078125, %v709_v35  ;;  %v759_v12 = vmul.f32 0.0078125, %v711_v36  ;;  %4910 = vmatprep.mubr.msk.bf16.mxu0 %vm1124_vm0, %v5124_v2  ;;  %1311 = vperm.xlu0 %5120, %v6438_v19  }
 0x176   : > { %v5217_v22 = vpop.eup %5216  ;;  %v1447_v44 = vpack.c.bf16 %v1021_v8, %v1020_v59  ;;  %v946_v5 = vmul.f32 %v5215_v9, %v850_v23 }
 0x177   : > { %v822_v32 = vsub.f32 %v758_v21, %v790_v28  ;;  %v823_v41 = vsub.f32 %v759_v12, %v791_v0  ;;  %v947_v39 = vmul.f32 %v5217_v22, %v851_v31 }
 0x178   : > { %4930 = vmatprep.subr.bf16.mxu0 %v1447_v44  ;;  %v584_v40 = vpop.xlane.xlu0 %583  ;;  %v586_v1 = vpop.xlane.xlu1 %585  ;;  %2285 = vperm.xlu1 %5121, %v6260_v15   ;;  %v984_v49 = vmul.f32 %v6326_v48, %v946_v5  ;;  %v854_v5 = vsub.f32 %v6170_v29, %v6428_v13 }
 0x179   : > { %v886_v53 = vadd.f32 1e-05, %v822_v32  ;;  %v887_v17 = vadd.f32 1e-05, %v823_v41  ;;  %4931 = vmatpush3.bf16.msra.mxu0 %v1447_v44  ;;  %v6466_v18 = vmul.f32 0.0078125, %v584_v40  ;;  %v6468_v55 = vmul.f32 0.0078125, %v586_v1  ;;  %1321 = vperm.xlu0 %5120, %v6456_v20  }
 0x17a   : > { %v985_v15 = vmul.f32 %v6326_v48, %v947_v39  ;;  %v1022_v54 = vadd.f32 %v6340_v3, %v984_v49  ;;  %v855_v1 = vsub.f32 %v6173_v30, %v6430_v14  ;;  %v6525_v30 = vld [vmem:[%s8141_s8 + $0x20] sm:$0xff] }
 0x17b   : > { %5222 = vrsqrt.f32 %v886_v53  ;;  %v792_v61 = vmul.f32 %v6466_v18, %v6466_v18  ;;  %v793_v24 = vmul.f32 %v6468_v55, %v6468_v55 }
 0x17c   : > { %5224 = vrsqrt.f32 %v887_v17  ;;  %4911 = vmatmul.mubr.msk.bf16.gmra.mrb[4].mxu0 %vm1124_vm0, %v5125_v58  ;;  %v713_v27 = vpop.xlane.xlu0 %712  ;;  %v715_v6 = vpop.xlane.xlu1 %714  ;;  %2295 = vperm.xlu1 %5121, %v6286_v45   ;;  %v1023_v2 = vadd.f32 %v6340_v3, %v985_v15 }
 0x17d   : > { %v5219_v4 = vpop.eup %5218  ;;  %v760_v57 = vmul.f32 0.0078125, %v713_v27  ;;  %v761_v59 = vmul.f32 0.0078125, %v715_v6  ;;  %4938 = vmatprep.mubr.msk.bf16.mxu0 %vm1124_vm0, %v5126_v52  ;;  %1331 = vperm.xlu0 %5120, %v6476_v60   ;;  %v6518_v52 = vld [vmem:[%s8141_s8 + $0x10] sm:$0xff] }
 0x17e   : > { %v5221_v25 = vpop.eup %5220  ;;  %v1448_v7 = vpack.c.bf16 %v1023_v2, %v1022_v54  ;;  %v948_v23 = vmul.f32 %v5219_v4, %v852_v62  ;;  %v856_v4 = vsub.f32 %v6182_v33, %v6466_v18 }
 0x17f   : > { %v824_v31 = vsub.f32 %v760_v57, %v792_v61  ;;  %v825_v35 = vsub.f32 %v761_v59, %v793_v24  ;;  %v949_v36 = vmul.f32 %v5221_v25, %v853_v16  ;;  %v857_v59 = vsub.f32 %v6185_v34, %v6468_v55  ;;  %v6548_v34 = vld [vmem:[%s8141_s8 + $0x30] sm:$0xff] }
 0x180   : > { %4932 = vmatprep.subr.bf16.mxu0 %v1448_v7  ;;  %v588_v45 = vpop.xlane.xlu0 %587  ;;  %v590_v8 = vpop.xlane.xlu1 %589  ;;  %2305 = vperm.xlu1 %5121, %v6304_v63   ;;  %v986_v11 = vmul.f32 %v6326_v48, %v948_v23 }
 0x181   : > { %v888_v9 = vadd.f32 1e-05, %v824_v31  ;;  %v889_v28 = vadd.f32 1e-05, %v825_v35  ;;  %4933 = vmatpush3.bf16.msra.mxu0 %v1448_v7  ;;  %v6498_v0 = vmul.f32 0.0078125, %v588_v45  ;;  %v6500_v21 = vmul.f32 0.0078125, %v590_v8  ;;  %1703 = vperm.xlu0 %5120, %v6418_v56  }
 0x182   : > { %v987_v12 = vmul.f32 %v6326_v48, %v949_v36  ;;  %v1024_v63 = vadd.f32 %v6340_v3, %v986_v11 }
 0x183   : > { %5226 = vrsqrt.f32 %v888_v9  ;;  %v794_v22 = vmul.f32 %v6498_v0, %v6498_v0  ;;  %v795_v44 = vmul.f32 %v6500_v21, %v6500_v21 }
 0x184   : > { %5228 = vrsqrt.f32 %v889_v28  ;;  %v717_v32 = vpop.xlane.xlu0 %716  ;;  %v719_v41 = vpop.xlane.xlu1 %718  ;;  %1296 = vperm.xlu1 %5121, %v6495_v26   ;;  %v1025_v39 = vadd.f32 %v6340_v3, %v987_v12 }
 0x185   : > { %v5223_v40 = vpop.eup %5222  ;;  %v762_v58 = vmul.f32 0.0078125, %v717_v32  ;;  %v763_v49 = vmul.f32 0.0078125, %v719_v41  ;;  %1713 = vperm.xlu0 %5120, %v6438_v19  }
 0x186   : > { %v5225_v29 = vpop.eup %5224  ;;  %v1449_v13 = vpack.c.bf16 %v1025_v39, %v1024_v63  ;;  %v950_v53 = vmul.f32 %v5223_v40, %v854_v5 }
 0x187   : > { %v826_v17 = vsub.f32 %v762_v58, %v794_v22  ;;  %v827_v15 = vsub.f32 %v763_v49, %v795_v44  ;;  %v951_v54 = vmul.f32 %v5225_v29, %v855_v1  ;;  %v5127_v22 = vld [vmem:[%s8138_s5 + $0x8] sm:$0xff]   ;;  %v5128_v44 = vld [vmem:[%s8138_s5 + $0x10] sm:$0xff]   ;;  %v858_v1 = vsub.f32 %v6194_v37, %v6498_v0 }
 0x188   : > { %4934 = vmatprep.subr.bf16.mxu0 %v1449_v13  ;;  %v592_v61 = vpop.xlane.xlu0 %591  ;;  %v594_v24 = vpop.xlane.xlu1 %593  ;;  %1306 = vperm.xlu1 %5121, %v6518_v52   ;;  %v988_v14 = vmul.f32 %v6326_v48, %v950_v53  ;;  %v859_v29 = vsub.f32 %v6197_v38, %v6500_v21 }
 0x189   : > { %v890_v62 = vadd.f32 1e-05, %v826_v17  ;;  %v891_v27 = vadd.f32 1e-05, %v827_v15  ;;  %4935 = vmatpush3.bf16.msra.mxu0 %v1449_v13  ;;  %v6528_v6 = vmul.f32 0.0078125, %v592_v61  ;;  %v6530_v2 = vmul.f32 0.0078125, %v594_v24  ;;  %1723 = vperm.xlu0 %5120, %v6456_v20  }
 0x18a   : > { %v989_v16 = vmul.f32 %v6326_v48, %v951_v54  ;;  %v1026_v57 = vadd.f32 %v6340_v3, %v988_v14 }
 0x18b   : > { %5230 = vrsqrt.f32 %v890_v62  ;;  %v796_v25 = vmul.f32 %v6528_v6, %v6528_v6  ;;  %v797_v7 = vmul.f32 %v6530_v2, %v6530_v2 }
 0x18c   : > { %5232 = vrsqrt.f32 %v891_v27  ;;  %v721_v23 = vpop.xlane.xlu0 %720  ;;  %v723_v31 = vpop.xlane.xlu1 %722  ;;  %1316 = vperm.xlu1 %5121, %v6525_v30   ;;  %v1027_v33 = vadd.f32 %v6340_v3, %v989_v16 }
 0x18d   : > { %v5227_v18 = vpop.eup %5226  ;;  %v764_v35 = vmul.f32 0.0078125, %v721_v23  ;;  %v765_v36 = vmul.f32 0.0078125, %v723_v31  ;;  %1733 = vperm.xlu0 %5120, %v6476_v60  }
 0x18e   : > { %v5229_v55 = vpop.eup %5228  ;;  %v1450_v45 = vpack.c.bf16 %v1027_v33, %v1026_v57  ;;  %v952_v8 = vmul.f32 %v5227_v18, %v856_v4  ;;  %v5129_v57 = vld [vmem:[%s8138_s5 + $0x18] sm:$0xff]   ;;  %v860_v18 = vsub.f32 %v6210_v42, %v6528_v6 }
 0x18f   : > { %v828_v11 = vsub.f32 %v764_v35, %v796_v25  ;;  %v829_v9 = vsub.f32 %v765_v36, %v797_v7  ;;  %v953_v28 = vmul.f32 %v5229_v55, %v857_v59  ;;  %v5130_v25 = vld [vmem:[%s8138_s5] sm:$0xff]   ;;  %v861_v55 = vsub.f32 %v6213_v43, %v6530_v2 }
 0x190   : > { %4936 = vmatprep.subr.bf16.mxu0 %v1450_v45  ;;  %v596_v12 = vpop.xlane.xlu0 %595  ;;  %v598_v63 = vpop.xlane.xlu1 %597  ;;  %1326 = vperm.xlu1 %5121, %v6548_v34   ;;  %v990_v5 = vmul.f32 %v6326_v48, %v952_v8 }
 0x191   : > { %v892_v32 = vadd.f32 1e-05, %v828_v11  ;;  %v893_v41 = vadd.f32 1e-05, %v829_v9  ;;  %4937 = vmatpush3.bf16.msra.mxu0 %v1450_v45  ;;  %v6559_v39 = vmul.f32 0.0078125, %v596_v12  ;;  %v6561_v40 = vmul.f32 0.0078125, %v598_v63  ;;  %2106 = vperm.xlu0 %5120, %v6418_v56  }
 0x192   : > { %v991_v58 = vmul.f32 %v6326_v48, %v953_v28  ;;  %v1028_v49 = vadd.f32 %v6340_v3, %v990_v5 }
 0x193   : > { %5234 = vrsqrt.f32 %v892_v32  ;;  %v798_v13 = vmul.f32 %v6559_v39, %v6559_v39  ;;  %v799_v53 = vmul.f32 %v6561_v40, %v6561_v40 }
 0x194   : > { %5236 = vrsqrt.f32 %v893_v41  ;;  %4939 = vmatmul.mubr.msk.bf16.vlgmr.msra.gmra.mrb[8].mxu0 %vm1124_vm0, %v5127_v22  ;;  %v725_v17 = vpop.xlane.xlu0 %724  ;;  %v727_v15 = vpop.xlane.xlu1 %726  ;;  %1698 = vperm.xlu1 %5121, %v6495_v26   ;;  %v1029_v37 = vadd.f32 %v6340_v3, %v991_v58 }
 0x195   : > { %v5231_v0 = vpop.eup %5230  ;;  %v766_v54 = vmul.f32 0.0078125, %v725_v17  ;;  %v767_v61 = vmul.f32 0.0078125, %v727_v15  ;;  %4942 = vmatprep.mubr.msk.bf16.mxu0 %vm1124_vm0, %v5128_v44  ;;  %2111 = vperm.xlu0 %5120, %v6518_v52  }
 0x196   : > { %v5233_v38 = vpop.eup %5232  ;;  %v1850_v21 = vpack.c.bf16 %v1029_v37, %v1028_v49  ;;  %v954_v24 = vmul.f32 %v5231_v0, %v858_v1 }
 0x197   : > { %v830_v14 = vsub.f32 %v766_v54, %v798_v13  ;;  %v831_v62 = vsub.f32 %v767_v61, %v799_v53  ;;  %v955_v27 = vmul.f32 %v5233_v38, %v859_v29  ;;  %v862_v53 = vsub.f32 %v6222_v46, %v6559_v39 }
 0x198   : > { %v600_v4 = vpop.xlane.xlu0 %599  ;;  %v602_v16 = vpop.xlane.xlu1 %601  ;;  %1708 = vperm.xlu1 %5121, %v6518_v52   ;;  %4962 = vmatprep.subr.bf16.mxu0 %v1850_v21  ;;  %v992_v59 = vmul.f32 %v6326_v48, %v954_v24 }
 0x199   : > { %v894_v7 = vadd.f32 1e-05, %v830_v14  ;;  %v895_v23 = vadd.f32 1e-05, %v831_v62  ;;  %v6587_v31 = vmul.f32 0.0078125, %v600_v4  ;;  %v6589_v33 = vmul.f32 0.0078125, %v602_v16  ;;  %4963 = vmatpush3.bf16.msra.mxu0 %v1850_v21  ;;  %2121 = vperm.xlu0 %5120, %v6525_v30  }
 0x19a   : > { %v993_v35 = vmul.f32 %v6326_v48, %v955_v27  ;;  %v1030_v36 = vadd.f32 %v6340_v3, %v992_v59 }
 0x19b   : > { %5238 = vrsqrt.f32 %v894_v7  ;;  %v800_v45 = vmul.f32 %v6587_v31, %v6587_v31  ;;  %v801_v8 = vmul.f32 %v6589_v33, %v6589_v33 }
 0x19c   : > { %5240 = vrsqrt.f32 %v895_v23  ;;  %4943 = vmatmul.mubr.msk.bf16.gmra.mrb[12].mxu0 %vm1124_vm0, %v5129_v57  ;;  %v729_v11 = vpop.xlane.xlu0 %728  ;;  %v731_v9 = vpop.xlane.xlu1 %730  ;;  %1718 = vperm.xlu1 %5121, %v6525_v30   ;;  %v1031_v42 = vadd.f32 %v6340_v3, %v993_v35  ;;  %v865_v35 = vsub.f32 %v6237_v51, %v6589_v33 }
 0x19d   : > { %v5235_v6 = vpop.eup %5234  ;;  %v768_v28 = vmul.f32 0.0078125, %v729_v11  ;;  %v769_v12 = vmul.f32 0.0078125, %v731_v9  ;;  %4970 = vmatprep.mubr.msk.bf16.mxu0 %vm1124_vm0, %v5130_v25  ;;  %2131 = vperm.xlu0 %5120, %v6548_v34  }
 0x19e   : > { %v5237_v43 = vpop.eup %5236  ;;  %v1851_v2 = vpack.c.bf16 %v1031_v42, %v1030_v36  ;;  %v956_v63 = vmul.f32 %v5235_v6, %v860_v18 }
 0x19f   : > { %v832_v22 = vsub.f32 %v768_v28, %v800_v45  ;;  %v833_v44 = vsub.f32 %v769_v12, %v801_v8  ;;  %v957_v5 = vmul.f32 %v5237_v43, %v861_v55 }
 0x1a0   : > { %v604_v32 = vpop.xlane.xlu0 %603  ;;  %v606_v41 = vpop.xlane.xlu1 %605  ;;  %1728 = vperm.xlu1 %5121, %v6548_v34   ;;  %4964 = vmatprep.subr.bf16.mxu0 %v1851_v2  ;;  %v994_v1 = vmul.f32 %v6326_v48, %v956_v63  ;;  %v863_v34 = vsub.f32 %v6225_v47, %v6561_v40  ;;  %v5132_v63 = vld [vmem:[%s8138_s5 + $0x10] sm:$0xff]  }
 0x1a1   : > { %v896_v58 = vadd.f32 1e-05, %v832_v22  ;;  %v897_v49 = vadd.f32 1e-05, %v833_v44  ;;  %v6609_v29 = vmul.f32 0.0078125, %v604_v32  ;;  %v6611_v13 = vmul.f32 0.0078125, %v606_v41  ;;  %4965 = vmatpush3.bf16.msra.mxu0 %v1851_v2  ;;  %2504 = vperm.xlu0 %5120, %v6495_v26  }
 0x1a2   : > { %v995_v17 = vmul.f32 %v6326_v48, %v957_v5  ;;  %v1032_v15 = vadd.f32 %v6340_v3, %v994_v1  ;;  %v5131_v2 = vld [vmem:[%s8138_s5 + $0x8] sm:$0xff]   ;;  %v5514_v1 = vld [vmem:[%s6069_s23 + $0xd0] sm:$0xff] }
 0x1a3   : > { %5242 = vrsqrt.f32 %v896_v58  ;;  %v802_v37 = vmul.f32 %v6609_v29, %v6609_v29  ;;  %v803_v0 = vmul.f32 %v6611_v13, %v6611_v13 }
 0x1a4   : > { %5244 = vrsqrt.f32 %v897_v49  ;;  %v733_v54 = vpop.xlane.xlu0 %732  ;;  %v735_v61 = vpop.xlane.xlu1 %734  ;;  %2101 = vperm.xlu1 %5121, %v6495_v26   ;;  %v1033_v46 = vadd.f32 %v6340_v3, %v995_v17 }
 0x1a5   : > { %v5239_v39 = vpop.eup %5238  ;;  %v770_v38 = vmul.f32 0.0078125, %v733_v54  ;;  %v771_v21 = vmul.f32 0.0078125, %v735_v61  ;;  %2514 = vperm.xlu0 %5120, %v6518_v52   ;;  %v864_v52 = vsub.f32 %v6234_v50, %v6587_v31 }
 0x1a6   : > { %v5241_v47 = vpop.eup %5240  ;;  %v1852_v40 = vpack.c.bf16 %v1033_v46, %v1032_v15  ;;  %v958_v24 = vmul.f32 %v5239_v39, %v862_v53  ;;  %v5515_v53 = vld [vmem:[%s6069_s23 + $0xd8] sm:$0xff] }
 0x1a7   : > { %v834_v14 = vsub.f32 %v770_v38, %v802_v37  ;;  %v835_v62 = vsub.f32 %v771_v21, %v803_v0  ;;  %v959_v27 = vmul.f32 %v5241_v47, %v863_v34  ;;  %v867_v17 = vsub.f32 %v5515_v53, %v6611_v13 }
 0x1a8   : > { %v608_v4 = vpop.xlane.xlu0 %607  ;;  %v610_v16 = vpop.xlane.xlu1 %609  ;;  %2116 = vperm.xlu1 %5121, %v6438_v19   ;;  %4966 = vmatprep.subr.bf16.mxu0 %v1852_v40  ;;  %v996_v26 = vmul.f32 %v6326_v48, %v958_v24 }
 0x1a9   : > { %v898_v57 = vadd.f32 1e-05, %v834_v14  ;;  %v899_v59 = vadd.f32 1e-05, %v835_v62  ;;  %v6629_v25 = vmul.f32 0.0078125, %v608_v4  ;;  %v6631_v7 = vmul.f32 0.0078125, %v610_v16  ;;  %4967 = vmatpush3.bf16.msra.mxu0 %v1852_v40  ;;  %2524 = vperm.xlu0 %5120, %v6525_v30  }
 0x1aa   : > { %v997_v23 = vmul.f32 %v6326_v48, %v959_v27  ;;  %v1034_v18 = vadd.f32 %v6340_v3, %v996_v26  ;;  %v5134_v4 = vld [vmem:[%s8138_s5] sm:$0xff]  }
 0x1ab   : > { %5246 = vrsqrt.f32 %v898_v57  ;;  %v804_v36 = vmul.f32 %v6629_v25, %v6629_v25  ;;  %v805_v55 = vmul.f32 %v6631_v7, %v6631_v7  ;;  %v5516_v16 = vld [vmem:[%s6069_s23 + $0xe0] sm:$0xff]  ;;  %v5517_v57 = vld [vmem:[%s6069_s23 + $0xe8] sm:$0xff] }
 0x1ac   : > { %5248 = vrsqrt.f32 %v899_v59  ;;  %v737_v45 = vpop.xlane.xlu0 %736  ;;  %v739_v30 = vpop.xlane.xlu1 %738  ;;  %2126 = vperm.xlu1 %5121, %v6456_v20   ;;  %v1035_v50 = vadd.f32 %v6340_v3, %v997_v23  ;;  %v868_v26 = vsub.f32 %v5516_v16, %v6629_v25  ;;  %v869_v59 = vsub.f32 %v5517_v57, %v6631_v7 }
 0x1ad   : > { %v5243_v31 = vpop.eup %5242  ;;  %v772_v8 = vmul.f32 0.0078125, %v737_v45  ;;  %v773_v11 = vmul.f32 0.0078125, %v739_v30  ;;  %v5518_v45 = vld [vmem:[%s6069_s23 + $0xf0] sm:$0xff] }
 0x1ae   : > { %v5245_v9 = vpop.eup %5244  ;;  %v1853_v42 = vpack.c.bf16 %v1035_v50, %v1034_v18  ;;  %v960_v51 = vmul.f32 %v5243_v31, %v864_v52  ;;  %v5519_v31 = vld [vmem:[%s6069_s23 + $0xf8] sm:$0xff] }
 0x1af   : > { %v836_v33 = vsub.f32 %v772_v8, %v804_v36  ;;  %v837_v6 = vsub.f32 %v773_v11, %v805_v55  ;;  %v961_v28 = vmul.f32 %v5245_v9, %v865_v35 }
 0x1b0   : > { %4968 = vmatprep.subr.bf16.mxu0 %v1853_v42  ;;  %v612_v12 = vpop.xlane.xlu0 %611  ;;  %v614_v43 = vpop.xlane.xlu1 %613  ;;  %2136 = vperm.xlu1 %5121, %v6476_v60   ;;  %v998_v22 = vmul.f32 %v6326_v48, %v960_v51  ;;  %v866_v60 = vsub.f32 %v5514_v1, %v6609_v29 }
 0x1b1   : > { %v900_v44 = vadd.f32 1e-05, %v836_v33  ;;  %v901_v5 = vadd.f32 1e-05, %v837_v6  ;;  %4969 = vmatpush3.bf16.msra.mxu0 %v1853_v42  ;;  %v6654_v32 = vmul.f32 0.0078125, %v612_v12  ;;  %v6656_v41 = vmul.f32 0.0078125, %v614_v43 }
 0x1b2   : > { %v999_v58 = vmul.f32 %v6326_v48, %v961_v28  ;;  %v1036_v49 = vadd.f32 %v6340_v3, %v998_v22  ;;  %v5136_v22 = vld [vmem:[%s8138_s5 + $0x10] sm:$0xff]  }
 0x1b3   : > { %5250 = vrsqrt.f32 %v900_v44  ;;  %v806_v15 = vmul.f32 %v6654_v32, %v6654_v32  ;;  %v807_v34 = vmul.f32 %v6656_v41, %v6656_v41  ;;  %v870_v30 = vsub.f32 %v5518_v45, %v6654_v32 }
 0x1b4   : > { %5252 = vrsqrt.f32 %v901_v5  ;;  %4971 = vmatmul.mubr.msk.bf16.vlgmr.msra.gmra.mrb[16].mxu0 %vm1124_vm0, %v5131_v2  ;;  %v741_v37 = vpop.xlane.xlu0 %740  ;;  %v743_v0 = vpop.xlane.xlu1 %742  ;;  %2509 = vperm.xlu1 %5121, %v6418_v56   ;;  %v1037_v29 = vadd.f32 %v6340_v3, %v999_v58  ;;  %v5133_v56 = vld [vmem:[%s8138_s5 + $0x18] sm:$0xff]  }
 0x1b5   : > { %v5247_v54 = vpop.eup %5246  ;;  %v774_v61 = vmul.f32 0.0078125, %v741_v37  ;;  %v775_v46 = vmul.f32 0.0078125, %v743_v0  ;;  %4974 = vmatprep.mubr.msk.bf16.mxu0 %vm1124_vm0, %v5132_v63  ;;  %v5135_v63 = vld [vmem:[%s8138_s5 + $0x8] sm:$0xff]  }
 0x1b6   : > { %v5249_v13 = vpop.eup %5248  ;;  %v2253_v39 = vpack.c.bf16 %v1037_v29, %v1036_v49  ;;  %v962_v38 = vmul.f32 %v5247_v54, %v866_v60 }
 0x1b7   : > { %v838_v21 = vsub.f32 %v774_v61, %v806_v15  ;;  %v839_v47 = vsub.f32 %v775_v46, %v807_v34  ;;  %v963_v40 = vmul.f32 %v5249_v13, %v867_v17 }
 0x1b8   : > { %2519 = vperm.xlu1 %5121, %v6438_v19   ;;  %4994 = vmatprep.subr.bf16.mxu0 %v2253_v39  ;;  %v1000_v24 = vmul.f32 %v6326_v48, %v962_v38  ;;  %v1072_v44 = vpop.permute.xlu1 %1071 }
 0x1b9   : > { %v902_v14 = vadd.f32 1e-05, %v838_v21  ;;  %v903_v62 = vadd.f32 1e-05, %v839_v47  ;;  %4995 = vmatpush3.bf16.msra.mxu0 %v2253_v39  ;;  %v1001_v27 = vmul.f32 %v6326_v48, %v963_v40 }
 0x1ba   : > { %v1038_v19 = vadd.f32 %v6340_v3, %v1000_v24 }
 0x1bb   : > { %5254 = vrsqrt.f32 %v902_v14  ;;  %v1039_v52 = vadd.f32 %v6340_v3, %v1001_v27 }
 0x1bc   : > { %5256 = vrsqrt.f32 %v903_v62  ;;  %4975 = vmatmul.mubr.msk.bf16.gmra.mrb[20].mxu0 %vm1124_vm0, %v5133_v56  ;;  %2529 = vperm.xlu1 %5121, %v6456_v20   ;;  %v871_v20 = vsub.f32 %v5519_v31, %v6656_v41  ;;  %v1077_v5 = vpop.permute.xlu1 %1076  ;;  %v1067_v58 = vpop.permute.xlu0 %1066 }
 0x1bd   : > { %v5251_v23 = vpop.eup %5250  ;;  %v2254_v18 = vpack.c.bf16 %v1039_v52, %v1038_v19  ;;  %5002 = vmatprep.mubr.msk.bf16.mxu0 %vm1124_vm0, %v5134_v4 }
 0x1be   : > { %v5253_v25 = vpop.eup %5252  ;;  %v964_v35 = vmul.f32 %v5251_v23, %v868_v26 }
 0x1bf   : > { %4996 = vmatprep.subr.bf16.mxu0 %v2254_v18  ;;  %v965_v36 = vmul.f32 %v5253_v25, %v869_v59 }
 0x1c0   : > { %4997 = vmatpush3.bf16.msra.mxu0 %v2254_v18  ;;  %v1002_v7 = vmul.f32 %v6326_v48, %v964_v35  ;;  %v1082_v32 = vpop.permute.xlu1 %1081 }
 0x1c1   : > { %v1003_v55 = vmul.f32 %v6326_v48, %v965_v36 }
 0x1c2   : > { %v1040_v50 = vadd.f32 %v6340_v3, %v1002_v7 }
 0x1c3   : > { %v1041_v8 = vadd.f32 %v6340_v3, %v1003_v55 }
 0x1c4   : > { %v1087_v41 = vpop.permute.xlu1 %1086 }
 0x1c5   : > { %v5255_v11 = vpop.eup %5254  ;;  %v2255_v9 = vpack.c.bf16 %v1041_v8, %v1040_v50 }
 0x1c6   : > { %v5257_v42 = vpop.eup %5256  ;;  %v966_v51 = vmul.f32 %v5255_v11, %v870_v30 }
 0x1c7   : > { %4998 = vmatprep.subr.bf16.mxu0 %v2255_v9  ;;  %v967_v33 = vmul.f32 %v5257_v42, %v871_v20 }
 0x1c8   : > { %4999 = vmatpush3.bf16.msra.mxu0 %v2255_v9  ;;  %v1004_v6 = vmul.f32 %v6326_v48, %v966_v51  ;;  %v1092_v1 = vpop.permute.xlu1 %1091 }
 0x1c9   : > { %v1005_v28 = vmul.f32 %v6326_v48, %v967_v33  ;;  %v5137_v48 = vld [vmem:[%s8138_s5 + $0x18] sm:$0xff]  }
 0x1ca   : > { %v1042_v12 = vadd.f32 %v6340_v3, %v1004_v6 }
 0x1cb   : > { %v1043_v43 = vadd.f32 %v6340_v3, %v1005_v28  ;;  %v5138_v3 = vld [vmem:[#allocation9] sm:$0xff]  }
 0x1cc   : > { %4922 = vmatprep.mubr.msk.bf16.mxu1 %vm1124_vm0, %v5138_v3  ;;  %v1097_v29 = vpop.permute.xlu1 %1096 }
 0x1cd   : > { %v2256_v2 = vpack.c.bf16 %v1043_v43, %v1042_v12 }
 0x1cf   : > { %5000 = vmatprep.subr.bf16.mxu0 %v2256_v2 }
 0x1d0   : > { %5001 = vmatpush3.bf16.msra.mxu0 %v2256_v2  ;;  %v1102_v16 = vpop.permute.xlu1 %1101 }
 0x1d3   : > { %5003 = vmatmul.mubr.msk.bf16.vlgmr.msra.gmra.mrb[24].mxu0 %vm1124_vm0, %v5135_v63 }
 0x1d4   : > { %5006 = vmatprep.mubr.msk.bf16.mxu0 %vm1124_vm0, %v5136_v22 }
 0x1db   : > { %5007 = vmatmul.mubr.msk.bf16.gmra.mrb[28].mxu0 %vm1124_vm0, %v5137_v48 }
 0x1dc   : > { %3338 = vmatprep.mubr.bf16.mxu0 %v8154_v10 }
 0x247   : > { %v4908_v60 = vpop.f32.mrb[0].mxu0 }
 0x248   : > { %v6716_v49 = vadd.f32 %v4908_v60, %v1077_v5  ;;  %v1171_v53 = vpop.f32.mrb[1].mxu0 }
 0x249   : > { %v6718_v17 = vadd.f32 %v1171_v53, %v1067_v58  ;;  %v4909_v15 = vpop.f32.mrb[2].mxu0 }
 0x24a   : > { %v1212_v34 = vmul.f32 0.044715, %v6716_v49  ;;  %v6721_v37 = vadd.f32 %v4909_v15, %v1082_v32  ;;  %v1174_v0 = vpop.f32.mrb[3].mxu0 }
 0x24b   : > { %v1210_v54 = vmul.f32 0.044715, %v6718_v17  ;;  %v6724_v61 = vadd.f32 %v1174_v0, %v1072_v44  ;;  %v1470_v44 = vpop.permute.xlu1 %1469 }
 0x24c   : > { %v1220_v46 = vmul.f32 %v1212_v34, %v6716_v49  ;;  %v1213_v13 = vmul.f32 0.044715, %v6721_v37  ;;  %v1204_v34 = vmul.f32 0.5, %v6716_v49  ;;  %v1205_v0 = vmul.f32 0.5, %v6721_v37 }
 0x24d   : > { %v1218_v39 = vmul.f32 %v1210_v54, %v6718_v17  ;;  %v1211_v38 = vmul.f32 0.044715, %v6724_v61  ;;  %v1202_v54 = vmul.f32 0.5, %v6718_v17 }
 0x24e   : > { %v1228_v21 = vmul.f32 %v1220_v46, %v6716_v49  ;;  %v1221_v47 = vmul.f32 %v1213_v13, %v6721_v37  ;;  %v1203_v46 = vmul.f32 0.5, %v6724_v61 }
 0x24f   : > { %v1219_v40 = vmul.f32 %v1211_v38, %v6724_v61  ;;  %v4912_v56 = vpop.f32.mrb[4].mxu0  ;;  %v1226_v24 = vmul.f32 %v1218_v39, %v6718_v17  ;;  %v1480_v39 = vpop.permute.xlu1 %1479 }
 0x250   : > { %v1229_v14 = vmul.f32 %v1221_v47, %v6721_v37  ;;  %v6735_v62 = vadd.f32 %v4912_v56, %v1097_v29  ;;  %v1187_v27 = vpop.f32.mrb[5].mxu0  ;;  %v1236_v4 = vadd.f32 %v1228_v21, %v6716_v49 }
 0x251   : > { %v6738_v26 = vadd.f32 %v1187_v27, %v1087_v41  ;;  %v4913_v19 = vpop.f32.mrb[6].mxu0  ;;  %v1227_v57 = vmul.f32 %v1219_v40, %v6724_v61  ;;  %v1234_v59 = vadd.f32 %v1226_v24, %v6718_v17 }
 0x252   : > { %v1216_v52 = vmul.f32 0.044715, %v6735_v62  ;;  %v6743_v23 = vadd.f32 %v4913_v19, %v1102_v16  ;;  %v1190_v18 = vpop.f32.mrb[7].mxu0  ;;  %v1237_v25 = vadd.f32 %v1229_v14, %v6721_v37  ;;  %v1244_v35 = vmul.f32 0.7978846, %v1236_v4 }
 0x253   : > { %v1214_v36 = vmul.f32 0.044715, %v6738_v26  ;;  %v6747_v7 = vadd.f32 %v1190_v18, %v1092_v1  ;;  %v1235_v55 = vadd.f32 %v1227_v57, %v6724_v61  ;;  %v1242_v45 = vmul.f32 0.7978846, %v1234_v59  ;;  %v1475_v1 = vpop.permute.xlu0 %1474 }
 0x254   : > { %v1224_v30 = vmul.f32 %v1216_v52, %v6735_v62  ;;  %v1217_v50 = vmul.f32 0.044715, %v6743_v23  ;;  %v1245_v31 = vmul.f32 0.7978846, %v1237_v25  ;;  %5258 = vtanh.f32 %v1244_v35  ;;  %v1490_v52 = vpop.permute.xlu1 %1489 }
 0x255   : > { %v1222_v20 = vmul.f32 %v1214_v36, %v6738_v26  ;;  %v1215_v8 = vmul.f32 0.044715, %v6747_v7  ;;  %v1243_v11 = vmul.f32 0.7978846, %v1235_v55  ;;  %5260 = vtanh.f32 %v1242_v45 }
 0x256   : > { %v1232_v9 = vmul.f32 %v1224_v30, %v6735_v62  ;;  %v1225_v42 = vmul.f32 %v1217_v50, %v6743_v23  ;;  %5262 = vtanh.f32 %v1245_v31  ;;  %v1206_v61 = vmul.f32 0.5, %v6738_v26 }
 0x257   : > { %v1230_v51 = vmul.f32 %v1222_v20, %v6738_v26  ;;  %v1223_v33 = vmul.f32 %v1215_v8, %v6747_v7  ;;  %5264 = vtanh.f32 %v1243_v11  ;;  %v1485_v56 = vpop.permute.xlu0 %1484  ;;  %v1208_v35 = vmul.f32 0.5, %v6735_v62 }
 0x258   : > { %v1233_v6 = vmul.f32 %v1225_v42, %v6743_v23  ;;  %v1240_v28 = vadd.f32 %v1232_v9, %v6735_v62  ;;  %v1209_v36 = vmul.f32 0.5, %v6743_v23 }
 0x259   : > { %v1231_v12 = vmul.f32 %v1223_v33, %v6747_v7  ;;  %v1238_v43 = vadd.f32 %v1230_v51, %v6738_v26  ;;  %v1207_v26 = vmul.f32 0.5, %v6747_v7 }
 0x25a   : > { %v1241_v2 = vadd.f32 %v1233_v6, %v6743_v23  ;;  %v1248_v63 = vmul.f32 0.7978846, %v1240_v28 }
 0x25b   : > { %v1239_v22 = vadd.f32 %v1231_v12, %v6747_v7  ;;  %v1246_v48 = vmul.f32 0.7978846, %v1238_v43  ;;  %v1495_v20 = vpop.permute.xlu0 %1494 }
 0x25c   : > { %v1249_v3 = vmul.f32 0.7978846, %v1241_v2  ;;  %5266 = vtanh.f32 %v1248_v63  ;;  %v1500_v63 = vpop.permute.xlu1 %1499 }
 0x25d   : > { %v1247_v5 = vmul.f32 0.7978846, %v1239_v22  ;;  %5268 = vtanh.f32 %v1246_v48 }
 0x25e   : > { %v5259_v32 = vpop.eup %5258  ;;  %5270 = vtanh.f32 %v1249_v3 }
 0x25f   : > { %v5261_v41 = vpop.eup %5260  ;;  %v1260_v60 = vadd.f32 1.0, %v5259_v32  ;;  %5272 = vtanh.f32 %v1247_v5 }
 0x260   : > { %v5263_v58 = vpop.eup %5262  ;;  %v1258_v53 = vadd.f32 1.0, %v5261_v41 }
 0x261   : > { %v5265_v15 = vpop.eup %5264  ;;  %v1261_v29 = vadd.f32 1.0, %v5263_v58  ;;  %v1268_v38 = vmul.f32 %v1260_v60, %v1204_v34 }
 0x262   : > { %v1259_v13 = vadd.f32 1.0, %v5265_v15  ;;  %v1266_v47 = vmul.f32 %v1258_v53, %v1202_v54 }
 0x263   : > { %v1269_v21 = vmul.f32 %v1261_v29, %v1205_v0 }
 0x264   : > { %v1267_v40 = vmul.f32 %v1259_v13, %v1203_v46 }
 0x265   : > { %v1283_v24 = vpack.c.bf16 %v1269_v21, %v1268_v38 }
 0x266   : > { %v5267_v14 = vpop.eup %5266  ;;  %v1282_v27 = vpack.c.bf16 %v1267_v40, %v1266_v47 }
 0x267   : > { %v5269_v4 = vpop.eup %5268  ;;  %v4940_v16 = vpop.f32.mrb[8].mxu0  ;;  %v1264_v49 = vadd.f32 1.0, %v5267_v14 }
 0x268   : > { %v5271_v19 = vpop.eup %5270  ;;  %v6768_v37 = vadd.f32 %v4940_v16, %v1480_v39  ;;  %4914 = vmatprep.subr.bf16.mxu1 %v1282_v27  ;;  %v1573_v17 = vpop.f32.mrb[9].mxu0  ;;  %v1262_v57 = vadd.f32 1.0, %v5269_v4  ;;  %v5140_v4 = vld [vmem:[#allocation9 + $0x10] sm:$0xff]  }
 0x269   : > { %v5273_v59 = vpop.eup %5272  ;;  %v6771_v18 = vadd.f32 %v1573_v17, %v1470_v44  ;;  %4915 = vmatpush3.bf16.msra.mxu1 %v1282_v27  ;;  %v4941_v25 = vpop.f32.mrb[10].mxu0  ;;  %v1265_v55 = vadd.f32 1.0, %v5271_v19  ;;  %v1272_v9 = vmul.f32 %v1264_v49, %v1208_v35 }
 0x26a   : > { %v1614_v45 = vmul.f32 0.044715, %v6768_v37  ;;  %v6776_v30 = vadd.f32 %v4941_v25, %v1485_v56  ;;  %4916 = vmatprep.subr.bf16.mxu1 %v1283_v24  ;;  %v1576_v50 = vpop.f32.mrb[11].mxu0  ;;  %v1263_v31 = vadd.f32 1.0, %v5273_v59  ;;  %v1270_v51 = vmul.f32 %v1262_v57, %v1206_v61  ;;  %v5139_v56 = vld [vmem:[#allocation9 + $0x8] sm:$0xff]  }
 0x26b   : > { %v1612_v8 = vmul.f32 0.044715, %v6771_v18  ;;  %v6780_v11 = vadd.f32 %v1576_v50, %v1475_v1  ;;  %v1273_v42 = vmul.f32 %v1265_v55, %v1209_v36  ;;  %v1505_v1 = vpop.permute.xlu0 %1504  ;;  %v5141_v50 = vld [vmem:[#allocation9 + $0x18] sm:$0xff]  }
 0x26c   : > { %v1622_v62 = vmul.f32 %v1614_v45, %v6768_v37  ;;  %v1615_v23 = vmul.f32 0.044715, %v6776_v30  ;;  %v1271_v33 = vmul.f32 %v1263_v31, %v1207_v26  ;;  %v1873_v31 = vpop.permute.xlu1 %1872 }
 0x26d   : > { %v1620_v6 = vmul.f32 %v1612_v8, %v6771_v18  ;;  %v1613_v28 = vmul.f32 0.044715, %v6780_v11  ;;  %4917 = vmatpush3.bf16.msra.mxu1 %v1283_v24  ;;  %v1285_v7 = vpack.c.bf16 %v1273_v42, %v1272_v9  ;;  %v5142_v8 = vld [vmem:[#allocation9] sm:$0xff]  }
 0x26e   : > { %v1630_v12 = vmul.f32 %v1622_v62, %v6768_v37  ;;  %v1623_v43 = vmul.f32 %v1615_v23, %v6776_v30  ;;  %v1284_v2 = vpack.c.bf16 %v1271_v33, %v1270_v51 }
 0x26f   : > { %v1628_v22 = vmul.f32 %v1620_v6, %v6771_v18  ;;  %v1621_v48 = vmul.f32 %v1613_v28, %v6780_v11  ;;  %v4944_v3 = vpop.f32.mrb[12].mxu0  ;;  %v1878_v62 = vpop.permute.xlu0 %1877  ;;  %v1606_v28 = vmul.f32 0.5, %v6768_v37 }
 0x270   : > { %v1631_v44 = vmul.f32 %v1623_v43, %v6776_v30  ;;  %v6791_v5 = vadd.f32 %v4944_v3, %v1500_v63  ;;  %4918 = vmatprep.subr.bf16.mxu1 %v1284_v2  ;;  %v1589_v32 = vpop.f32.mrb[13].mxu0  ;;  %v1638_v41 = vadd.f32 %v1630_v12, %v6768_v37  ;;  %v1604_v43 = vmul.f32 0.5, %v6771_v18 }
 0x271   : > { %v1629_v60 = vmul.f32 %v1621_v48, %v6780_v11  ;;  %v6795_v58 = vadd.f32 %v1589_v32, %v1490_v52  ;;  %4919 = vmatpush3.bf16.msra.mxu1 %v1284_v2  ;;  %v4945_v53 = vpop.f32.mrb[14].mxu0  ;;  %v1636_v15 = vadd.f32 %v1628_v22, %v6771_v18  ;;  %v1605_v2 = vmul.f32 0.5, %v6780_v11  ;;  %v1883_v22 = vpop.permute.xlu1 %1882 }
 0x272   : > { %v1618_v34 = vmul.f32 0.044715, %v6791_v5  ;;  %v6799_v0 = vadd.f32 %v4945_v53, %v1505_v1  ;;  %4920 = vmatprep.subr.bf16.mxu1 %v1285_v7  ;;  %v1592_v29 = vpop.f32.mrb[15].mxu0  ;;  %v1639_v54 = vadd.f32 %v1631_v44, %v6776_v30  ;;  %v1646_v46 = vmul.f32 0.7978846, %v1638_v41 }
 0x273   : > { %v1616_v13 = vmul.f32 0.044715, %v6795_v58  ;;  %v6803_v39 = vadd.f32 %v1592_v29, %v1495_v20  ;;  %v1637_v38 = vadd.f32 %v1629_v60, %v6780_v11  ;;  %v1644_v21 = vmul.f32 0.7978846, %v1636_v15  ;;  %v1888_v41 = vpop.permute.xlu0 %1887 }
 0x274   : > { %v1626_v47 = vmul.f32 %v1618_v34, %v6791_v5  ;;  %v1619_v40 = vmul.f32 0.044715, %v6799_v0  ;;  %v1647_v24 = vmul.f32 0.7978846, %v1639_v54  ;;  %5274 = vtanh.f32 %v1646_v46 }
 0x275   : > { %v1624_v14 = vmul.f32 %v1616_v13, %v6795_v58  ;;  %v1617_v27 = vmul.f32 0.044715, %v6803_v39  ;;  %4921 = vmatpush3.bf16.msra.mxu1 %v1285_v7  ;;  %v1645_v16 = vmul.f32 0.7978846, %v1637_v38  ;;  %5276 = vtanh.f32 %v1644_v21  ;;  %v1893_v13 = vpop.permute.xlu1 %1892 }
 0x276   : > { %v1634_v49 = vmul.f32 %v1626_v47, %v6791_v5  ;;  %v1627_v19 = vmul.f32 %v1619_v40, %v6799_v0  ;;  %5278 = vtanh.f32 %v1647_v24  ;;  %v1607_v7 = vmul.f32 0.5, %v6776_v30 }
 0x277   : > { %v1632_v17 = vmul.f32 %v1624_v14, %v6795_v58  ;;  %v1625_v61 = vmul.f32 %v1617_v27, %v6803_v39  ;;  %5280 = vtanh.f32 %v1645_v16  ;;  %v1608_v11 = vmul.f32 0.5, %v6795_v58  ;;  %v1898_v16 = vpop.permute.xlu0 %1897 }
 0x278   : > { %v1635_v57 = vmul.f32 %v1627_v19, %v6799_v0  ;;  %4923 = vmatmul.mubr.msk.bf16.vlgmr.msra.gmra.mrb[0].mxu1 %vm1124_vm0, %v5139_v56  ;;  %v1642_v59 = vadd.f32 %v1634_v49, %v6791_v5  ;;  %v1610_v47 = vmul.f32 0.5, %v6791_v5  ;;  %v1611_v40 = vmul.f32 0.5, %v6799_v0 }
 0x279   : > { %v1633_v52 = vmul.f32 %v1625_v61, %v6803_v39  ;;  %4926 = vmatprep.mubr.msk.bf16.mxu1 %vm1124_vm0, %v5140_v4  ;;  %v1640_v25 = vadd.f32 %v1632_v17, %v6795_v58  ;;  %v1609_v58 = vmul.f32 0.5, %v6803_v39 }
 0x27a   : > { %v1643_v35 = vadd.f32 %v1635_v57, %v6799_v0  ;;  %v1650_v36 = vmul.f32 0.7978846, %v1642_v59 }
 0x27b   : > { %v1641_v55 = vadd.f32 %v1633_v52, %v6803_v39  ;;  %v1648_v45 = vmul.f32 0.7978846, %v1640_v25 }
 0x27c   : > { %v1651_v26 = vmul.f32 0.7978846, %v1643_v35  ;;  %5282 = vtanh.f32 %v1650_v36 }
 0x27d   : > { %v1649_v20 = vmul.f32 0.7978846, %v1641_v55  ;;  %5284 = vtanh.f32 %v1648_v45  ;;  %v1903_v45 = vpop.permute.xlu1 %1902 }
 0x27e   : > { %v5275_v9 = vpop.eup %5274  ;;  %5286 = vtanh.f32 %v1651_v26 }
 0x27f   : > { %v5277_v42 = vpop.eup %5276  ;;  %v1662_v23 = vadd.f32 1.0, %v5275_v9  ;;  %5288 = vtanh.f32 %v1649_v20 }
 0x280   : > { %v5279_v51 = vpop.eup %5278  ;;  %4927 = vmatmul.mubr.msk.bf16.gmra.mrb[4].mxu1 %vm1124_vm0, %v5141_v50  ;;  %v1660_v33 = vadd.f32 1.0, %v5277_v42 }
 0x281   : > { %v5281_v6 = vpop.eup %5280  ;;  %v1663_v12 = vadd.f32 1.0, %v5279_v51  ;;  %4954 = vmatprep.mubr.msk.bf16.mxu1 %vm1124_vm0, %v5142_v8  ;;  %v1670_v48 = vmul.f32 %v1662_v23, %v1606_v28 }
 0x282   : > { %v1661_v63 = vadd.f32 1.0, %v5281_v6  ;;  %v1668_v44 = vmul.f32 %v1660_v33, %v1604_v43 }
 0x283   : > { %v1671_v3 = vmul.f32 %v1663_v12, %v1607_v7 }
 0x284   : > { %v1669_v32 = vmul.f32 %v1661_v63, %v1605_v2 }
 0x285   : > { %v1685_v1 = vpack.c.bf16 %v1671_v3, %v1670_v48 }
 0x286   : > { %v5283_v60 = vpop.eup %5282  ;;  %v1684_v53 = vpack.c.bf16 %v1669_v32, %v1668_v44 }
 0x287   : > { %v5285_v37 = vpop.eup %5284  ;;  %v4972_v15 = vpop.f32.mrb[16].mxu0  ;;  %v1666_v30 = vadd.f32 1.0, %v5283_v60 }
 0x288   : > { %v5287_v34 = vpop.eup %5286  ;;  %v6828_v29 = vadd.f32 %v4972_v15, %v1883_v22  ;;  %4946 = vmatprep.subr.bf16.mxu1 %v1684_v53  ;;  %v1976_v18 = vpop.f32.mrb[17].mxu0  ;;  %v1664_v54 = vadd.f32 1.0, %v5285_v37  ;;  %v5144_v37 = vld [vmem:[#allocation9 + $0x10] sm:$0xff]  }
 0x289   : > { %v5289_v46 = vpop.eup %5288  ;;  %v6831_v38 = vadd.f32 %v1976_v18, %v1873_v31  ;;  %4947 = vmatpush3.bf16.msra.mxu1 %v1684_v53  ;;  %v4973_v21 = vpop.f32.mrb[18].mxu0  ;;  %v1667_v56 = vadd.f32 1.0, %v5287_v34  ;;  %v1674_v17 = vmul.f32 %v1666_v30, %v1610_v47 }
 0x28a   : > { %v2017_v24 = vmul.f32 0.044715, %v6828_v29  ;;  %v6836_v14 = vadd.f32 %v4973_v21, %v1888_v41  ;;  %4948 = vmatprep.subr.bf16.mxu1 %v1685_v1  ;;  %v1979_v27 = vpop.f32.mrb[19].mxu0  ;;  %v1665_v4 = vadd.f32 1.0, %v5289_v46  ;;  %v1672_v57 = vmul.f32 %v1664_v54, %v1608_v11  ;;  %v5143_v41 = vld [vmem:[#allocation9 + $0x8] sm:$0xff]  }
 0x28b   : > { %v2015_v49 = vmul.f32 0.044715, %v6831_v38  ;;  %v6840_v19 = vadd.f32 %v1979_v27, %v1878_v62  ;;  %v1675_v61 = vmul.f32 %v1667_v56, %v1611_v40  ;;  %v1908_v62 = vpop.permute.xlu0 %1907  ;;  %v2276_v27 = vpop.permute.xlu1 %2275 }
 0x28c   : > { %v2025_v5 = vmul.f32 %v2017_v24, %v6828_v29  ;;  %v2018_v0 = vmul.f32 0.044715, %v6836_v14  ;;  %v1673_v59 = vmul.f32 %v1665_v4, %v1609_v58  ;;  %v5145_v58 = vld [vmem:[#allocation9 + $0x18] sm:$0xff]  }
 0x28d   : > { %v2023_v52 = vmul.f32 %v2015_v49, %v6831_v38  ;;  %v2016_v25 = vmul.f32 0.044715, %v6840_v19  ;;  %4949 = vmatpush3.bf16.msra.mxu1 %v1685_v1  ;;  %v1687_v39 = vpack.c.bf16 %v1675_v61, %v1674_v17  ;;  %v5146_v49 = vld [vmem:[#allocation9] sm:$0xff]  }
 0x28e   : > { %v2033_v35 = vmul.f32 %v2025_v5, %v6828_v29  ;;  %v2026_v36 = vmul.f32 %v2018_v0, %v6836_v14  ;;  %v1686_v55 = vpack.c.bf16 %v1673_v59, %v1672_v57 }
 0x28f   : > { %v2031_v50 = vmul.f32 %v2023_v52, %v6831_v38  ;;  %v2024_v26 = vmul.f32 %v2016_v25, %v6840_v19  ;;  %v4976_v31 = vpop.f32.mrb[20].mxu0  ;;  %v2281_v61 = vpop.permute.xlu0 %2280  ;;  %v2009_v25 = vmul.f32 0.5, %v6828_v29 }
 0x290   : > { %v2034_v20 = vmul.f32 %v2026_v36, %v6836_v14  ;;  %v6851_v8 = vadd.f32 %v4976_v31, %v1903_v45  ;;  %4950 = vmatprep.subr.bf16.mxu1 %v1686_v55  ;;  %v1992_v9 = vpop.f32.mrb[21].mxu0  ;;  %v2041_v42 = vadd.f32 %v2033_v35, %v6828_v29  ;;  %v2286_v36 = vpop.permute.xlu1 %2285  ;;  %v2008_v45 = vmul.f32 0.5, %v6840_v19 }
 0x291   : > { %v2032_v23 = vmul.f32 %v2024_v26, %v6840_v19  ;;  %v6855_v51 = vadd.f32 %v1992_v9, %v1893_v13  ;;  %4951 = vmatpush3.bf16.msra.mxu1 %v1686_v55  ;;  %v4977_v33 = vpop.f32.mrb[22].mxu0  ;;  %v2039_v6 = vadd.f32 %v2031_v50, %v6831_v38  ;;  %v2007_v55 = vmul.f32 0.5, %v6831_v38 }
 0x292   : > { %v2021_v28 = vmul.f32 0.044715, %v6851_v8  ;;  %v6859_v7 = vadd.f32 %v4977_v33, %v1908_v62  ;;  %4952 = vmatprep.subr.bf16.mxu1 %v1687_v39  ;;  %v1995_v12 = vpop.f32.mrb[23].mxu0  ;;  %v2042_v43 = vadd.f32 %v2034_v20, %v6836_v14  ;;  %v2049_v2 = vmul.f32 0.7978846, %v2041_v42 }
 0x293   : > { %v2019_v63 = vmul.f32 0.044715, %v6855_v51  ;;  %v6863_v22 = vadd.f32 %v1995_v12, %v1898_v16  ;;  %v2040_v48 = vadd.f32 %v2032_v23, %v6840_v19  ;;  %v2047_v3 = vmul.f32 0.7978846, %v2039_v6  ;;  %v2291_v20 = vpop.permute.xlu0 %2290 }
 0x294   : > { %v2029_v44 = vmul.f32 %v2021_v28, %v6851_v8  ;;  %v2022_v32 = vmul.f32 0.044715, %v6859_v7  ;;  %v2050_v1 = vmul.f32 0.7978846, %v2042_v43  ;;  %5290 = vtanh.f32 %v2049_v2  ;;  %v2296_v2 = vpop.permute.xlu1 %2295 }
 0x295   : > { %v2027_v60 = vmul.f32 %v2019_v63, %v6855_v51  ;;  %v2020_v53 = vmul.f32 0.044715, %v6863_v22  ;;  %4953 = vmatpush3.bf16.msra.mxu1 %v1687_v39  ;;  %v2048_v15 = vmul.f32 0.7978846, %v2040_v48  ;;  %5292 = vtanh.f32 %v2047_v3 }
 0x296   : > { %v2037_v30 = vmul.f32 %v2029_v44, %v6851_v8  ;;  %v2030_v34 = vmul.f32 %v2022_v32, %v6859_v7  ;;  %5294 = vtanh.f32 %v2050_v1  ;;  %v2010_v39 = vmul.f32 0.5, %v6836_v14 }
 0x297   : > { %v2035_v18 = vmul.f32 %v2027_v60, %v6855_v51  ;;  %v2028_v11 = vmul.f32 %v2020_v53, %v6863_v22  ;;  %5296 = vtanh.f32 %v2048_v15  ;;  %v2011_v63 = vmul.f32 0.5, %v6855_v51 }
 0x298   : > { %v2038_v54 = vmul.f32 %v2030_v34, %v6859_v7  ;;  %4955 = vmatmul.mubr.msk.bf16.vlgmr.msra.gmra.mrb[8].mxu1 %vm1124_vm0, %v5143_v41  ;;  %v2045_v46 = vadd.f32 %v2037_v30, %v6851_v8  ;;  %v2013_v3 = vmul.f32 0.5, %v6851_v8  ;;  %v2014_v60 = vmul.f32 0.5, %v6859_v7 }
 0x299   : > { %v2036_v13 = vmul.f32 %v2028_v11, %v6863_v22  ;;  %4958 = vmatprep.mubr.msk.bf16.mxu1 %vm1124_vm0, %v5144_v37  ;;  %v2043_v21 = vadd.f32 %v2035_v18, %v6855_v51  ;;  %v2301_v37 = vpop.permute.xlu0 %2300  ;;  %v2012_v51 = vmul.f32 0.5, %v6863_v22 }
 0x29a   : > { %v2046_v47 = vadd.f32 %v2038_v54, %v6859_v7  ;;  %v2053_v40 = vmul.f32 0.7978846, %v2045_v46 }
 0x29b   : > { %v2044_v56 = vadd.f32 %v2036_v13, %v6863_v22  ;;  %v2051_v24 = vmul.f32 0.7978846, %v2043_v21  ;;  %v2306_v22 = vpop.permute.xlu1 %2305 }
 0x29c   : > { %v2054_v4 = vmul.f32 0.7978846, %v2046_v47  ;;  %5298 = vtanh.f32 %v2053_v40 }
 0x29d   : > { %v2052_v16 = vmul.f32 0.7978846, %v2044_v56  ;;  %5300 = vtanh.f32 %v2051_v24 }
 0x29e   : > { %v5291_v17 = vpop.eup %5290  ;;  %5302 = vtanh.f32 %v2054_v4 }
 0x29f   : > { %v5293_v5 = vpop.eup %5292  ;;  %v2065_v0 = vadd.f32 1.0, %v5291_v17  ;;  %5304 = vtanh.f32 %v2052_v16 }
 0x2a0   : > { %v5295_v57 = vpop.eup %5294  ;;  %4959 = vmatmul.mubr.msk.bf16.gmra.mrb[12].mxu1 %vm1124_vm0, %v5145_v58  ;;  %v2063_v59 = vadd.f32 1.0, %v5293_v5  ;;  %v2311_v5 = vpop.permute.xlu0 %2310 }
 0x2a1   : > { %v5297_v52 = vpop.eup %5296  ;;  %v2066_v35 = vadd.f32 1.0, %v5295_v57  ;;  %4986 = vmatprep.mubr.msk.bf16.mxu1 %vm1124_vm0, %v5146_v49  ;;  %v2073_v26 = vmul.f32 %v2065_v0, %v2009_v25 }
 0x2a2   : > { %v2064_v50 = vadd.f32 1.0, %v5297_v52  ;;  %v2071_v9 = vmul.f32 %v2063_v59, %v2007_v55 }
 0x2a3   : > { %v2074_v31 = vmul.f32 %v2066_v35, %v2010_v39 }
 0x2a4   : > { %v2072_v42 = vmul.f32 %v2064_v50, %v2008_v45 }
 0x2a5   : > { %v2088_v62 = vpack.c.bf16 %v2074_v31, %v2073_v26 }
 0x2a6   : > { %v5299_v23 = vpop.eup %5298  ;;  %v5004_v33 = vpop.f32.mrb[24].mxu0  ;;  %v2087_v29 = vpack.c.bf16 %v2072_v42, %v2071_v9 }
 0x2a7   : > { %v5301_v6 = vpop.eup %5300  ;;  %v6888_v14 = vadd.f32 %v5004_v33, %v2286_v36  ;;  %v2379_v28 = vpop.f32.mrb[25].mxu0  ;;  %v2069_v12 = vadd.f32 1.0, %v5299_v23  ;;  %v5147_v33 = vld [vmem:[#allocation9 + $0x8] sm:$0xff]  }
 0x2a8   : > { %v5303_v43 = vpop.eup %5302  ;;  %4978 = vmatprep.subr.bf16.mxu1 %v2087_v29  ;;  %v6890_v38 = vadd.f32 %v2379_v28, %v2276_v27  ;;  %v5005_v19 = vpop.f32.mrb[26].mxu0  ;;  %v2067_v48 = vadd.f32 1.0, %v5301_v6 }
 0x2a9   : > { %v5305_v44 = vpop.eup %5304  ;;  %v2420_v32 = vmul.f32 0.044715, %v6888_v14  ;;  %4979 = vmatpush3.bf16.msra.mxu1 %v2087_v29  ;;  %v6895_v41 = vadd.f32 %v5005_v19, %v2291_v20  ;;  %v2382_v1 = vpop.f32.mrb[27].mxu0  ;;  %v2070_v53 = vadd.f32 1.0, %v5303_v43  ;;  %v2077_v11 = vmul.f32 %v2069_v12, %v2013_v3  ;;  %v5148_v12 = vld [vmem:[#allocation9 + $0x10] sm:$0xff]  }
 0x2aa   : > { %v2418_v15 = vmul.f32 0.044715, %v6890_v38  ;;  %4980 = vmatprep.subr.bf16.mxu1 %v2088_v62  ;;  %v6899_v30 = vadd.f32 %v2382_v1, %v2281_v61  ;;  %v2068_v34 = vadd.f32 1.0, %v5305_v44  ;;  %v2075_v13 = vmul.f32 %v2067_v48, %v2011_v63 }
 0x2ab   : > { %v2428_v8 = vmul.f32 %v2420_v32, %v6888_v14  ;;  %v2421_v18 = vmul.f32 0.044715, %v6895_v41  ;;  %v2078_v54 = vmul.f32 %v2070_v53, %v2014_v60 }
 0x2ac   : > { %v2426_v46 = vmul.f32 %v2418_v15, %v6890_v38  ;;  %v2419_v7 = vmul.f32 0.044715, %v6899_v30  ;;  %v2076_v21 = vmul.f32 %v2068_v34, %v2012_v51  ;;  %v5150_v34 = vld [vmem:[#allocation9] sm:$0xff]  }
 0x2ad   : > { %v2436_v47 = vmul.f32 %v2428_v8, %v6888_v14  ;;  %v2429_v40 = vmul.f32 %v2421_v18, %v6895_v41  ;;  %4981 = vmatpush3.bf16.msra.mxu1 %v2088_v62  ;;  %v2090_v56 = vpack.c.bf16 %v2078_v54, %v2077_v11 }
 0x2ae   : > { %v2434_v24 = vmul.f32 %v2426_v46, %v6890_v38  ;;  %v2427_v27 = vmul.f32 %v2419_v7, %v6899_v30  ;;  %v5008_v58 = vpop.f32.mrb[28].mxu0  ;;  %v2089_v4 = vpack.c.bf16 %v2076_v21, %v2075_v13  ;;  %v2412_v7 = vmul.f32 0.5, %v6888_v14 }
 0x2af   : > { %v2437_v16 = vmul.f32 %v2429_v40, %v6895_v41  ;;  %v6911_v49 = vadd.f32 %v5008_v58, %v2306_v22  ;;  %v2395_v17 = vpop.f32.mrb[29].mxu0  ;;  %v2444_v61 = vadd.f32 %v2436_v47, %v6888_v14  ;;  %v2413_v13 = vmul.f32 0.5, %v6895_v41 }
 0x2b0   : > { %v2435_v0 = vmul.f32 %v2427_v27, %v6899_v30  ;;  %4982 = vmatprep.subr.bf16.mxu1 %v2089_v4  ;;  %v6915_v57 = vadd.f32 %v2395_v17, %v2296_v2  ;;  %v5009_v59 = vpop.f32.mrb[30].mxu0  ;;  %v2442_v52 = vadd.f32 %v2434_v24, %v6890_v38  ;;  %v2410_v47 = vmul.f32 0.5, %v6890_v38 }
 0x2b1   : > { %v2424_v25 = vmul.f32 0.044715, %v6911_v49  ;;  %4983 = vmatpush3.bf16.msra.mxu1 %v2089_v4  ;;  %v6919_v39 = vadd.f32 %v5009_v59, %v2311_v5  ;;  %v2398_v35 = vpop.f32.mrb[31].mxu0  ;;  %v2445_v36 = vadd.f32 %v2437_v16, %v6895_v41  ;;  %v2452_v55 = vmul.f32 0.7978846, %v2444_v61 }
 0x2b2   : > { %v2422_v45 = vmul.f32 0.044715, %v6915_v57  ;;  %4984 = vmatprep.subr.bf16.mxu1 %v2090_v56  ;;  %v6923_v50 = vadd.f32 %v2398_v35, %v2301_v37  ;;  %v2443_v26 = vadd.f32 %v2435_v0, %v6899_v30  ;;  %v2450_v31 = vmul.f32 0.7978846, %v2442_v52  ;;  %v5149_v37 = vld [vmem:[#allocation9 + $0x18] sm:$0xff]  }
 0x2b3   : > { %v2432_v20 = vmul.f32 %v2424_v25, %v6911_v49  ;;  %v2425_v9 = vmul.f32 0.044715, %v6919_v39  ;;  %v2453_v42 = vmul.f32 0.7978846, %v2445_v36  ;;  %5306 = vtanh.f32 %v2452_v55 }
 0x2b4   : > { %v2430_v62 = vmul.f32 %v2422_v45, %v6915_v57  ;;  %v2423_v23 = vmul.f32 0.044715, %v6923_v50  ;;  %v2451_v29 = vmul.f32 0.7978846, %v2443_v26  ;;  %5308 = vtanh.f32 %v2450_v31 }
 0x2b5   : > { %v2440_v6 = vmul.f32 %v2432_v20, %v6911_v49  ;;  %v2433_v28 = vmul.f32 %v2425_v9, %v6919_v39  ;;  %4985 = vmatpush3.bf16.msra.mxu1 %v2090_v56  ;;  %5310 = vtanh.f32 %v2453_v42  ;;  %v2411_v40 = vmul.f32 0.5, %v6899_v30  ;;  %v1302_v9 = vpop.permute.xlu0 %1301 }
 0x2b6   : > { %v2438_v43 = vmul.f32 %v2430_v62, %v6915_v57  ;;  %v2431_v2 = vmul.f32 %v2423_v23, %v6923_v50  ;;  %5312 = vtanh.f32 %v2451_v29  ;;  %v2416_v38 = vmul.f32 0.5, %v6911_v49 }
 0x2b7   : > { %v2441_v19 = vmul.f32 %v2433_v28, %v6919_v39  ;;  %v2448_v63 = vadd.f32 %v2440_v6, %v6911_v49  ;;  %v2417_v30 = vmul.f32 0.5, %v6919_v39  ;;  %v2414_v52 = vmul.f32 0.5, %v6915_v57  ;;  %v5151_v49 = vld [vmem:[#allocation9 + $0x8] sm:$0xff]  }
 0x2b8   : > { %v2439_v48 = vmul.f32 %v2431_v2, %v6923_v50  ;;  %4987 = vmatmul.mubr.msk.bf16.vlgmr.msra.gmra.mrb[16].mxu1 %vm1124_vm0, %v5147_v33  ;;  %v2446_v3 = vadd.f32 %v2438_v43, %v6915_v57  ;;  %v2415_v25 = vmul.f32 0.5, %v6923_v50  ;;  %v5153_v57 = vld [vmem:[#allocation9 + $0x18] sm:$0xff]   ;;  %v5520_v28 = vld [vmem:[%s6069_s23 + $0x10] sm:$0xff] }
 0x2b9   : > { %4990 = vmatprep.mubr.msk.bf16.mxu1 %vm1124_vm0, %v5148_v12  ;;  %v2449_v44 = vadd.f32 %v2441_v19, %v6919_v39  ;;  %v2456_v32 = vmul.f32 0.7978846, %v2448_v63  ;;  %v5152_v39 = vld [vmem:[#allocation9 + $0x10] sm:$0xff]   ;;  %v1312_v29 = vpop.permute.xlu0 %1311 }
 0x2ba   : > { %v2447_v1 = vadd.f32 %v2439_v48, %v6923_v50  ;;  %v2454_v60 = vmul.f32 0.7978846, %v2446_v3  ;;  %v1297_v50 = vpop.permute.xlu1 %1296  ;;  %v5521_v63 = vld [vmem:[%s6069_s23 + $0x18] sm:$0xff]  ;;  %v5522_v3 = vld [vmem:[%s6069_s23] sm:$0xff] }
 0x2bb   : > { %v2457_v53 = vmul.f32 0.7978846, %v2449_v44  ;;  %5314 = vtanh.f32 %v2456_v32 }
 0x2bc   : > { %v2455_v15 = vmul.f32 0.7978846, %v2447_v1  ;;  %5316 = vtanh.f32 %v2454_v60 }
 0x2bd   : > { %v5307_v51 = vpop.eup %5306  ;;  %5318 = vtanh.f32 %v2457_v53 }
 0x2be   : > { %v5309_v8 = vpop.eup %5308  ;;  %v2468_v18 = vadd.f32 1.0, %v5307_v51  ;;  %5320 = vtanh.f32 %v2455_v15  ;;  %v1307_v42 = vpop.permute.xlu1 %1306 }
 0x2bf   : > { %v5311_v11 = vpop.eup %5310  ;;  %v2466_v54 = vadd.f32 1.0, %v5309_v8  ;;  %v1322_v15 = vpop.permute.xlu0 %1321 }
 0x2c0   : > { %v5313_v46 = vpop.eup %5312  ;;  %4991 = vmatmul.mubr.msk.bf16.gmra.mrb[20].mxu1 %vm1124_vm0, %v5149_v37  ;;  %v2469_v21 = vadd.f32 1.0, %v5311_v11  ;;  %v2476_v22 = vmul.f32 %v2468_v18, %v2412_v7 }
 0x2c1   : > { %v2467_v56 = vadd.f32 1.0, %v5313_v46  ;;  %5018 = vmatprep.mubr.msk.bf16.mxu1 %vm1124_vm0, %v5150_v34  ;;  %v2474_v27 = vmul.f32 %v2466_v54, %v2410_v47  ;;  %v5523_v34 = vld [vmem:[%s6069_s23 + $0x8] sm:$0xff] }
 0x2c2   : > { %v2477_v24 = vmul.f32 %v2469_v21, %v2413_v13  ;;  %v1317_v1 = vpop.permute.xlu1 %1316 }
 0x2c3   : > { %v2475_v58 = vmul.f32 %v2467_v56, %v2411_v40  ;;  %v1332_v13 = vpop.permute.xlu0 %1331  ;;  %v5524_v40 = vld [vmem:[%s6069_s23 + $0x30] sm:$0xff] }
 0x2c4   : > { %v2491_v4 = vpack.c.bf16 %v2477_v24, %v2476_v22  ;;  %v5525_v24 = vld [vmem:[%s6069_s23 + $0x38] sm:$0xff] }
 0x2c5   : > { %v5315_v16 = vpop.eup %5314  ;;  %v2490_v17 = vpack.c.bf16 %v2475_v58, %v2474_v27  ;;  %v5526_v58 = vld [vmem:[%s6069_s23 + $0x20] sm:$0xff] }
 0x2c6   : > { %v5317_v61 = vpop.eup %5316  ;;  %v2472_v5 = vadd.f32 1.0, %v5315_v16  ;;  %v1327_v54 = vpop.permute.xlu1 %1326 }
 0x2c7   : > { %v5319_v14 = vpop.eup %5318  ;;  %5010 = vmatprep.subr.bf16.mxu1 %v2490_v17  ;;  %v2470_v41 = vadd.f32 1.0, %v5317_v61 }
 0x2c8   : > { %v5321_v0 = vpop.eup %5320  ;;  %5011 = vmatpush3.bf16.msra.mxu1 %v2490_v17  ;;  %v2473_v59 = vadd.f32 1.0, %v5319_v14  ;;  %v2480_v36 = vmul.f32 %v2472_v5, %v2416_v38  ;;  %v5527_v5 = vld [vmem:[%s6069_s23 + $0x28] sm:$0xff] }
 0x2c9   : > { %5012 = vmatprep.subr.bf16.mxu1 %v2491_v4  ;;  %v2471_v35 = vadd.f32 1.0, %v5321_v0  ;;  %v2478_v45 = vmul.f32 %v2470_v41, %v2414_v52  ;;  %v1704_v0 = vpop.permute.xlu0 %1703  ;;  %v5156_v38 = vld [vmem:[%s8142_s9 + $0x4] ss:$8 sps:$4 sm:$0xff]  }
 0x2ca   : > { %v2481_v55 = vmul.f32 %v2473_v59, %v2417_v30  ;;  %v1699_v61 = vpop.permute.xlu1 %1698  ;;  %v5154_v59 = vld [vmem:[%s8142_s9] ss:$8 sps:$4 sm:$0xff]   ;;  %3306 = vmatprep.subr.bf16.mxu0 %v5156_v38 }
 0x2cb   : > { %v2479_v26 = vmul.f32 %v2471_v35, %v2415_v25  ;;  %3307 = vmatpush1.bf16.msra.mxu0 %v5154_v59 }
 0x2cc   : > { %5013 = vmatpush3.bf16.msra.mxu1 %v2491_v4  ;;  %v2493_v31 = vpack.c.bf16 %v2481_v55, %v2480_v36 }
 0x2cd   : > { %v2492_v20 = vpack.c.bf16 %v2479_v26, %v2478_v45  ;;  %v5157_v45 = vld [vmem:[%s8142_s9 + $0x10] ss:$8 sps:$4 sm:$0xff]   ;;  %v5159_v26 = vld [vmem:[%s8142_s9 + $0x14] ss:$8 sps:$4 sm:$0xff]  }
 0x2ce   : > { %v1709_v52 = vpop.permute.xlu1 %1708  ;;  %3308 = vmatprep.subr.bf16.mxu0 %v5159_v26 }
 0x2cf   : > { %5014 = vmatprep.subr.bf16.mxu1 %v2492_v20  ;;  %3309 = vmatpush1.bf16.msra.mxu0 %v5157_v45  ;;  %v5532_v45 = vld [vmem:[%s6069_s23 + $0x60] sm:$0xff] }
 0x2d0   : > { %5015 = vmatpush3.bf16.msra.mxu1 %v2492_v20 }
 0x2d1   : > { %5016 = vmatprep.subr.bf16.mxu1 %v2493_v31 }
 0x2d4   : > { %5017 = vmatpush3.bf16.msra.mxu1 %v2493_v31  ;;  %v1714_v31 = vpop.permute.xlu0 %1713 }
 0x2d7   : > { %5019 = vmatmul.mubr.msk.bf16.vlgmr.msra.gmra.mrb[24].mxu1 %vm1124_vm0, %v5151_v49  ;;  %v5528_v49 = vld [vmem:[%s6069_s23 + $0x50] sm:$0xff] }
 0x2d8   : > { %5022 = vmatprep.mubr.msk.bf16.mxu1 %vm1124_vm0, %v5152_v39  ;;  %v1724_v38 = vpop.permute.xlu0 %1723 }
 0x2df   : > { %5023 = vmatmul.mubr.msk.bf16.gmra.mrb[28].mxu1 %vm1124_vm0, %v5153_v57 }
 0x34b   : > { %v4924_v62 = vpop.f32.mrb[0].mxu1 }
 0x34c   : > { %v1409_v23 = vadd.f32 %v4924_v62, %v1307_v42  ;;  %v1400_v33 = vpop.f32.mrb[1].mxu1  ;;  %v5529_v42 = vld [vmem:[%s6069_s23 + $0x58] sm:$0xff] }
 0x34d   : > { %v4925_v6 = vpop.f32.mrb[2].mxu1  ;;  %v1401_v43 = vadd.f32 %v1400_v33, %v1297_v50  ;;  %v5530_v33 = vld [vmem:[%s6069_s23 + $0x40] sm:$0xff] }
 0x34e   : > { %v6956_v12 = vadd.f32 %v5520_v28, %v1409_v23  ;;  %v1412_v2 = vadd.f32 %v4925_v6, %v1312_v29  ;;  %v1403_v19 = vpop.f32.mrb[3].mxu1  ;;  %v5162_v23 = vld [vmem:[%s8142_s9 + $0x24] ss:$8 sps:$4 sm:$0xff]   ;;  %v5160_v28 = vld [vmem:[%s8142_s9 + $0x20] ss:$8 sps:$4 sm:$0xff]  }
 0x34f   : > { %v6963_v44 = vadd.f32 %v5522_v3, %v1401_v43  ;;  %v1404_v32 = vadd.f32 %v1403_v19, %v1302_v9  ;;  %3310 = vmatprep.subr.bf16.mxu0 %v5162_v23  ;;  %v5165_v3 = vld [vmem:[%s8142_s9 + $0x34] ss:$8 sps:$4 sm:$0xff]  }
 0x350   : > { %8195 = vst [vmem:[#allocation19_spill] sm:$0xff] %v6956_v12  ;;  %v6959_v48 = vadd.f32 %v5521_v63, %v1412_v2  ;;  %2694 = vadd.xlane.f32.xlu1 %v6956_v12  ;;  %v2788_v37 = vmul.f32 %v6956_v12, %v6956_v12  ;;  %3311 = vmatpush1.bf16.msra.mxu0 %v5160_v28 }
 0x351   : > { %v6970_v8 = vadd.f32 %v5523_v34, %v1404_v32  ;;  %v2786_v47 = vmul.f32 %v6963_v44, %v6963_v44  ;;  %v5531_v32 = vld [vmem:[%s6069_s23 + $0x48] sm:$0xff]  ;;  %3312 = vmatprep.subr.bf16.mxu0 %v5165_v3  ;;  %v5535_v3 = vld [vmem:[%s6069_s23 + $0x78] sm:$0xff] }
 0x352   : > { %8196 = vst [vmem:[#allocation20_spill] sm:$0xff] %v6959_v48  ;;  %2696 = vadd.xlane.f32.xlu0 %v6959_v48  ;;  %v2789_v11 = vmul.f32 %v6959_v48, %v6959_v48  ;;  %v5166_v34 = vld [vmem:[%s8142_s9 + $0x40] ss:$8 sps:$4 sm:$0xff]  }
 0x353   : > { %v4928_v60 = vpop.f32.mrb[4].mxu1  ;;  %v2787_v7 = vmul.f32 %v6970_v8, %v6970_v8 }
 0x354   : > { %v1416_v53 = vpop.f32.mrb[5].mxu1  ;;  %2690 = vadd.xlane.f32.xlu1 %v6963_v44  ;;  %v1425_v46 = vadd.f32 %v4928_v60, %v1327_v54  ;;  %v5171_v54 = vld [vmem:[%s8142_s9 + $0x54] ss:$8 sps:$4 sm:$0xff]  }
 0x355   : > { %v4929_v51 = vpop.f32.mrb[6].mxu1  ;;  %v1417_v22 = vadd.f32 %v1416_v53, %v1317_v1 }
 0x356   : > { %v1419_v18 = vpop.f32.mrb[7].mxu1  ;;  %2822 = vadd.xlane.f32.xlu0 %v2788_v37  ;;  %v1428_v21 = vadd.f32 %v4929_v51, %v1332_v13  ;;  %v6980_v56 = vadd.f32 %v5524_v40, %v1425_v46  ;;  %v5163_v37 = vld [vmem:[%s8142_s9 + $0x30] ss:$8 sps:$4 sm:$0xff]   ;;  %v5174_v46 = vld [vmem:[%s8142_s9 + $0x64] ss:$8 sps:$4 sm:$0xff]  }
 0x357   : > { %v6987_v4 = vadd.f32 %v5526_v58, %v1417_v22  ;;  %v1420_v16 = vadd.f32 %v1419_v18, %v1322_v15  ;;  %3313 = vmatpush1.bf16.msra.mxu0 %v5163_v37  ;;  %v5168_v15 = vld [vmem:[%s8142_s9 + $0x44] ss:$8 sps:$4 sm:$0xff]   ;;  %v5177_v13 = vld [vmem:[%s8142_s9 + $0x74] ss:$8 sps:$4 sm:$0xff]  }
 0x358   : > { %2824 = vadd.xlane.f32.xlu1 %v2789_v11  ;;  %v6983_v27 = vadd.f32 %v5525_v24, %v1428_v21  ;;  %v2792_v17 = vmul.f32 %v6980_v56, %v6980_v56  ;;  %3314 = vmatprep.subr.bf16.mxu0 %v5168_v15  ;;  %v5169_v11 = vld [vmem:[%s8142_s9 + $0x50] ss:$8 sps:$4 sm:$0xff]  }
 0x359   : > { %8197 = vst [vmem:[#allocation21_spill] sm:$0xff] %v6987_v4  ;;  %v6994_v14 = vadd.f32 %v5527_v5, %v1420_v16  ;;  %v2790_v55 = vmul.f32 %v6987_v4, %v6987_v4  ;;  %v5175_v21 = vld [vmem:[%s8142_s9 + $0x70] ss:$8 sps:$4 sm:$0xff]  }
 0x35a   : > { %2692 = vadd.xlane.f32.xlu0 %v6970_v8  ;;  %v2793_v41 = vmul.f32 %v6983_v27, %v6983_v27  ;;  %v2500_v16 = vld [vmem:[%s8141_s8 + $0x30] sm:$0xff] }
 0x35b   : > { %8198 = vst [vmem:[#allocation22_spill] sm:$0xff] %v6994_v14  ;;  %v2791_v30 = vmul.f32 %v6994_v14, %v6994_v14  ;;  %3315 = vmatpush1.bf16.msra.mxu0 %v5166_v34 }
 0x35c   : > { %2820 = vadd.xlane.f32.xlu1 %v2787_v7  ;;  %3316 = vmatprep.subr.bf16.mxu0 %v5171_v54  ;;  %v5172_v7 = vld [vmem:[%s8142_s9 + $0x60] ss:$8 sps:$4 sm:$0xff]  }
 0x35e   : > { %2818 = vadd.xlane.f32.xlu0 %v2786_v47  ;;  %v2501_v47 = vld [vmem:[%s8141_s8 + $0x38] sm:$0xff] }
 0x35f   : > { %3317 = vmatpush1.bf16.msra.mxu0 %v5169_v11 }
 0x360   : > { %2702 = vadd.xlane.f32.xlu1 %v6980_v56  ;;  %3318 = vmatprep.subr.bf16.mxu0 %v5174_v46  ;;  %v5537_v46 = vld [vmem:[%s6069_s23 + $0x80] sm:$0xff] }
 0x362   : > { %2704 = vadd.xlane.f32.xlu0 %v6983_v27 }
 0x363   : > { %3319 = vmatpush1.bf16.msra.mxu0 %v5172_v7 }
 0x364   : > { %2698 = vadd.xlane.f32.xlu1 %v6987_v4  ;;  %3320 = vmatprep.subr.bf16.mxu0 %v5177_v13 }
 0x366   : > { %2830 = vadd.xlane.f32.xlu0 %v2792_v17 }
 0x367   : > { %3321 = vmatpush1.bf16.msra.mxu0 %v5175_v21 }
 0x368   : > { %2832 = vadd.xlane.f32.xlu1 %v2793_v41 }
 0x36a   : > { %2700 = vadd.xlane.f32.xlu0 %v6994_v14 }
 0x36b   : > { %v4956_v25 = vpop.f32.mrb[8].mxu1 }
 0x36c   : > { %v1811_v35 = vadd.f32 %v4956_v25, %v1709_v52  ;;  %v1802_v36 = vpop.f32.mrb[9].mxu1  ;;  %2828 = vadd.xlane.f32.xlu1 %v2791_v30 }
 0x36d   : > { %v4957_v20 = vpop.f32.mrb[10].mxu1  ;;  %v1803_v57 = vadd.f32 %v1802_v36, %v1699_v61 }
 0x36e   : > { %v7016_v39 = vadd.f32 %v5528_v49, %v1811_v35  ;;  %v1814_v50 = vadd.f32 %v4957_v20, %v1714_v31  ;;  %v1805_v9 = vpop.f32.mrb[11].mxu1  ;;  %2826 = vadd.xlane.f32.xlu0 %v2790_v55  ;;  %v5533_v31 = vld [vmem:[%s6069_s23 + $0x68] sm:$0xff]  ;;  %v1734_v49 = vpop.permute.xlu0 %1733 }
 0x36f   : > { %v7026_v29 = vadd.f32 %v5530_v33, %v1803_v57  ;;  %v1806_v6 = vadd.f32 %v1805_v9, %v1704_v0  ;;  %v1719_v0 = vpop.permute.xlu1 %1718 }
 0x370   : > { %v7019_v62 = vadd.f32 %v5529_v42, %v1814_v50  ;;  %2710 = vadd.xlane.f32.xlu1 %v7016_v39  ;;  %v2796_v19 = vmul.f32 %v7016_v39, %v7016_v39 }
 0x371   : > { %v7041_v1 = vadd.f32 %v5531_v32, %v1806_v6  ;;  %v2794_v18 = vmul.f32 %v7026_v29, %v7026_v29 }
 0x372   : > { %2712 = vadd.xlane.f32.xlu0 %v7019_v62  ;;  %v2797_v53 = vmul.f32 %v7019_v62, %v7019_v62 }
 0x373   : > { %v7032_v43 = vpop.f32.mrb[12].mxu1  ;;  %v2795_v51 = vmul.f32 %v7041_v1, %v7041_v1  ;;  %v1729_v55 = vpop.permute.xlu1 %1728 }
 0x374   : > { %v1818_v2 = vpop.f32.mrb[13].mxu1  ;;  %2706 = vadd.xlane.f32.xlu1 %v7026_v29  ;;  %v1827_v50 = vadd.f32 %v7032_v43, %v1729_v55  ;;  %v5534_v43 = vld [vmem:[%s6069_s23 + $0x70] sm:$0xff] }
 0x375   : > { %v4961_v63 = vpop.f32.mrb[14].mxu1  ;;  %v1819_v59 = vadd.f32 %v1818_v2, %v1719_v0  ;;  %v5538_v0 = vld [vmem:[%s6069_s23 + $0x98] sm:$0xff] }
 0x376   : > { %v1821_v60 = vpop.f32.mrb[15].mxu1  ;;  %2838 = vadd.xlane.f32.xlu0 %v2796_v19  ;;  %v1830_v9 = vadd.f32 %v4961_v63, %v1734_v49  ;;  %v2107_v19 = vpop.permute.xlu0 %2106  ;;  %v7123_v63 = vadd.f32 %v5534_v43, %v1827_v50 }
 0x377   : > { %v1822_v52 = vadd.f32 %v1821_v60, %v1724_v38  ;;  %v7102_v26 = vadd.f32 %v5532_v45, %v1819_v59  ;;  %v2102_v6 = vpop.permute.xlu1 %2101 }
 0x378   : > { %2840 = vadd.xlane.f32.xlu1 %v2797_v53  ;;  %v7126_v32 = vadd.f32 %v5535_v3, %v1830_v9  ;;  %v2800_v34 = vmul.f32 %v7123_v63, %v7123_v63  ;;  %v5540_v9 = vld [vmem:[%s6069_s23 + $0xa8] sm:$0xff] }
 0x379   : > { %v7105_v20 = vadd.f32 %v5533_v31, %v1822_v52  ;;  %v2798_v2 = vmul.f32 %v7102_v26, %v7102_v26 }
 0x37a   : > { %2708 = vadd.xlane.f32.xlu0 %v7041_v1  ;;  %v2801_v37 = vmul.f32 %v7126_v32, %v7126_v32  ;;  %v2112_v15 = vpop.permute.xlu0 %2111 }
 0x37b   : > { %v2799_v23 = vmul.f32 %v7105_v20, %v7105_v20  ;;  %v2117_v60 = vpop.permute.xlu1 %2116 }
 0x37c   : > { %2836 = vadd.xlane.f32.xlu1 %v2795_v51 }
 0x37e   : > { %2834 = vadd.xlane.f32.xlu0 %v2794_v18  ;;  %v5536_v18 = vld [vmem:[%s6069_s23 + $0x88] sm:$0xff]  ;;  %v2122_v13 = vpop.permute.xlu0 %2121 }
 0x37f   : > { %v2127_v54 = vpop.permute.xlu1 %2126 }
 0x382   : > { %v2132_v59 = vpop.permute.xlu0 %2131 }
 0x386   : > { %v2505_v50 = vpop.permute.xlu0 %2504 }
 0x38a   : > { %v2515_v43 = vpop.permute.xlu0 %2514 }
 0x38b   : > { %v7080_v40 = vpop.f32.mrb[16].mxu1 }
 0x38c   : > { %v2205_v22 = vpop.f32.mrb[17].mxu1 }
 0x38d   : > { %v4989_v24 = vpop.f32.mrb[18].mxu1  ;;  %2539 = vperm.xlu1 %5121, %v2501_v47   ;;  %v2206_v51 = vadd.f32 %v2205_v22, %v2102_v6  ;;  %v2214_v22 = vadd.f32 %v7080_v40, %v2112_v15 }
 0x38e   : > { %v2208_v58 = vpop.f32.mrb[19].mxu1  ;;  %v2217_v21 = vadd.f32 %v4989_v24, %v2117_v60  ;;  %v5539_v24 = vld [vmem:[%s6069_s23 + $0x90] sm:$0xff] }
 0x38f   : > { %v2209_v53 = vadd.f32 %v2208_v58, %v2107_v19  ;;  %v7138_v7 = vadd.f32 %v5537_v46, %v2206_v51  ;;  %v7151_v52 = vadd.f32 %v5539_v24, %v2214_v22 }
 0x390   : > { %v7148_v38 = vadd.f32 %v5538_v0, %v2217_v21  ;;  %v5544_v21 = vld [vmem:[%s6069_s23 + $0xc8] sm:$0xff] }
 0x391   : > { %v7135_v11 = vadd.f32 %v5536_v18, %v2209_v53  ;;  %v2802_v58 = vmul.f32 %v7138_v7, %v7138_v7  ;;  %v2804_v49 = vmul.f32 %v7151_v52, %v7151_v52  ;;  %v5542_v53 = vld [vmem:[%s6069_s23 + $0xb8] sm:$0xff] }
 0x392   : > { %8199 = vst [vmem:[#allocation23_spill] sm:$0xff] %v7148_v38  ;;  %v2805_v40 = vmul.f32 %v7148_v38, %v7148_v38 }
 0x393   : > { %v7085_v17 = vpop.f32.mrb[20].mxu1  ;;  %v2803_v47 = vmul.f32 %v7135_v11, %v7135_v11 }
 0x394   : > { %v7087_v61 = vpop.f32.mrb[21].mxu1  ;;  %2534 = vperm.xlu0 %5120, %v2500_v16   ;;  %v2137_v16 = vpop.permute.xlu1 %2136  ;;  %v2230_v3 = vadd.f32 %v7085_v17, %v2132_v59 }
 0x395   : > { %v7089_v5 = vpop.f32.mrb[22].mxu1  ;;  %v2222_v31 = vadd.f32 %v7087_v61, %v2122_v13 }
 0x396   : > { %v7091_v41 = vpop.f32.mrb[23].mxu1  ;;  %v2233_v19 = vadd.f32 %v7089_v5, %v2137_v16  ;;  %v5543_v5 = vld [vmem:[%s6069_s23 + $0xb0] sm:$0xff] }
 0x397   : > { %v2225_v55 = vadd.f32 %v7091_v41, %v2127_v54  ;;  %v5541_v41 = vld [vmem:[%s6069_s23 + $0xa0] sm:$0xff]  ;;  %v7179_v51 = vadd.f32 %v5543_v5, %v2230_v3 }
 0x398   : > { %v2510_v45 = vpop.permute.xlu1 %2509  ;;  %v7165_v6 = vadd.f32 %v5541_v41, %v2222_v31 }
 0x399   : > { %8203 = vst [vmem:[#allocation27_spill] sm:$0xff] %v7179_v51  ;;  %v2808_v13 = vmul.f32 %v7179_v51, %v7179_v51 }
 0x39a   : > { %8201 = vst [vmem:[#allocation25_spill] sm:$0xff] %v7165_v6  ;;  %v2806_v60 = vmul.f32 %v7165_v6, %v7165_v6 }
 0x3aa   : > { %v7093_v30 = vpop.f32.mrb[24].mxu1 }
 0x3ab   : > { %v7095_v25 = vpop.f32.mrb[25].mxu1 }
 0x3ac   : > { %v7097_v35 = vpop.f32.mrb[26].mxu1  ;;  %v2609_v54 = vadd.f32 %v7095_v25, %v2505_v50  ;;  %v5546_v50 = vld [vmem:[%s6069_s23 + $0xd8] sm:$0xff] }
 0x3ad   : > { %v7099_v36 = vpop.f32.mrb[27].mxu1 }
 0x3ae   : > { %v2612_v18 = vadd.f32 %v7099_v36, %v2510_v45 }
 0x3b1   : > { %2714 = vadd.xlane.f32.xlu1 %v7102_v26 }
 0x3b2   : > { %v7108_v57 = vpop.f32.mrb[28].mxu1 }
 0x3b3   : > { %2716 = vadd.xlane.f32.xlu0 %v7105_v20  ;;  %v7112_v42 = vpop.f32.mrb[29].mxu1 }
 0x3b4   : > { %v7116_v33 = vpop.f32.mrb[30].mxu1 }
 0x3b5   : > { %2844 = vadd.xlane.f32.xlu1 %v2799_v23  ;;  %v7118_v28 = vpop.f32.mrb[31].mxu1  ;;  %v7162_v23 = vadd.f32 %v5540_v9, %v2225_v55  ;;  %v2617_v55 = vadd.f32 %v7093_v30, %v2515_v43  ;;  %v5547_v43 = vld [vmem:[%s6069_s23 + $0xd0] sm:$0xff] }
 0x3b7   : > { %2842 = vadd.xlane.f32.xlu0 %v2798_v2  ;;  %8200 = vst [vmem:[#allocation24_spill] sm:$0xff] %v7162_v23  ;;  %v2520_v2 = vpop.permute.xlu1 %2519  ;;  %v2807_v61 = vmul.f32 %v7162_v23, %v7162_v23  ;;  %v7217_v3 = vadd.f32 %v5547_v43, %v2617_v55 }
 0x3b8   : > { %v2620_v25 = vadd.f32 %v7097_v35, %v2520_v2 }
 0x3b9   : > { %2718 = vadd.xlane.f32.xlu1 %v7123_v63  ;;  %8207 = vst [vmem:[#allocation31_spill] sm:$0xff] %v7217_v3 }
 0x3ba   : > { %v7210_v9 = vadd.f32 %v5546_v50, %v2620_v25  ;;  %v5549_v50 = vld [vmem:[%s6069_s23 + $0xe0] sm:$0xff] }
 0x3bb   : > { %2720 = vadd.xlane.f32.xlu0 %v7126_v32  ;;  %v2530_v15 = vpop.permute.xlu1 %2529 }
 0x3bc   : > { %8206 = vst [vmem:[#allocation30_spill] sm:$0xff] %v7210_v9 }
 0x3bd   : > { %2848 = vadd.xlane.f32.xlu1 %v2801_v37  ;;  %v7176_v37 = vadd.f32 %v5542_v53, %v2233_v19 }
 0x3bf   : > { %2846 = vadd.xlane.f32.xlu0 %v2800_v34  ;;  %8202 = vst [vmem:[#allocation26_spill] sm:$0xff] %v7176_v37  ;;  %v2525_v34 = vpop.permute.xlu0 %2524  ;;  %v2809_v17 = vmul.f32 %v7176_v37, %v7176_v37 }
 0x3c1   : > { %2724 = vadd.xlane.f32.xlu1 %v7135_v11 }
 0x3c3   : > { %2722 = vadd.xlane.f32.xlu0 %v7138_v7 }
 0x3c5   : > { %2852 = vadd.xlane.f32.xlu1 %v2803_v47  ;;  %v7190_v47 = vadd.f32 %v5544_v21, %v2612_v18  ;;  %v2628_v18 = vadd.f32 %v7118_v28, %v2530_v15  ;;  %v2812_v28 = vmul.f32 %v7217_v3, %v7217_v3 }
 0x3c7   : > { %2850 = vadd.xlane.f32.xlu0 %v2802_v58  ;;  %8204 = vst [vmem:[#allocation28_spill] sm:$0xff] %v7190_v47  ;;  %v5545_v58 = vld [vmem:[%s6069_s23 + $0xc0] sm:$0xff]  ;;  %v2811_v24 = vmul.f32 %v7190_v47, %v7190_v47 }
 0x3c8   : > { %v7193_v36 = vadd.f32 %v5545_v58, %v2609_v54 }
 0x3c9   : > { %2728 = vadd.xlane.f32.xlu1 %v7148_v38 }
 0x3ca   : > { %8205 = vst [vmem:[#allocation29_spill] sm:$0xff] %v7193_v36  ;;  %v2810_v45 = vmul.f32 %v7193_v36, %v7193_v36 }
 0x3cb   : > { %2726 = vadd.xlane.f32.xlu0 %v7151_v52 }
 0x3cd   : > { %2856 = vadd.xlane.f32.xlu1 %v2805_v40 }
 0x3cf   : > { %2854 = vadd.xlane.f32.xlu0 %v2804_v49 }
 0x3d1   : > { %2732 = vadd.xlane.f32.xlu1 %v7162_v23 }
 0x3d3   : > { %2730 = vadd.xlane.f32.xlu0 %v7165_v6 }
 0x3d5   : > { %2860 = vadd.xlane.f32.xlu1 %v2807_v61 }
 0x3d7   : > { %2858 = vadd.xlane.f32.xlu0 %v2806_v60 }
 0x3d9   : > { %2736 = vadd.xlane.f32.xlu1 %v7176_v37 }
 0x3db   : > { %2734 = vadd.xlane.f32.xlu0 %v7179_v51 }
 0x3dd   : > { %2864 = vadd.xlane.f32.xlu1 %v2809_v17  ;;  %v2695_v46 = vpop.xlane.xlu1 %2694 }
 0x3de   : > { %v7205_v31 = vmul.f32 0.0078125, %v2695_v46  ;;  %v2813_v46 = vmul.f32 %v7210_v9, %v7210_v9 }
 0x3df   : > { %v2697_v22 = vpop.xlane.xlu0 %2696  ;;  %2862 = vadd.xlane.f32.xlu0 %v2808_v13 }
 0x3e0   : > { %v7196_v0 = vmul.f32 0.0078125, %v2697_v22  ;;  %v2916_v53 = vmul.f32 %v7205_v31, %v7205_v31 }
 0x3e1   : > { %2740 = vadd.xlane.f32.xlu1 %v7190_v47  ;;  %v2691_v16 = vpop.xlane.xlu1 %2690 }
 0x3e2   : > { %v2917_v49 = vmul.f32 %v7196_v0, %v7196_v0  ;;  %v7212_v2 = vmul.f32 0.0078125, %v2691_v16  ;;  %v2625_v16 = vadd.f32 %v7112_v42, %v2525_v34 }
 0x3e3   : > { %v2823_v59 = vpop.xlane.xlu0 %2822  ;;  %2738 = vadd.xlane.f32.xlu0 %v7193_v36 }
 0x3e4   : > { %v2884_v19 = vmul.f32 0.0078125, %v2823_v59  ;;  %v2914_v13 = vmul.f32 %v7212_v2, %v7212_v2 }
 0x3e5   : > { %2868 = vadd.xlane.f32.xlu1 %v2811_v24  ;;  %v2825_v40 = vpop.xlane.xlu1 %2824  ;;  %v5548_v24 = vld [vmem:[%s6069_s23 + $0xe8] sm:$0xff] }
 0x3e6   : > { %v2885_v35 = vmul.f32 0.0078125, %v2825_v40  ;;  %v2948_v21 = vsub.f32 %v2884_v19, %v2916_v53  ;;  %v7234_v55 = vadd.f32 %v5548_v24, %v2628_v18 }
 0x3e7   : > { %v2693_v41 = vpop.xlane.xlu0 %2692  ;;  %2866 = vadd.xlane.f32.xlu0 %v2810_v45 }
 0x3e8   : > { %v2949_v30 = vsub.f32 %v2885_v35, %v2917_v49  ;;  %v7214_v61 = vmul.f32 0.0078125, %v2693_v41  ;;  %8208 = vst [vmem:[#allocation32_spill] sm:$0xff] %v7234_v55  ;;  %v3012_v49 = vadd.f32 1e-05, %v2948_v21  ;;  %v7237_v41 = vadd.f32 %v5549_v50, %v2625_v16 }
 0x3e9   : > { %2744 = vadd.xlane.f32.xlu1 %v7210_v9  ;;  %v2821_v60 = vpop.xlane.xlu1 %2820 }
 0x3ea   : > { %v2915_v5 = vmul.f32 %v7214_v61, %v7214_v61  ;;  %v2883_v17 = vmul.f32 0.0078125, %v2821_v60  ;;  %v3013_v22 = vadd.f32 1e-05, %v2949_v30  ;;  %8209 = vst [vmem:[#allocation33_spill] sm:$0xff] %v7237_v41  ;;  %v2815_v30 = vmul.f32 %v7234_v55, %v7234_v55 }
 0x3eb   : > { %v2819_v54 = vpop.xlane.xlu0 %2818  ;;  %2742 = vadd.xlane.f32.xlu0 %v7217_v3  ;;  %v2814_v60 = vmul.f32 %v7237_v41, %v7237_v41  ;;  %v2979_v16 = vsub.f32 %v6970_v8, %v7214_v61 }
 0x3ec   : > { %v2882_v58 = vmul.f32 0.0078125, %v2819_v54  ;;  %v2947_v25 = vsub.f32 %v2883_v17, %v2915_v5  ;;  %5322 = vrsqrt.f32 %v3013_v22 }
 0x3ed   : > { %2872 = vadd.xlane.f32.xlu1 %v2813_v46  ;;  %v2703_v59 = vpop.xlane.xlu1 %2702 }
 0x3ee   : > { %v2946_v15 = vsub.f32 %v2882_v58, %v2914_v13  ;;  %v3011_v40 = vadd.f32 1e-05, %v2947_v25  ;;  %v7247_v53 = vmul.f32 0.0078125, %v2703_v59 }
 0x3ef   : > { %v2705_v45 = vpop.xlane.xlu0 %2704  ;;  %2870 = vadd.xlane.f32.xlu0 %v2812_v28 }
 0x3f0   : > { %v3010_v35 = vadd.f32 1e-05, %v2946_v15  ;;  %5324 = vrsqrt.f32 %v3011_v40  ;;  %v7240_v34 = vmul.f32 0.0078125, %v2705_v45  ;;  %v2920_v25 = vmul.f32 %v7247_v53, %v7247_v53 }
 0x3f1   : > { %2748 = vadd.xlane.f32.xlu1 %v7234_v55  ;;  %v2699_v42 = vpop.xlane.xlu1 %2698  ;;  %v2978_v15 = vsub.f32 %v6963_v44, %v7212_v2 }
 0x3f2   : > { %5326 = vrsqrt.f32 %v3010_v35  ;;  %v2921_v5 = vmul.f32 %v7240_v34, %v7240_v34  ;;  %v7251_v17 = vmul.f32 0.0078125, %v2699_v42 }
 0x3f3   : > { %v2831_v19 = vpop.xlane.xlu0 %2830  ;;  %2746 = vadd.xlane.f32.xlu0 %v7237_v41  ;;  %5328 = vrsqrt.f32 %v3012_v49 }
 0x3f4   : > { %v2888_v46 = vmul.f32 0.0078125, %v2831_v19  ;;  %v2918_v24 = vmul.f32 %v7251_v17, %v7251_v17  ;;  %v2981_v19 = vsub.f32 %v6959_v48, %v7196_v0 }
 0x3f5   : > { %2876 = vadd.xlane.f32.xlu1 %v2815_v30  ;;  %v2833_v43 = vpop.xlane.xlu1 %2832 }
 0x3f6   : > { %v2889_v18 = vmul.f32 0.0078125, %v2833_v43  ;;  %v5323_v58 = vpop.eup %5322  ;;  %v2952_v50 = vsub.f32 %v2888_v46, %v2920_v25 }
 0x3f7   : > { %v2701_v54 = vpop.xlane.xlu0 %2700  ;;  %2874 = vadd.xlane.f32.xlu0 %v2814_v60 }
 0x3f8   : > { %v2953_v13 = vsub.f32 %v2889_v18, %v2921_v5  ;;  %v7253_v21 = vmul.f32 0.0078125, %v2701_v54  ;;  %v7267_v5 = vld [vmem:[#allocation6] ss:$0 sm:$0xff]  ;;  %v3016_v25 = vadd.f32 1e-05, %v2952_v50 }
 0x3f9   : > { %v2829_v22 = vpop.xlane.xlu1 %2828 }
 0x3fa   : > { %v2919_v59 = vmul.f32 %v7253_v21, %v7253_v21  ;;  %v5325_v28 = vpop.eup %5324  ;;  %v2887_v40 = vmul.f32 0.0078125, %v2829_v22  ;;  %v3017_v42 = vadd.f32 1e-05, %v2953_v13  ;;  %v2980_v22 = vsub.f32 %v6956_v12, %v7205_v31 }
 0x3fb   : > { %v2827_v45 = vpop.xlane.xlu0 %2826  ;;  %v3075_v35 = vmul.f32 %v5325_v28, %v2979_v16  ;;  %v3077_v13 = vmul.f32 %v5323_v58, %v2981_v19  ;;  %v7273_v28 = vld [vmem:[#allocation8] ss:$0 sm:$0xff]  ;;  %v8210_v19 = vmov 0  }
 0x3fc   : > { %v5327_v49 = vpop.eup %5326  ;;  %v2886_v61 = vmul.f32 0.0078125, %v2827_v45  ;;  %v2951_v43 = vsub.f32 %v2887_v40, %v2919_v59  ;;  %5330 = vrsqrt.f32 %v3017_v42 }
 0x3fd   : > { %v3074_v30 = vmul.f32 %v5327_v49, %v2978_v15  ;;  %v2711_v60 = vpop.xlane.xlu1 %2710  ;;  %v5329_v18 = vpop.eup %5328  ;;  %v3113_v54 = vmul.f32 %v7267_v5, %v3075_v35  ;;  %v3115_v35 = vmul.f32 %v7267_v5, %v3077_v13  ;;  %v2983_v13 = vsub.f32 %v6994_v14, %v7253_v21 }
 0x3fe   : > { %v2950_v2 = vsub.f32 %v2886_v61, %v2918_v24  ;;  %v3015_v10 = vadd.f32 1e-05, %v2951_v43  ;;  %v3076_v40 = vmul.f32 %v5329_v18, %v2980_v22  ;;  %v7281_v42 = vmul.f32 0.0078125, %v2711_v60 }
 0x3ff   : > { %v2713_v16 = vpop.xlane.xlu0 %2712  ;;  %v3112_v46 = vmul.f32 %v7267_v5, %v3074_v30  ;;  %v3151_v24 = vadd.f32 %v7273_v28, %v3113_v54  ;;  %v3153_v18 = vadd.f32 %v7273_v28, %v3115_v35 }
 0x400   : > { %v3014_v0 = vadd.f32 1e-05, %v2950_v2  ;;  %5332 = vrsqrt.f32 %v3015_v10  ;;  %v7277_v45 = vmul.f32 0.0078125, %v2713_v16  ;;  %v3114_v50 = vmul.f32 %v7267_v5, %v3076_v40 }
 0x401   : > { %v2707_v59 = vpop.xlane.xlu1 %2706  ;;  %v3150_v15 = vadd.f32 %v7273_v28, %v3112_v46 }
 0x402   : > { %5334 = vrsqrt.f32 %v3014_v0  ;;  %v2925_v10 = vmul.f32 %v7277_v45, %v7277_v45  ;;  %v7286_v30 = vmul.f32 0.0078125, %v2707_v59  ;;  %v3152_v46 = vadd.f32 %v7273_v28, %v3114_v50 }
 0x403   : > { %v2839_v31 = vpop.xlane.xlu0 %2838  ;;  %v3182_v49 = vpack.c.bf16 %v3151_v24, %v3150_v15  ;;  %5336 = vrsqrt.f32 %v3016_v25  ;;  %v2924_v25 = vmul.f32 %v7281_v42, %v7281_v42  ;;  %v2982_v15 = vsub.f32 %v6987_v4, %v7251_v17 }
 0x404   : > { %v2892_v2 = vmul.f32 0.0078125, %v2839_v31  ;;  %v2922_v24 = vmul.f32 %v7286_v30, %v7286_v30 }
 0x405   : > { %3339 = vmatmul.mubr.bf16.vlgmr.msra.gmra.mrb[32].mxu0 %v3182_v49  ;;  %v2841_v58 = vpop.xlane.xlu1 %2840  ;;  %v3183_v49 = vpack.c.bf16 %v3153_v18, %v3152_v46 }
 0x406   : > { %v2893_v61 = vmul.f32 0.0078125, %v2841_v58  ;;  %3348 = vmatprep.mubr.bf16.mxu0 %v8210_v19  ;;  %v5331_v60 = vpop.eup %5330  ;;  %v2956_v58 = vsub.f32 %v2892_v2, %v2924_v25  ;;  %v2984_v2 = vsub.f32 %v6980_v56, %v7247_v53  ;;  %v5550_v25 = vld [vmem:[%s6069_s23 + $0xf8] sm:$0xff] }
 0x407   : > { %v2709_v43 = vpop.xlane.xlu0 %2708 }
 0x408   : > { %v2957_v54 = vsub.f32 %v2893_v61, %v2925_v10  ;;  %v7289_v22 = vmul.f32 0.0078125, %v2709_v43  ;;  %v2985_v61 = vsub.f32 %v6983_v27, %v7240_v34  ;;  %v3020_v46 = vadd.f32 1e-05, %v2956_v58 }
 0x409   : > { %v2837_v16 = vpop.xlane.xlu1 %2836 }
 0x40a   : > { %v2923_v0 = vmul.f32 %v7289_v22, %v7289_v22  ;;  %v5333_v59 = vpop.eup %5332  ;;  %v2891_v40 = vmul.f32 0.0078125, %v2837_v16  ;;  %v3021_v50 = vadd.f32 1e-05, %v2957_v54  ;;  %v3081_v34 = vmul.f32 %v5331_v60, %v2985_v61 }
 0x40b   : > { %v2835_v31 = vpop.xlane.xlu0 %2834  ;;  %v3079_v10 = vmul.f32 %v5333_v59, %v2983_v13 }
 0x40c   : > { %v5335_v35 = vpop.eup %5334  ;;  %v2890_v21 = vmul.f32 0.0078125, %v2835_v31  ;;  %v2955_v43 = vsub.f32 %v2891_v40, %v2923_v0  ;;  %5338 = vrsqrt.f32 %v3021_v50 }
 0x40d   : > { %3349 = vmatmul.mubr.bf16.gmra.mrb[36].mxu0 %v3183_v49  ;;  %v2540_v14 = vpop.permute.xlu1 %2539  ;;  %v3078_v48 = vmul.f32 %v5335_v35, %v2982_v15  ;;  %v5337_v17 = vpop.eup %5336  ;;  %v3117_v18 = vmul.f32 %v7267_v5, %v3079_v10 }
 0x40e   : > { %v2954_v4 = vsub.f32 %v2890_v21, %v2922_v24  ;;  %v2636_v12 = vadd.f32 %v7116_v33, %v2540_v14  ;;  %3358 = vmatprep.mubr.bf16.mxu0 %v8210_v19  ;;  %v3019_v54 = vadd.f32 1e-05, %v2955_v43  ;;  %v3080_v59 = vmul.f32 %v5337_v17, %v2984_v2  ;;  %v5551_v24 = vld [vmem:[%s6069_s23 + $0xf0] sm:$0xff]  ;;  %s5694_s23 = scalar_lea.vmem %s8086_s14, 4096 }
 0x40f   : > { %v3116_v16 = vmul.f32 %v7267_v5, %v3078_v48  ;;  %v3155_v33 = vadd.f32 %v7273_v28, %v3117_v18  ;;  %v3119_v48 = vmul.f32 %v7267_v5, %v3081_v34  ;;  %v2986_v21 = vsub.f32 %v7026_v29, %v7286_v30  ;;  %p5695_p4 = scmp.ne.s32.totalorder %s8086_s14, %s5694_s23 }
 0x410   : > { %v3018_v13 = vadd.f32 1e-05, %v2954_v4  ;;  %v7311_v0 = vadd.f32 %v5550_v25, %v2636_v12  ;;  %5340 = vrsqrt.f32 %v3019_v54  ;;  %v3118_v60 = vmul.f32 %v7267_v5, %v3080_v59 }
 0x411   : > { %v3154_v14 = vadd.f32 %v7273_v28, %v3116_v16  ;;  %v3157_v31 = vadd.f32 %v7273_v28, %v3119_v48  ;;  %v2989_v17 = vsub.f32 %v7019_v62, %v7277_v45  ;;  %v2988_v54 = vsub.f32 %v7016_v39, %v7281_v42  ;;  %p5696_p6 = pnand %p5695_p4, %p6011_p1 }
 0x412   : > { %8211 = vst [vmem:[#allocation34_spill] sm:$0xff] %v7311_v0  ;;  %5342 = vrsqrt.f32 %v3018_v13  ;;  %2752 = vadd.xlane.f32.xlu1 %v7311_v0  ;;  %v2817_v12 = vmul.f32 %v7311_v0, %v7311_v0  ;;  %v3156_v49 = vadd.f32 %v7273_v28, %v3118_v60 }
 0x413   : > { %v2535_v53 = vpop.permute.xlu0 %2534  ;;  %v3184_v15 = vpack.c.bf16 %v3155_v33, %v3154_v14  ;;  %5344 = vrsqrt.f32 %v3020_v46  ;;  %p5697_p8 = pneg %p5696_p6 }
 0x414   : > { %v2633_v4 = vadd.f32 %v7108_v57, %v2535_v53  ;;  %v2987_v57 = vsub.f32 %v7041_v1, %v7289_v22  ;;  %v3185_v10 = vpack.c.bf16 %v3157_v31, %v3156_v49 }
 0x415   : > { %3359 = vmatmul.mubr.bf16.gmra.mrb[40].mxu0 %v3184_v15 }
 0x416   : > { %v7322_v40 = vadd.f32 %v5551_v24, %v2633_v4  ;;  %2880 = vadd.xlane.f32.xlu1 %v2817_v12  ;;  %3368 = vmatprep.mubr.bf16.mxu0 %v8210_v19  ;;  %v5339_v35 = vpop.eup %5338 }
 0x417   : > { %v3085_v30 = vmul.f32 %v5339_v35, %v2989_v17 }
 0x418   : > { %8212 = vst [vmem:[#allocation35_spill] sm:$0xff] %v7322_v40  ;;  %2750 = vadd.xlane.f32.xlu0 %v7322_v40  ;;  %v2816_v58 = vmul.f32 %v7322_v40, %v7322_v40 }
 0x419   : > { %v3123_v45 = vmul.f32 %v7267_v5, %v3085_v30 }
 0x41a   : > { %v5341_v50 = vpop.eup %5340 }
 0x41b   : > { %v3083_v43 = vmul.f32 %v5341_v50, %v2987_v57  ;;  %v3161_v33 = vadd.f32 %v7273_v28, %v3123_v45 }
 0x41c   : > { %v5343_v61 = vpop.eup %5342  ;;  %2878 = vadd.xlane.f32.xlu0 %v2816_v58 }
 0x41d   : > { %3369 = vmatmul.mubr.bf16.gmra.mrb[44].mxu0 %v3185_v10  ;;  %v3082_v18 = vmul.f32 %v5343_v61, %v2986_v21  ;;  %v5345_v2 = vpop.eup %5344  ;;  %v3121_v22 = vmul.f32 %v7267_v5, %v3083_v43 }
 0x41e   : > { %3378 = vmatprep.mubr.bf16.mxu0 %v8210_v19  ;;  %v3084_v13 = vmul.f32 %v5345_v2, %v2988_v54 }
 0x41f   : > { %v3120_v16 = vmul.f32 %v7267_v5, %v3082_v18  ;;  %v3159_v46 = vadd.f32 %v7273_v28, %v3121_v22 }
 0x420   : > { %v3122_v14 = vmul.f32 %v7267_v5, %v3084_v13 }
 0x421   : > { %v3158_v34 = vadd.f32 %v7273_v28, %v3120_v16 }
 0x422   : > { %v3160_v42 = vadd.f32 %v7273_v28, %v3122_v14 }
 0x423   : > { %v3186_v25 = vpack.c.bf16 %v3159_v46, %v3158_v34 }
 0x424   : > { %v3187_v59 = vpack.c.bf16 %v3161_v33, %v3160_v42 }
 0x425   : > { %3379 = vmatmul.mubr.bf16.gmra.mrb[48].mxu0 %v3186_v25 }
 0x426   : > { %3388 = vmatprep.mubr.bf16.mxu0 %v8210_v19 }
 0x42d   : > { %3389 = vmatmul.mubr.bf16.gmra.mrb[52].mxu0 %v3187_v59 }
 0x42e   : > { %3398 = vmatprep.mubr.bf16.mxu0 %v8210_v19 }
 0x43e   : > { %v2715_v53 = vpop.xlane.xlu1 %2714 }
 0x43f   : > { %v2766_v48 = vmul.f32 0.0078125, %v2715_v53 }
 0x440   : > { %v2717_v15 = vpop.xlane.xlu0 %2716 }
 0x441   : > { %v2767_v4 = vmul.f32 0.0078125, %v2717_v15  ;;  %v2926_v49 = vmul.f32 %v2766_v48, %v2766_v48 }
 0x442   : > { %v2845_v12 = vpop.xlane.xlu1 %2844 }
 0x443   : > { %v2927_v60 = vmul.f32 %v2767_v4, %v2767_v4  ;;  %v2895_v24 = vmul.f32 0.0078125, %v2845_v12  ;;  %v2991_v59 = vsub.f32 %v7105_v20, %v2767_v4 }
 0x444   : > { %v2843_v31 = vpop.xlane.xlu0 %2842 }
 0x445   : > { %v2959_v35 = vsub.f32 %v2895_v24, %v2927_v60  ;;  %v2894_v57 = vmul.f32 0.0078125, %v2843_v31  ;;  %v2990_v24 = vsub.f32 %v7102_v26, %v2766_v48 }
 0x446   : > { %v2719_v58 = vpop.xlane.xlu1 %2718 }
 0x447   : > { %v3023_v50 = vadd.f32 1e-05, %v2959_v35  ;;  %v2958_v21 = vsub.f32 %v2894_v57, %v2926_v49  ;;  %v2768_v43 = vmul.f32 0.0078125, %v2719_v58 }
 0x448   : > { %v2721_v10 = vpop.xlane.xlu0 %2720 }
 0x449   : > { %5346 = vrsqrt.f32 %v3023_v50  ;;  %v3022_v61 = vadd.f32 1e-05, %v2958_v21  ;;  %v2769_v17 = vmul.f32 0.0078125, %v2721_v10  ;;  %v2928_v16 = vmul.f32 %v2768_v43, %v2768_v43 }
 0x44a   : > { %v2849_v18 = vpop.xlane.xlu1 %2848 }
 0x44b   : > { %5348 = vrsqrt.f32 %v3022_v61  ;;  %v2897_v2 = vmul.f32 0.0078125, %v2849_v18  ;;  %v2929_v22 = vmul.f32 %v2769_v17, %v2769_v17 }
 0x44c   : > { %v2847_v54 = vpop.xlane.xlu0 %2846 }
 0x44d   : > { %v2896_v30 = vmul.f32 0.0078125, %v2847_v54  ;;  %v2961_v34 = vsub.f32 %v2897_v2, %v2929_v22 }
 0x44e   : > { %v2725_v46 = vpop.xlane.xlu1 %2724 }
 0x44f   : > { %v2960_v13 = vsub.f32 %v2896_v30, %v2928_v16  ;;  %v7349_v25 = vmul.f32 0.0078125, %v2725_v46  ;;  %v3025_v45 = vadd.f32 1e-05, %v2961_v34 }
 0x450   : > { %v2723_v14 = vpop.xlane.xlu0 %2722 }
 0x451   : > { %v3024_v33 = vadd.f32 1e-05, %v2960_v13  ;;  %v7351_v42 = vmul.f32 0.0078125, %v2723_v14  ;;  %5350 = vrsqrt.f32 %v3025_v45  ;;  %v2931_v12 = vmul.f32 %v7349_v25, %v7349_v25 }
 0x452   : > { %v2853_v53 = vpop.xlane.xlu1 %2852  ;;  %v2993_v13 = vsub.f32 %v7126_v32, %v2769_v17 }
 0x453   : > { %v5347_v15 = vpop.eup %5346  ;;  %5352 = vrsqrt.f32 %v3024_v33  ;;  %v2899_v60 = vmul.f32 0.0078125, %v2853_v53  ;;  %v2930_v57 = vmul.f32 %v7351_v42, %v7351_v42 }
 0x454   : > { %v2851_v31 = vpop.xlane.xlu0 %2850  ;;  %v3087_v49 = vmul.f32 %v5347_v15, %v2991_v59  ;;  %v2992_v59 = vsub.f32 %v7123_v63, %v2768_v43 }
 0x455   : > { %v5349_v35 = vpop.eup %5348  ;;  %v2963_v58 = vsub.f32 %v2899_v60, %v2931_v12  ;;  %v2898_v50 = vmul.f32 0.0078125, %v2851_v31 }
 0x456   : > { %v2729_v21 = vpop.xlane.xlu1 %2728  ;;  %v3086_v4 = vmul.f32 %v5349_v35, %v2990_v24  ;;  %v3125_v10 = vmul.f32 %v7267_v5, %v3087_v49 }
 0x457   : > { %v3027_v61 = vadd.f32 1e-05, %v2963_v58  ;;  %v2962_v18 = vsub.f32 %v2898_v50, %v2930_v57  ;;  %v7360_v2 = vmul.f32 0.0078125, %v2729_v21  ;;  %v5178_v57 = vld [vmem:[#allocation11 + $0x40] sm:$0xff]  }
 0x458   : > { %v2727_v22 = vpop.xlane.xlu0 %2726  ;;  %v3124_v54 = vmul.f32 %v7267_v5, %v3086_v4  ;;  %v3163_v46 = vadd.f32 %v7273_v28, %v3125_v10  ;;  %v5179_v4 = vld [vmem:[#allocation11] sm:$0xff]   ;;  %4786 = vmatprep.subr.bf16.mxu1 %v5178_v57  ;;  %v5182_v57 = vld [vmem:[#allocation11 + $0x50] sm:$0xff]  }
 0x459   : > { %5354 = vrsqrt.f32 %v3027_v61  ;;  %v3026_v48 = vadd.f32 1e-05, %v2962_v18  ;;  %v7363_v16 = vmul.f32 0.0078125, %v2727_v22  ;;  %v2933_v45 = vmul.f32 %v7360_v2, %v7360_v2  ;;  %4787 = vmatpush3.bf16.msra.mxu1 %v5179_v4 }
 0x45a   : > { %v2857_v30 = vpop.xlane.xlu1 %2856  ;;  %v3162_v34 = vadd.f32 %v7273_v28, %v3124_v54  ;;  %v2995_v22 = vsub.f32 %v7135_v11, %v7349_v25 }
 0x45b   : > { %5356 = vrsqrt.f32 %v3026_v48  ;;  %v2901_v14 = vmul.f32 0.0078125, %v2857_v30  ;;  %v5351_v33 = vpop.eup %5350  ;;  %v2932_v60 = vmul.f32 %v7363_v16, %v7363_v16 }
 0x45c   : > { %v2855_v53 = vpop.xlane.xlu0 %2854  ;;  %v3188_v15 = vpack.c.bf16 %v3163_v46, %v3162_v34  ;;  %v3089_v49 = vmul.f32 %v5351_v33, %v2993_v13  ;;  %v5180_v46 = vld [vmem:[#allocation11 + $0x48] sm:$0xff]  }
 0x45d   : > { %v5353_v12 = vpop.eup %5352  ;;  %v2965_v24 = vsub.f32 %v2901_v14, %v2933_v45  ;;  %v2900_v31 = vmul.f32 0.0078125, %v2855_v53  ;;  %v5181_v33 = vld [vmem:[#allocation11 + $0x8] sm:$0xff]   ;;  %4788 = vmatprep.subr.bf16.mxu1 %v5180_v46  ;;  %v5184_v46 = vld [vmem:[#allocation11 + $0x58] sm:$0xff]  }
 0x45e   : > { %3399 = vmatmul.mubr.bf16.gmra.mrb[56].mxu0 %v3188_v15  ;;  %v2733_v35 = vpop.xlane.xlu1 %2732  ;;  %v3088_v17 = vmul.f32 %v5353_v12, %v2992_v59  ;;  %v3127_v43 = vmul.f32 %v7267_v5, %v3089_v49  ;;  %v2994_v59 = vsub.f32 %v7138_v7, %v7351_v42  ;;  %4789 = vmatpush3.bf16.msra.mxu1 %v5181_v33 }
 0x45f   : > { %v3029_v58 = vadd.f32 1e-05, %v2965_v24  ;;  %v2964_v50 = vsub.f32 %v2900_v31, %v2932_v60  ;;  %v7373_v21 = vmul.f32 0.0078125, %v2733_v35  ;;  %3408 = vmatprep.mubr.bf16.mxu0 %v8210_v19  ;;  %4790 = vmatprep.subr.bf16.mxu1 %v5182_v57 }
 0x460   : > { %v2731_v10 = vpop.xlane.xlu0 %2730  ;;  %v3126_v61 = vmul.f32 %v7267_v5, %v3088_v17  ;;  %v3165_v34 = vadd.f32 %v7273_v28, %v3127_v43  ;;  %v5183_v43 = vld [vmem:[#allocation11 + $0x10] sm:$0xff]  }
 0x461   : > { %5358 = vrsqrt.f32 %v3029_v58  ;;  %v3028_v18 = vadd.f32 1e-05, %v2964_v50  ;;  %v7380_v54 = vmul.f32 0.0078125, %v2731_v10  ;;  %v2935_v45 = vmul.f32 %v7373_v21, %v7373_v21 }
 0x462   : > { %v2861_v48 = vpop.xlane.xlu1 %2860  ;;  %v3164_v30 = vadd.f32 %v7273_v28, %v3126_v61  ;;  %4791 = vmatpush3.bf16.msra.mxu1 %v5183_v43 }
 0x463   : > { %v5355_v13 = vpop.eup %5354  ;;  %5360 = vrsqrt.f32 %v3028_v18  ;;  %v2903_v14 = vmul.f32 0.0078125, %v2861_v48  ;;  %v2934_v60 = vmul.f32 %v7380_v54, %v7380_v54  ;;  %v2997_v18 = vsub.f32 %v7148_v38, %v7360_v2  ;;  %4792 = vmatprep.subr.bf16.mxu1 %v5184_v46  ;;  %v5188_v46 = vld [vmem:[#allocation11 + $0x68] sm:$0xff]  }
 0x464   : > { %v2859_v53 = vpop.xlane.xlu0 %2858  ;;  %v3189_v25 = vpack.c.bf16 %v3165_v34, %v3164_v30  ;;  %v3091_v15 = vmul.f32 %v5355_v13, %v2995_v22  ;;  %v5185_v13 = vld [vmem:[#allocation11 + $0x18] sm:$0xff]  }
 0x465   : > { %v5357_v12 = vpop.eup %5356  ;;  %v2967_v24 = vsub.f32 %v2903_v14, %v2935_v45  ;;  %v2902_v31 = vmul.f32 0.0078125, %v2859_v53 }
 0x466   : > { %3409 = vmatmul.mubr.bf16.gmra.mrb[60].mxu0 %v3189_v25  ;;  %v2737_v49 = vpop.xlane.xlu1 %2736  ;;  %v3090_v35 = vmul.f32 %v5357_v12, %v2994_v59  ;;  %v3129_v17 = vmul.f32 %v7267_v5, %v3091_v15  ;;  %v2996_v59 = vsub.f32 %v7151_v52, %v7363_v16  ;;  %4793 = vmatpush3.bf16.msra.mxu1 %v5185_v13  ;;  %v5189_v13 = vld [vmem:[#allocation11 + $0x28] sm:$0xff]  }
 0x467   : > { %v3031_v58 = vadd.f32 1e-05, %v2967_v24  ;;  %v2966_v50 = vsub.f32 %v2902_v31, %v2934_v60  ;;  %v7391_v42 = vmul.f32 0.0078125, %v2737_v49  ;;  %3418 = vmatprep.mubr.bf16.mxu0 %v8210_v19 }
 0x468   : > { %v2735_v4 = vpop.xlane.xlu0 %2734  ;;  %v3128_v10 = vmul.f32 %v7267_v5, %v3090_v35  ;;  %v3167_v34 = vadd.f32 %v7273_v28, %v3129_v17  ;;  %v5186_v17 = vld [vmem:[#allocation11 + $0x60] sm:$0xff]  }
 0x469   : > { %5362 = vrsqrt.f32 %v3031_v58  ;;  %v3030_v61 = vadd.f32 1e-05, %v2966_v50  ;;  %v7397_v22 = vmul.f32 0.0078125, %v2735_v4  ;;  %v2937_v14 = vmul.f32 %v7391_v42, %v7391_v42  ;;  %v5187_v50 = vld [vmem:[#allocation11 + $0x20] sm:$0xff]   ;;  %4794 = vmatprep.subr.bf16.mxu1 %v5186_v17 }
 0x46a   : > { %v2865_v48 = vpop.xlane.xlu1 %2864  ;;  %v3166_v30 = vadd.f32 %v7273_v28, %v3128_v10  ;;  %4795 = vmatpush3.bf16.msra.mxu1 %v5187_v50 }
 0x46b   : > { %v5359_v45 = vpop.eup %5358  ;;  %5364 = vrsqrt.f32 %v3030_v61  ;;  %v2905_v33 = vmul.f32 0.0078125, %v2865_v48  ;;  %v2936_v12 = vmul.f32 %v7397_v22, %v7397_v22  ;;  %v2999_v61 = vsub.f32 %v7162_v23, %v7373_v21  ;;  %4796 = vmatprep.subr.bf16.mxu1 %v5188_v46  ;;  %v5192_v46 = vld [vmem:[#allocation11 + $0x78] sm:$0xff]  }
 0x46c   : > { %v2863_v53 = vpop.xlane.xlu0 %2862  ;;  %v3190_v2 = vpack.c.bf16 %v3167_v34, %v3166_v30  ;;  %v3093_v25 = vmul.f32 %v5359_v45, %v2997_v18 }
 0x46d   : > { %v5361_v15 = vpop.eup %5360  ;;  %v2969_v60 = vsub.f32 %v2905_v33, %v2937_v14  ;;  %v2904_v24 = vmul.f32 0.0078125, %v2863_v53 }
 0x46e   : > { %3419 = vmatmul.mubr.bf16.gmra.mrb[64].mxu0 %v3190_v2  ;;  %v2741_v31 = vpop.xlane.xlu1 %2740  ;;  %v3092_v49 = vmul.f32 %v5361_v15, %v2996_v59  ;;  %v3131_v35 = vmul.f32 %v7267_v5, %v3093_v25  ;;  %v2998_v59 = vsub.f32 %v7165_v6, %v7380_v54  ;;  %4797 = vmatpush3.bf16.msra.mxu1 %v5189_v13  ;;  %v5193_v13 = vld [vmem:[#allocation11 + $0x38] sm:$0xff]  }
 0x46f   : > { %v3033_v57 = vadd.f32 1e-05, %v2969_v60  ;;  %v2968_v58 = vsub.f32 %v2904_v24, %v2936_v12  ;;  %v7408_v16 = vmul.f32 0.0078125, %v2741_v31  ;;  %3428 = vmatprep.mubr.bf16.mxu0 %v8210_v19 }
 0x470   : > { %v2739_v43 = vpop.xlane.xlu0 %2738  ;;  %v3130_v4 = vmul.f32 %v7267_v5, %v3092_v49  ;;  %v3169_v34 = vadd.f32 %v7273_v28, %v3131_v35  ;;  %v5190_v35 = vld [vmem:[#allocation11 + $0x70] sm:$0xff]  }
 0x471   : > { %5366 = vrsqrt.f32 %v3033_v57  ;;  %v3032_v10 = vadd.f32 1e-05, %v2968_v58  ;;  %v7414_v18 = vmul.f32 0.0078125, %v2739_v43  ;;  %v2939_v14 = vmul.f32 %v7408_v16, %v7408_v16  ;;  %v5191_v58 = vld [vmem:[#allocation11 + $0x30] sm:$0xff]   ;;  %4798 = vmatprep.subr.bf16.mxu1 %v5190_v35 }
 0x472   : > { %v2869_v48 = vpop.xlane.xlu1 %2868  ;;  %v3168_v30 = vadd.f32 %v7273_v28, %v3130_v4  ;;  %4799 = vmatpush3.bf16.msra.mxu1 %v5191_v58 }
 0x473   : > { %v5363_v45 = vpop.eup %5362  ;;  %5368 = vrsqrt.f32 %v3032_v10  ;;  %v2907_v33 = vmul.f32 0.0078125, %v2869_v48  ;;  %v2938_v15 = vmul.f32 %v7414_v18, %v7414_v18  ;;  %v3001_v10 = vsub.f32 %v7176_v37, %v7391_v42  ;;  %4800 = vmatprep.subr.bf16.mxu1 %v5192_v46 }
 0x474   : > { %v2867_v53 = vpop.xlane.xlu0 %2866  ;;  %v3191_v21 = vpack.c.bf16 %v3169_v34, %v3168_v30  ;;  %v3095_v2 = vmul.f32 %v5363_v45, %v2999_v61 }
 0x475   : > { %v5365_v25 = vpop.eup %5364  ;;  %v2971_v12 = vsub.f32 %v2907_v33, %v2939_v14  ;;  %v2906_v60 = vmul.f32 0.0078125, %v2867_v53 }
 0x476   : > { %3429 = vmatmul.mubr.bf16.gmra.mrb[68].mxu0 %v3191_v21  ;;  %v2745_v24 = vpop.xlane.xlu1 %2744  ;;  %v3094_v31 = vmul.f32 %v5365_v25, %v2998_v59  ;;  %v3133_v49 = vmul.f32 %v7267_v5, %v3095_v2  ;;  %v3000_v59 = vsub.f32 %v7179_v51, %v7397_v22  ;;  %4801 = vmatpush3.bf16.msra.mxu1 %v5193_v13 }
 0x477   : > { %v3035_v17 = vadd.f32 1e-05, %v2971_v12  ;;  %v2970_v57 = vsub.f32 %v2906_v60, %v2938_v15  ;;  %v7425_v54 = vmul.f32 0.0078125, %v2745_v24  ;;  %3438 = vmatprep.mubr.bf16.mxu0 %v8210_v19  ;;  %v3002_v13 = vsub.f32 %v7193_v36, %v7414_v18 }
 0x478   : > { %v2743_v50 = vpop.xlane.xlu0 %2742  ;;  %v3132_v43 = vmul.f32 %v7267_v5, %v3094_v31  ;;  %v3171_v34 = vadd.f32 %v7273_v28, %v3133_v49 }
 0x479   : > { %5370 = vrsqrt.f32 %v3035_v17  ;;  %v3034_v4 = vadd.f32 1e-05, %v2970_v57  ;;  %v7431_v61 = vmul.f32 0.0078125, %v2743_v50  ;;  %v2941_v14 = vmul.f32 %v7425_v54, %v7425_v54 }
 0x47a   : > { %v2873_v48 = vpop.xlane.xlu1 %2872  ;;  %v3170_v30 = vadd.f32 %v7273_v28, %v3132_v43  ;;  %v3003_v50 = vsub.f32 %v7190_v47, %v7408_v16  ;;  %v3005_v18 = vsub.f32 %v7210_v9, %v7425_v54 }
 0x47b   : > { %v5367_v45 = vpop.eup %5366  ;;  %5372 = vrsqrt.f32 %v3034_v4  ;;  %v2909_v33 = vmul.f32 0.0078125, %v2873_v48  ;;  %v2940_v25 = vmul.f32 %v7431_v61, %v7431_v61 }
 0x47c   : > { %v2871_v53 = vpop.xlane.xlu0 %2870  ;;  %v3192_v42 = vpack.c.bf16 %v3171_v34, %v3170_v30  ;;  %v3097_v21 = vmul.f32 %v5367_v45, %v3001_v10 }
 0x47d   : > { %v5369_v2 = vpop.eup %5368  ;;  %v2973_v15 = vsub.f32 %v2909_v33, %v2941_v14  ;;  %v2908_v12 = vmul.f32 0.0078125, %v2871_v53 }
 0x47e   : > { %3439 = vmatmul.mubr.bf16.gmra.mrb[72].mxu0 %v3192_v42  ;;  %v2749_v60 = vpop.xlane.xlu1 %2748  ;;  %v3096_v24 = vmul.f32 %v5369_v2, %v3000_v59  ;;  %v3135_v31 = vmul.f32 %v7267_v5, %v3097_v21 }
 0x47f   : > { %v3037_v49 = vadd.f32 1e-05, %v2973_v15  ;;  %v2972_v35 = vsub.f32 %v2908_v12, %v2940_v25  ;;  %v2783_v17 = vmul.f32 0.0078125, %v2749_v60  ;;  %3448 = vmatprep.mubr.bf16.mxu0 %v8210_v19 }
 0x480   : > { %v2747_v22 = vpop.xlane.xlu0 %2746  ;;  %v3134_v57 = vmul.f32 %v7267_v5, %v3096_v24  ;;  %v3173_v48 = vadd.f32 %v7273_v28, %v3135_v31 }
 0x481   : > { %5374 = vrsqrt.f32 %v3037_v49  ;;  %v3036_v58 = vadd.f32 1e-05, %v2972_v35  ;;  %v2782_v43 = vmul.f32 0.0078125, %v2747_v22  ;;  %v2943_v34 = vmul.f32 %v2783_v17, %v2783_v17 }
 0x482   : > { %v2877_v4 = vpop.xlane.xlu1 %2876  ;;  %v3172_v10 = vadd.f32 %v7273_v28, %v3134_v57  ;;  %v3004_v35 = vsub.f32 %v7217_v3, %v7431_v61 }
 0x483   : > { %v5371_v30 = vpop.eup %5370  ;;  %5376 = vrsqrt.f32 %v3036_v58  ;;  %v2911_v46 = vmul.f32 0.0078125, %v2877_v4  ;;  %v2942_v53 = vmul.f32 %v2782_v43, %v2782_v43  ;;  %v3006_v61 = vsub.f32 %v7237_v41, %v2782_v43 }
 0x484   : > { %v2875_v45 = vpop.xlane.xlu0 %2874  ;;  %v3193_v14 = vpack.c.bf16 %v3173_v48, %v3172_v10  ;;  %v3099_v33 = vmul.f32 %v5371_v30, %v3003_v50  ;;  %v3007_v10 = vsub.f32 %v7234_v55, %v2783_v17 }
 0x485   : > { %v5373_v59 = vpop.eup %5372  ;;  %v2975_v42 = vsub.f32 %v2911_v46, %v2943_v34  ;;  %v2910_v16 = vmul.f32 0.0078125, %v2875_v45 }
 0x486   : > { %3449 = vmatmul.mubr.bf16.gmra.mrb[76].mxu0 %v3193_v14  ;;  %v3098_v21 = vmul.f32 %v5373_v59, %v3002_v13  ;;  %v3137_v2 = vmul.f32 %v7267_v5, %v3099_v33 }
 0x487   : > { %v3039_v25 = vadd.f32 1e-05, %v2975_v42  ;;  %v2974_v15 = vsub.f32 %v2910_v16, %v2942_v53  ;;  %3458 = vmatprep.mubr.bf16.mxu0 %v8210_v19 }
 0x488   : > { %v3136_v12 = vmul.f32 %v7267_v5, %v3098_v21  ;;  %v3175_v31 = vadd.f32 %v7273_v28, %v3137_v2 }
 0x489   : > { %5378 = vrsqrt.f32 %v3039_v25  ;;  %v3038_v60 = vadd.f32 1e-05, %v2974_v15 }
 0x48a   : > { %v3174_v24 = vadd.f32 %v7273_v28, %v3136_v12 }
 0x48b   : > { %v5375_v49 = vpop.eup %5374  ;;  %5380 = vrsqrt.f32 %v3038_v60 }
 0x48c   : > { %v3194_v22 = vpack.c.bf16 %v3175_v31, %v3174_v24  ;;  %v3101_v57 = vmul.f32 %v5375_v49, %v3005_v18 }
 0x48d   : > { %v5377_v58 = vpop.eup %5376 }
 0x48e   : > { %3459 = vmatmul.mubr.bf16.gmra.mrb[80].mxu0 %v3194_v22  ;;  %v3100_v50 = vmul.f32 %v5377_v58, %v3004_v35  ;;  %v3139_v4 = vmul.f32 %v7267_v5, %v3101_v57 }
 0x48f   : > { %3468 = vmatprep.mubr.bf16.mxu0 %v8210_v19 }
 0x490   : > { %v3138_v54 = vmul.f32 %v7267_v5, %v3100_v50  ;;  %v3177_v30 = vadd.f32 %v7273_v28, %v3139_v4 }
 0x492   : > { %v3176_v48 = vadd.f32 %v7273_v28, %v3138_v54 }
 0x493   : > { %v5379_v34 = vpop.eup %5378 }
 0x494   : > { %v3195_v46 = vpack.c.bf16 %v3177_v30, %v3176_v48  ;;  %v3103_v13 = vmul.f32 %v5379_v34, %v3007_v10 }
 0x495   : > { %v5381_v45 = vpop.eup %5380 }
 0x496   : > { %3469 = vmatmul.mubr.bf16.gmra.mrb[84].mxu0 %v3195_v46  ;;  %v3102_v14 = vmul.f32 %v5381_v45, %v3006_v61  ;;  %v3141_v33 = vmul.f32 %v7267_v5, %v3103_v13  ;;  %v3216_v46 = vlaneseq }
 0x497   : > { %3478 = vmatprep.mubr.bf16.mxu0 %v8210_v19 }
 0x498   : > { %v3140_v59 = vmul.f32 %v7267_v5, %v3102_v14  ;;  %v3179_v53 = vadd.f32 %v7273_v28, %v3141_v33  ;;  %v3217_v13 = vshrl.u32 %v3216_v46, 7  ;;  %v3214_v14 = vld [vmem:[%s8213_s3] sm:$0x3]  ;;  %s5698_s3 = sshll.u32 %s5780_s13, 4  ;;  %s5699_s3 = int_to_ptr.vmem [resolvable:$false] %s5698_s3 }
 0x499   : > { %s5700_s18 = scalar_lea.vmem %s5699_s3, 8192  ;;  %p5701_p3 = scmp.lt.s32.totalorder %s8086_s14, %s5699_s3 }
 0x49a   : > { %v3178_v17 = vadd.f32 %v7273_v28, %v3140_v59  ;;  %v3218_v45 = vsub.s32 0, %v3217_v13  ;;  %v3222_v33 = vsub.s32 1, %v3217_v13  ;;  %p5702_p7 = scmp.lt.s32.totalorder %s5700_s18, %s5694_s23 }
 0x49c   : > { %v3196_v42 = vpack.c.bf16 %v3179_v53, %v3178_v17  ;;  %v7481_v59 = vrot.slane %v3214_v14, %v3218_v45  ;;  %v7483_v17 = vrot.slane %v3214_v14, %v3222_v33  ;;  %p5703_p10 = por %p5702_p7, %p5701_p3 }
 0x49e   : > { %3479 = vmatmul.mubr.bf16.gmra.mrb[88].mxu0 %v3196_v42  ;;  %p5704_p13 = pnand %p5703_p10, %p5697_p8 }
 0x49f   : > { %v2753_v16 = vpop.xlane.xlu1 %2752  ;;  %3488 = vmatprep.mubr.bf16.mxu0 %v8210_v19 }
 0x4a0   : > { %v2785_v43 = vmul.f32 0.0078125, %v2753_v16 }
 0x4a2   : > { %v2945_v2 = vmul.f32 %v2785_v43, %v2785_v43  ;;  %v3009_v58 = vsub.f32 %v7311_v0, %v2785_v43 }
 0x4a3   : > { %v2881_v21 = vpop.xlane.xlu1 %2880 }
 0x4a4   : > { %v2913_v25 = vmul.f32 0.0078125, %v2881_v21 }
 0x4a5   : > { %v2751_v15 = vpop.xlane.xlu0 %2750 }
 0x4a6   : > { %v2977_v12 = vsub.f32 %v2913_v25, %v2945_v2  ;;  %v2784_v60 = vmul.f32 0.0078125, %v2751_v15 }
 0x4a8   : > { %v3041_v18 = vadd.f32 1e-05, %v2977_v12  ;;  %v2944_v31 = vmul.f32 %v2784_v60, %v2784_v60  ;;  %v3008_v19 = vsub.f32 %v7322_v40, %v2784_v60 }
 0x4a9   : > { %v2879_v24 = vpop.xlane.xlu0 %2878 }
 0x4aa   : > { %5382 = vrsqrt.f32 %v3041_v18  ;;  %v2912_v49 = vmul.f32 0.0078125, %v2879_v24 }
 0x4ac   : > { %v2976_v35 = vsub.f32 %v2912_v49, %v2944_v31 }
 0x4ae   : > { %v3040_v22 = vadd.f32 1e-05, %v2976_v35 }
 0x4b0   : > { %5384 = vrsqrt.f32 %v3040_v22 }
 0x4b4   : > { %v5383_v57 = vpop.eup %5382 }
 0x4b5   : > { %v3105_v50 = vmul.f32 %v5383_v57, %v3009_v58 }
 0x4b7   : > { %v3143_v10 = vmul.f32 %v7267_v5, %v3105_v50 }
 0x4b9   : > { %v3181_v34 = vadd.f32 %v7273_v28, %v3143_v10 }
 0x4ba   : > { %v5385_v4 = vpop.eup %5384 }
 0x4bb   : > { %v3104_v54 = vmul.f32 %v5385_v4, %v3008_v19 }
 0x4bd   : > { %v3142_v48 = vmul.f32 %v7267_v5, %v3104_v54 }
 0x4bf   : > { %v3180_v30 = vadd.f32 %v7273_v28, %v3142_v48 }
 0x4c1   : > { %v3197_v61 = vpack.c.bf16 %v3181_v34, %v3180_v30 }
 0x4c3   : > { %3489 = vmatmul.mubr.bf16.gmra.mrb[92].mxu0 %v3197_v61 }
 0x4d8   : > { %v3340_v53 = vpop.f32.mrb[32].mxu0 }
 0x4d9   : > { %v3341_v5 = vadd.f32 %v3340_v53, %v7481_v59  ;;  %v3342_v42 = vpop.f32.mrb[33].mxu0 }
 0x4da   : > { %v7487_v28 = vadd.f32 %v3342_v42, %v7483_v17  ;;  %v3344_v16 = vpop.f32.mrb[34].mxu0 }
 0x4db   : > { %v3563_v43 = vmul.f32 0.044715, %v3341_v5  ;;  %v3345_v21 = vadd.f32 %v3344_v16, %v7481_v59  ;;  %v3346_v2 = vpop.f32.mrb[35].mxu0 }
 0x4dc   : > { %v3564_v25 = vmul.f32 0.044715, %v7487_v28  ;;  %v7492_v15 = vadd.f32 %v3346_v2, %v7483_v17 }
 0x4dd   : > { %v3627_v12 = vmul.f32 %v3563_v43, %v3341_v5  ;;  %v3565_v60 = vmul.f32 0.044715, %v3345_v21 }
 0x4de   : > { %v3628_v18 = vmul.f32 %v3564_v25, %v7487_v28  ;;  %v3566_v24 = vmul.f32 0.044715, %v7492_v15 }
 0x4df   : > { %v3691_v31 = vmul.f32 %v3627_v12, %v3341_v5  ;;  %v3629_v49 = vmul.f32 %v3565_v60, %v3345_v21 }
 0x4e0   : > { %v3692_v35 = vmul.f32 %v3628_v18, %v7487_v28  ;;  %v3630_v22 = vmul.f32 %v3566_v24, %v7492_v15  ;;  %v3350_v57 = vpop.f32.mrb[36].mxu0 }
 0x4e1   : > { %v3755_v58 = vadd.f32 %v3691_v31, %v3341_v5  ;;  %v3693_v50 = vmul.f32 %v3629_v49, %v3345_v21  ;;  %v7499_v19 = vadd.f32 %v3350_v57, %v7481_v59  ;;  %v3352_v4 = vpop.f32.mrb[37].mxu0 }
 0x4e2   : > { %v3694_v54 = vmul.f32 %v3630_v22, %v7492_v15  ;;  %v3353_v10 = vadd.f32 %v3352_v4, %v7483_v17  ;;  %v3354_v48 = vpop.f32.mrb[38].mxu0  ;;  %v3756_v30 = vadd.f32 %v3692_v35, %v7487_v28 }
 0x4e3   : > { %v3819_v34 = vmul.f32 0.7978846, %v3755_v58  ;;  %v3757_v61 = vadd.f32 %v3693_v50, %v3345_v21  ;;  %v3567_v46 = vmul.f32 0.044715, %v7499_v19  ;;  %v7506_v13 = vadd.f32 %v3354_v48, %v7481_v59  ;;  %v3356_v45 = vpop.f32.mrb[39].mxu0 }
 0x4e4   : > { %v3568_v14 = vmul.f32 0.044715, %v3353_v10  ;;  %v3357_v33 = vadd.f32 %v3356_v45, %v7483_v17  ;;  %v3758_v53 = vadd.f32 %v3694_v54, %v7492_v15  ;;  %v3820_v42 = vmul.f32 0.7978846, %v3756_v30 }
 0x4e5   : > { %5386 = vtanh.f32 %v3819_v34  ;;  %v3821_v16 = vmul.f32 0.7978846, %v3757_v61  ;;  %v3631_v43 = vmul.f32 %v3567_v46, %v7499_v19  ;;  %v3569_v2 = vmul.f32 0.044715, %v7506_v13 }
 0x4e6   : > { %v3632_v25 = vmul.f32 %v3568_v14, %v3353_v10  ;;  %v3570_v12 = vmul.f32 0.044715, %v3357_v33  ;;  %v3822_v60 = vmul.f32 0.7978846, %v3758_v53  ;;  %5388 = vtanh.f32 %v3820_v42 }
 0x4e7   : > { %5390 = vtanh.f32 %v3821_v16  ;;  %v3695_v18 = vmul.f32 %v3631_v43, %v7499_v19  ;;  %v3633_v24 = vmul.f32 %v3569_v2, %v7506_v13  ;;  %v3499_v30 = vmul.f32 0.5, %v3341_v5 }
 0x4e8   : > { %v3696_v31 = vmul.f32 %v3632_v25, %v3353_v10  ;;  %v3634_v49 = vmul.f32 %v3570_v12, %v3357_v33  ;;  %v3360_v35 = vpop.f32.mrb[40].mxu0  ;;  %5392 = vtanh.f32 %v3822_v60  ;;  %v3501_v43 = vmul.f32 0.5, %v3345_v21 }
 0x4e9   : > { %v3697_v22 = vmul.f32 %v3633_v24, %v7506_v13  ;;  %v3362_v57 = vpop.f32.mrb[41].mxu0  ;;  %v3759_v48 = vadd.f32 %v3695_v18, %v7499_v19  ;;  %v7520_v34 = vadd.f32 %v3360_v35, %v7481_v59  ;;  %v3500_v2 = vmul.f32 0.5, %v7487_v28 }
 0x4ea   : > { %v3698_v58 = vmul.f32 %v3634_v49, %v3357_v33  ;;  %v7516_v50 = vadd.f32 %v3362_v57, %v7483_v17  ;;  %v3364_v4 = vpop.f32.mrb[42].mxu0  ;;  %v3760_v54 = vadd.f32 %v3696_v31, %v3353_v10  ;;  %v3502_v49 = vmul.f32 0.5, %v7492_v15 }
 0x4eb   : > { %v7523_v61 = vadd.f32 %v3364_v4, %v7481_v59  ;;  %v3366_v46 = vpop.f32.mrb[43].mxu0  ;;  %v3761_v45 = vadd.f32 %v3697_v22, %v7506_v13  ;;  %v3823_v5 = vmul.f32 0.7978846, %v3759_v48  ;;  %v3571_v31 = vmul.f32 0.044715, %v7520_v34 }
 0x4ec   : > { %v3572_v14 = vmul.f32 0.044715, %v7516_v50  ;;  %v7528_v53 = vadd.f32 %v3366_v46, %v7483_v17  ;;  %v3762_v42 = vadd.f32 %v3698_v58, %v3357_v33  ;;  %v3824_v16 = vmul.f32 0.7978846, %v3760_v54 }
 0x4ed   : > { %v3825_v25 = vmul.f32 0.7978846, %v3761_v45  ;;  %v7535_v35 = vmul.f32 0.5, %v3353_v10  ;;  %v3573_v21 = vmul.f32 0.044715, %v7523_v61  ;;  %v3506_v45 = vmul.f32 0.5, %v3357_v33 }
 0x4ee   : > { %v3636_v12 = vmul.f32 %v3572_v14, %v7516_v50  ;;  %v3574_v60 = vmul.f32 0.044715, %v7528_v53  ;;  %v3826_v18 = vmul.f32 0.7978846, %v3762_v42  ;;  %5394 = vtanh.f32 %v3824_v16 }
 0x4ef   : > { %v5387_v24 = vpop.eup %5386  ;;  %5396 = vtanh.f32 %v3823_v5  ;;  %v3503_v33 = vmul.f32 0.5, %v7499_v19 }
 0x4f0   : > { %v5389_v22 = vpop.eup %5388  ;;  %v3638_v28 = vmul.f32 %v3574_v60, %v7528_v53  ;;  %v3370_v57 = vpop.f32.mrb[44].mxu0  ;;  %v3947_v58 = vadd.f32 1.0, %v5387_v24  ;;  %5398 = vtanh.f32 %v3826_v18  ;;  %v3700_v54 = vmul.f32 %v3636_v12, %v7516_v50 }
 0x4f1   : > { %v5391_v4 = vpop.eup %5390  ;;  %v3372_v48 = vpop.f32.mrb[45].mxu0  ;;  %v3948_v46 = vadd.f32 1.0, %v5389_v22  ;;  %5400 = vtanh.f32 %v3825_v25  ;;  %v7542_v10 = vadd.f32 %v3370_v57, %v7481_v59  ;;  %v3635_v60 = vmul.f32 %v3571_v31, %v7520_v34 }
 0x4f2   : > { %v5393_v14 = vpop.eup %5392  ;;  %v3702_v15 = vmul.f32 %v3638_v28, %v7528_v53  ;;  %v7545_v42 = vadd.f32 %v3372_v48, %v7483_v17  ;;  %v3374_v16 = vpop.f32.mrb[46].mxu0  ;;  %v3949_v5 = vadd.f32 1.0, %v5391_v4  ;;  %v3637_v25 = vmul.f32 %v3573_v21, %v7523_v61 }
 0x4f3   : > { %v7549_v18 = vadd.f32 %v3374_v16, %v7481_v59  ;;  %v3376_v12 = vpop.f32.mrb[47].mxu0  ;;  %v3950_v24 = vadd.f32 1.0, %v5393_v14  ;;  %v4011_v28 = vmul.f32 %v3947_v58, %v3499_v30  ;;  %v4012_v48 = vmul.f32 %v3948_v46, %v3500_v2 }
 0x4f4   : > { %v7554_v22 = vadd.f32 %v3376_v12, %v7483_v17  ;;  %v4013_v57 = vmul.f32 %v3949_v5, %v3501_v43  ;;  %v3505_v4 = vmul.f32 0.5, %v7506_v13  ;;  %v3764_v31 = vadd.f32 %v3700_v54, %v7516_v50 }
 0x4f5   : > { %v4014_v0 = vmul.f32 %v3950_v24, %v3502_v49  ;;  %v3575_v16 = vmul.f32 0.044715, %v7542_v10  ;;  %v3576_v40 = vmul.f32 0.044715, %v7545_v42  ;;  %v3766_v19 = vadd.f32 %v3702_v15, %v7528_v53 }
 0x4f6   : > { %v4075_v14 = vpack.c.bf16 %v4013_v57, %v4011_v28  ;;  %v3577_v21 = vmul.f32 0.044715, %v7549_v18  ;;  %v3578_v12 = vmul.f32 0.044715, %v7554_v22  ;;  %v3828_v30 = vmul.f32 0.7978846, %v3764_v31 }
 0x4f7   : > { %v4076_v55 = vpack.c.bf16 %v4014_v0, %v4012_v48  ;;  %v3699_v2 = vmul.f32 %v3635_v60, %v7520_v34  ;;  %v3701_v13 = vmul.f32 %v3637_v25, %v7523_v61  ;;  %v7566_v58 = vmul.f32 0.5, %v7516_v50 }
 0x4f8   : > { %v5395_v43 = vpop.eup %5394  ;;  %v3380_v49 = vpop.f32.mrb[48].mxu0  ;;  %v3830_v54 = vmul.f32 0.7978846, %v3766_v19  ;;  %v7572_v0 = vmul.f32 0.5, %v7528_v53  ;;  %5402 = vtanh.f32 %v3828_v30  ;;  %v3639_v60 = vmul.f32 %v3575_v16, %v7542_v10 }
 0x4f9   : > { %v5397_v46 = vpop.eup %5396  ;;  %v7569_v5 = vadd.f32 %v3380_v49, %v7481_v59  ;;  %v3382_v15 = vpop.f32.mrb[49].mxu0  ;;  %4274 = vmatprep.mubr.bf16.mxu1 %v4076_v55  ;;  %v3952_v24 = vadd.f32 1.0, %v5395_v43  ;;  %v3640_v31 = vmul.f32 %v3576_v40, %v7545_v42  ;;  %v3641_v55 = vmul.f32 %v3577_v21, %v7549_v18 }
 0x4fa   : > { %v5399_v28 = vpop.eup %5398  ;;  %v7576_v25 = vadd.f32 %v3382_v15, %v7483_v17  ;;  %v3384_v50 = vpop.f32.mrb[50].mxu0  ;;  %4275 = vmatmul.mubr.bf16.vlgmr.msra.gmra.mrb[32].mxu1 %v4075_v14  ;;  %v3951_v57 = vadd.f32 1.0, %v5397_v46  ;;  %5404 = vtanh.f32 %v3830_v54  ;;  %v3642_v19 = vmul.f32 %v3578_v12, %v7554_v22 }
 0x4fb   : > { %v5401_v48 = vpop.eup %5400  ;;  %v3386_v53 = vpop.f32.mrb[51].mxu0  ;;  %v3954_v43 = vadd.f32 1.0, %v5399_v28  ;;  %v3579_v30 = vmul.f32 0.044715, %v7569_v5  ;;  %v7583_v16 = vadd.f32 %v3384_v50, %v7481_v59  ;;  %v4016_v46 = vmul.f32 %v3952_v24, %v7535_v35 }
 0x4fc   : > { %v7586_v49 = vadd.f32 %v3386_v53, %v7483_v17  ;;  %v3953_v14 = vadd.f32 1.0, %v5401_v48  ;;  %v3580_v54 = vmul.f32 0.044715, %v7576_v25  ;;  %v3763_v21 = vadd.f32 %v3699_v2, %v7520_v34 }
 0x4fd   : > { %v4018_v40 = vmul.f32 %v3954_v43, %v3506_v45  ;;  %v4015_v15 = vmul.f32 %v3951_v57, %v3503_v33  ;;  %v3765_v41 = vadd.f32 %v3701_v13, %v7523_v61  ;;  %v3704_v50 = vmul.f32 %v3640_v31, %v7545_v42 }
 0x4fe   : > { %v3582_v12 = vmul.f32 0.044715, %v7586_v49  ;;  %v4017_v28 = vmul.f32 %v3953_v14, %v3505_v4  ;;  %v3706_v9 = vmul.f32 %v3642_v19, %v7554_v22  ;;  %v3827_v3 = vmul.f32 0.7978846, %v3763_v21 }
 0x4ff   : > { %v4078_v53 = vpack.c.bf16 %v4018_v40, %v4016_v46  ;;  %v3703_v48 = vmul.f32 %v3639_v60, %v7542_v10  ;;  %v3581_v47 = vmul.f32 0.044715, %v7583_v16  ;;  %v3829_v24 = vmul.f32 0.7978846, %v3765_v41 }
 0x500   : > { %v3390_v35 = vpop.f32.mrb[52].mxu0  ;;  %v4077_v45 = vpack.c.bf16 %v4017_v28, %v4015_v15  ;;  %v3644_v2 = vmul.f32 %v3580_v54, %v7576_v25  ;;  %v3646_v33 = vmul.f32 %v3582_v12, %v7586_v49  ;;  %5406 = vtanh.f32 %v3827_v3 }
 0x501   : > { %v7600_v4 = vadd.f32 %v3390_v35, %v7481_v59  ;;  %v3392_v13 = vpop.f32.mrb[53].mxu0  ;;  %4282 = vmatprep.mubr.bf16.mxu1 %v4078_v53  ;;  %v3705_v57 = vmul.f32 %v3641_v55, %v7549_v18  ;;  %v3643_v31 = vmul.f32 %v3579_v30, %v7569_v5  ;;  %5408 = vtanh.f32 %v3829_v24 }
 0x502   : > { %v7605_v60 = vadd.f32 %v3392_v13, %v7483_v17  ;;  %v3394_v19 = vpop.f32.mrb[54].mxu0  ;;  %4283 = vmatmul.mubr.bf16.gmra.mrb[36].mxu1 %v4077_v45  ;;  %v5403_v41 = vpop.eup %5402  ;;  %v3768_v46 = vadd.f32 %v3704_v50, %v7545_v42  ;;  %v3770_v3 = vadd.f32 %v3706_v9, %v7554_v22  ;;  %v3645_v30 = vmul.f32 %v3581_v47, %v7583_v16 }
 0x503   : > { %v3583_v43 = vmul.f32 0.044715, %v7600_v4  ;;  %v7609_v14 = vadd.f32 %v3394_v19, %v7481_v59  ;;  %v3396_v54 = vpop.f32.mrb[55].mxu0  ;;  %v3956_v12 = vadd.f32 1.0, %v5403_v41  ;;  %v3708_v15 = vmul.f32 %v3644_v2, %v7576_v25 }
 0x504   : > { %v5405_v55 = vpop.eup %5404  ;;  %v3584_v40 = vmul.f32 0.044715, %v7605_v60  ;;  %v7616_v21 = vadd.f32 %v3396_v54, %v7483_v17  ;;  %v3710_v28 = vmul.f32 %v3646_v33, %v7586_v49  ;;  %v3832_v35 = vmul.f32 0.7978846, %v3768_v46 }
 0x505   : > { %v3958_v53 = vadd.f32 1.0, %v5405_v55  ;;  %v3647_v45 = vmul.f32 %v3583_v43, %v7600_v4  ;;  %v3585_v50 = vmul.f32 0.044715, %v7609_v14  ;;  %v3834_v24 = vmul.f32 0.7978846, %v3770_v3 }
 0x506   : > { %v3586_v9 = vmul.f32 0.044715, %v7616_v21  ;;  %v3648_v47 = vmul.f32 %v3584_v40, %v7605_v60  ;;  %v4020_v13 = vmul.f32 %v3956_v12, %v7566_v58  ;;  %5410 = vtanh.f32 %v3832_v35 }
 0x507   : > { %v4022_v19 = vmul.f32 %v3958_v53, %v7572_v0  ;;  %v3707_v2 = vmul.f32 %v3643_v31, %v7569_v5  ;;  %v3507_v41 = vmul.f32 0.5, %v7520_v34  ;;  %5412 = vtanh.f32 %v3834_v24 }
 0x508   : > { %v3650_v33 = vmul.f32 %v3586_v9, %v7616_v21  ;;  %v3709_v43 = vmul.f32 %v3645_v30, %v7583_v16  ;;  %v3767_v46 = vadd.f32 %v3703_v48, %v7542_v10  ;;  %v3769_v3 = vadd.f32 %v3705_v57, %v7549_v18 }
 0x509   : > { %v4080_v54 = vpack.c.bf16 %v4022_v19, %v4020_v13  ;;  %v3711_v55 = vmul.f32 %v3647_v45, %v7600_v4  ;;  %v3649_v58 = vmul.f32 %v3585_v50, %v7609_v14  ;;  %v3509_v0 = vmul.f32 0.5, %v7523_v61 }
 0x50a   : > { %v3772_v31 = vadd.f32 %v3708_v15, %v7576_v25  ;;  %v5407_v40 = vpop.eup %5406  ;;  %v3712_v12 = vmul.f32 %v3648_v47, %v7605_v60  ;;  %v3831_v34 = vmul.f32 0.7978846, %v3767_v46  ;;  %v3833_v53 = vmul.f32 0.7978846, %v3769_v3 }
 0x50b   : > { %4290 = vmatprep.mubr.bf16.mxu1 %v4080_v54  ;;  %v3774_v30 = vadd.f32 %v3710_v28, %v7586_v49  ;;  %v5409_v35 = vpop.eup %5408  ;;  %v3714_v48 = vmul.f32 %v3650_v33, %v7616_v21  ;;  %v3955_v57 = vadd.f32 1.0, %v5407_v40  ;;  %v3771_v45 = vadd.f32 %v3707_v2, %v7569_v5 }
 0x50c   : > { %v3836_v9 = vmul.f32 0.7978846, %v3772_v31  ;;  %v3957_v50 = vadd.f32 1.0, %v5409_v35  ;;  %5414 = vtanh.f32 %v3831_v34  ;;  %v3773_v15 = vadd.f32 %v3709_v43, %v7583_v16 }
 0x50d   : > { %v3838_v61 = vmul.f32 0.7978846, %v3774_v30  ;;  %v3713_v24 = vmul.f32 %v3649_v58, %v7609_v14  ;;  %5416 = vtanh.f32 %v3833_v53  ;;  %v3835_v47 = vmul.f32 0.7978846, %v3771_v45 }
 0x50e   : > { %v4019_v13 = vmul.f32 %v3955_v57, %v3507_v41  ;;  %v4021_v19 = vmul.f32 %v3957_v50, %v3509_v0  ;;  %5418 = vtanh.f32 %v3836_v9  ;;  %v3837_v28 = vmul.f32 0.7978846, %v3773_v15 }
 0x50f   : > { %5420 = vtanh.f32 %v3838_v61  ;;  %v3776_v33 = vadd.f32 %v3712_v12, %v7605_v60  ;;  %v3778_v54 = vadd.f32 %v3714_v48, %v7616_v21  ;;  %v3512_v3 = vmul.f32 0.5, %v7545_v42 }
 0x510   : > { %v5411_v46 = vpop.eup %5410  ;;  %v4079_v2 = vpack.c.bf16 %v4021_v19, %v4019_v13  ;;  %5422 = vtanh.f32 %v3835_v47  ;;  %v3775_v43 = vadd.f32 %v3711_v55, %v7600_v4  ;;  %v3514_v0 = vmul.f32 0.5, %v7554_v22 }
 0x511   : > { %v5413_v31 = vpop.eup %5412  ;;  %v3960_v58 = vadd.f32 1.0, %v5411_v46  ;;  %5424 = vtanh.f32 %v3837_v28  ;;  %v3840_v40 = vmul.f32 0.7978846, %v3776_v33  ;;  %v3842_v41 = vmul.f32 0.7978846, %v3778_v54 }
 0x512   : > { %4291 = vmatmul.mubr.bf16.gmra.mrb[40].mxu1 %v4079_v2  ;;  %v3962_v34 = vadd.f32 1.0, %v5413_v31  ;;  %v3777_v12 = vadd.f32 %v3713_v24, %v7609_v14  ;;  %v3839_v53 = vmul.f32 0.7978846, %v3775_v43  ;;  %v3511_v50 = vmul.f32 0.5, %v7542_v10 }
 0x513   : > { %5426 = vtanh.f32 %v3840_v40  ;;  %v4024_v30 = vmul.f32 %v3960_v58, %v3512_v3  ;;  %v3513_v22 = vmul.f32 0.5, %v7549_v18  ;;  %v3516_v24 = vmul.f32 0.5, %v7576_v25 }
 0x514   : > { %v4026_v35 = vmul.f32 %v3962_v34, %v3514_v0  ;;  %5428 = vtanh.f32 %v3842_v41  ;;  %v3841_v42 = vmul.f32 0.7978846, %v3777_v12  ;;  %v3518_v33 = vmul.f32 0.5, %v7586_v49 }
 0x515   : > { %5430 = vtanh.f32 %v3839_v53  ;;  %v3515_v2 = vmul.f32 0.5, %v7569_v5  ;;  %v3517_v3 = vmul.f32 0.5, %v7583_v16  ;;  %v3520_v49 = vmul.f32 0.5, %v7605_v60 }
 0x516   : > { %v5415_v48 = vpop.eup %5414  ;;  %v4082_v55 = vpack.c.bf16 %v4026_v35, %v4024_v30  ;;  %5432 = vtanh.f32 %v3841_v42  ;;  %v3522_v30 = vmul.f32 0.5, %v7616_v21  ;;  %v3519_v42 = vmul.f32 0.5, %v7600_v4 }
 0x517   : > { %v5417_v57 = vpop.eup %5416  ;;  %v3959_v9 = vadd.f32 1.0, %v5415_v48 }
 0x518   : > { %v5419_v45 = vpop.eup %5418  ;;  %4298 = vmatprep.mubr.bf16.mxu1 %v4082_v55  ;;  %v3961_v61 = vadd.f32 1.0, %v5417_v57 }
 0x519   : > { %v5421_v15 = vpop.eup %5420  ;;  %v3964_v47 = vadd.f32 1.0, %v5419_v45  ;;  %v4023_v19 = vmul.f32 %v3959_v9, %v3511_v50  ;;  %v3521_v9 = vmul.f32 0.5, %v7609_v14 }
 0x51a   : > { %v5423_v13 = vpop.eup %5422  ;;  %v4025_v28 = vmul.f32 %v3961_v61, %v3513_v22  ;;  %v3966_v54 = vadd.f32 1.0, %v5421_v15 }
 0x51b   : > { %v5425_v46 = vpop.eup %5424  ;;  %v3963_v43 = vadd.f32 1.0, %v5423_v13  ;;  %v4028_v31 = vmul.f32 %v3964_v47, %v3516_v24 }
 0x51c   : > { %v4081_v10 = vpack.c.bf16 %v4025_v28, %v4023_v19  ;;  %v4030_v18 = vmul.f32 %v3966_v54, %v3518_v33  ;;  %v3965_v58 = vadd.f32 1.0, %v5425_v46 }
 0x51d   : > { %v5427_v40 = vpop.eup %5426  ;;  %v4027_v0 = vmul.f32 %v3963_v43, %v3515_v2 }
 0x51e   : > { %v5429_v41 = vpop.eup %5428  ;;  %4299 = vmatmul.mubr.bf16.gmra.mrb[44].mxu1 %v4081_v10  ;;  %v4084_v25 = vpack.c.bf16 %v4030_v18, %v4028_v31  ;;  %v4029_v34 = vmul.f32 %v3965_v58, %v3517_v3  ;;  %v3968_v12 = vadd.f32 1.0, %v5427_v40 }
 0x51f   : > { %v5431_v53 = vpop.eup %5430  ;;  %v3970_v5 = vadd.f32 1.0, %v5429_v41 }
 0x520   : > { %v5433_v35 = vpop.eup %5432  ;;  %4306 = vmatprep.mubr.bf16.mxu1 %v4084_v25  ;;  %v4083_v16 = vpack.c.bf16 %v4029_v34, %v4027_v0  ;;  %v3967_v48 = vadd.f32 1.0, %v5431_v53  ;;  %v4032_v55 = vmul.f32 %v3968_v12, %v3520_v49 }
 0x521   : > { %v4034_v57 = vmul.f32 %v3970_v5, %v3522_v30  ;;  %v3969_v45 = vadd.f32 1.0, %v5433_v35 }
 0x522   : > { %v4031_v22 = vmul.f32 %v3967_v48, %v3519_v42 }
 0x523   : > { %v4086_v50 = vpack.c.bf16 %v4034_v57, %v4032_v55  ;;  %v4033_v61 = vmul.f32 %v3969_v45, %v3521_v9 }
 0x525   : > { %v4085_v15 = vpack.c.bf16 %v4033_v61, %v4031_v22 }
 0x526   : > { %4307 = vmatmul.mubr.bf16.gmra.mrb[48].mxu1 %v4083_v16 }
 0x527   : > { %4314 = vmatprep.mubr.bf16.mxu1 %v4086_v50 }
 0x52e   : > { %4315 = vmatmul.mubr.bf16.gmra.mrb[52].mxu1 %v4085_v15 }
 0x531   : > { %v3400_v60 = vpop.f32.mrb[56].mxu0 }
 0x532   : > { %v7659_v21 = vadd.f32 %v3400_v60, %v7481_v59  ;;  %v3402_v24 = vpop.f32.mrb[57].mxu0 }
 0x533   : > { %v7662_v4 = vadd.f32 %v3402_v24, %v7483_v17  ;;  %v3404_v47 = vpop.f32.mrb[58].mxu0 }
 0x534   : > { %v3587_v13 = vmul.f32 0.044715, %v7659_v21  ;;  %v7666_v14 = vadd.f32 %v3404_v47, %v7481_v59  ;;  %v3406_v19 = vpop.f32.mrb[59].mxu0 }
 0x535   : > { %v3588_v28 = vmul.f32 0.044715, %v7662_v4  ;;  %v7670_v33 = vadd.f32 %v3406_v19, %v7483_v17 }
 0x536   : > { %v3651_v54 = vmul.f32 %v3587_v13, %v7659_v21  ;;  %v3589_v46 = vmul.f32 0.044715, %v7666_v14 }
 0x537   : > { %v3652_v2 = vmul.f32 %v3588_v28, %v7662_v4  ;;  %v3590_v3 = vmul.f32 0.044715, %v7670_v33 }
 0x538   : > { %v3715_v43 = vmul.f32 %v3651_v54, %v7659_v21  ;;  %v3653_v10 = vmul.f32 %v3589_v46, %v7666_v14 }
 0x539   : > { %v3716_v31 = vmul.f32 %v3652_v2, %v7662_v4  ;;  %v3654_v18 = vmul.f32 %v3590_v3, %v7670_v33  ;;  %v3410_v58 = vpop.f32.mrb[60].mxu0 }
 0x53a   : > { %v3717_v40 = vmul.f32 %v3653_v10, %v7666_v14  ;;  %v7682_v41 = vadd.f32 %v3410_v58, %v7481_v59  ;;  %v3412_v25 = vpop.f32.mrb[61].mxu0  ;;  %v3779_v0 = vadd.f32 %v3715_v43, %v7659_v21 }
 0x53b   : > { %v3718_v34 = vmul.f32 %v3654_v18, %v7670_v33  ;;  %v7687_v12 = vadd.f32 %v3412_v25, %v7483_v17  ;;  %v3414_v53 = vpop.f32.mrb[62].mxu0  ;;  %v3780_v49 = vadd.f32 %v3716_v31, %v7662_v4 }
 0x53c   : > { %v3591_v30 = vmul.f32 0.044715, %v7682_v41  ;;  %v7692_v5 = vadd.f32 %v3414_v53, %v7481_v59  ;;  %v3416_v35 = vpop.f32.mrb[63].mxu0  ;;  %v3781_v16 = vadd.f32 %v3717_v40, %v7666_v14  ;;  %v3843_v42 = vmul.f32 0.7978846, %v3779_v0 }
 0x53d   : > { %v3592_v48 = vmul.f32 0.044715, %v7687_v12  ;;  %v7697_v55 = vadd.f32 %v3416_v35, %v7483_v17  ;;  %v3782_v57 = vadd.f32 %v3718_v34, %v7670_v33  ;;  %v3844_v9 = vmul.f32 0.7978846, %v3780_v49 }
 0x53e   : > { %v3655_v45 = vmul.f32 %v3591_v30, %v7682_v41  ;;  %v3593_v50 = vmul.f32 0.044715, %v7692_v5  ;;  %v3845_v22 = vmul.f32 0.7978846, %v3781_v16  ;;  %5434 = vtanh.f32 %v3843_v42 }
 0x53f   : > { %v3656_v61 = vmul.f32 %v3592_v48, %v7687_v12  ;;  %v3594_v15 = vmul.f32 0.044715, %v7697_v55  ;;  %v3846_v60 = vmul.f32 0.7978846, %v3782_v57  ;;  %5436 = vtanh.f32 %v3844_v9 }
 0x540   : > { %v3719_v24 = vmul.f32 %v3655_v45, %v7682_v41  ;;  %v3657_v47 = vmul.f32 %v3593_v50, %v7692_v5  ;;  %5438 = vtanh.f32 %v3845_v22  ;;  %v3524_v9 = vmul.f32 0.5, %v7662_v4 }
 0x541   : > { %v3720_v13 = vmul.f32 %v3656_v61, %v7687_v12  ;;  %v3658_v19 = vmul.f32 %v3594_v15, %v7697_v55  ;;  %v3420_v28 = vpop.f32.mrb[64].mxu0  ;;  %5440 = vtanh.f32 %v3846_v60  ;;  %v3523_v45 = vmul.f32 0.5, %v7659_v21 }
 0x542   : > { %v3721_v54 = vmul.f32 %v3657_v47, %v7692_v5  ;;  %v3422_v46 = vpop.f32.mrb[65].mxu0  ;;  %v3783_v31 = vadd.f32 %v3719_v24, %v7682_v41  ;;  %v7722_v53 = vadd.f32 %v3420_v28, %v7481_v59  ;;  %v3525_v50 = vmul.f32 0.5, %v7666_v14 }
 0x543   : > { %v3722_v2 = vmul.f32 %v3658_v19, %v7697_v55  ;;  %v7711_v3 = vadd.f32 %v3422_v46, %v7483_v17  ;;  %v3424_v43 = vpop.f32.mrb[66].mxu0  ;;  %v3784_v10 = vadd.f32 %v3720_v13, %v7687_v12  ;;  %v3526_v60 = vmul.f32 0.5, %v7670_v33 }
 0x544   : > { %v3426_v18 = vpop.f32.mrb[67].mxu0  ;;  %v3785_v58 = vadd.f32 %v3721_v54, %v7692_v5  ;;  %v7725_v49 = vadd.f32 %v3424_v43, %v7481_v59  ;;  %v3847_v30 = vmul.f32 0.7978846, %v3783_v31  ;;  %v3595_v13 = vmul.f32 0.044715, %v7722_v53 }
 0x545   : > { %v3596_v40 = vmul.f32 0.044715, %v7711_v3  ;;  %v7718_v25 = vadd.f32 %v3426_v18, %v7483_v17  ;;  %v3786_v0 = vadd.f32 %v3722_v2, %v7697_v55  ;;  %v3848_v34 = vmul.f32 0.7978846, %v3784_v10 }
 0x546   : > { %v3849_v35 = vmul.f32 0.7978846, %v3785_v58  ;;  %v3597_v14 = vmul.f32 0.044715, %v7725_v49  ;;  %v3528_v18 = vmul.f32 0.5, %v7687_v12  ;;  %v3530_v58 = vmul.f32 0.5, %v7697_v55 }
 0x547   : > { %v3660_v16 = vmul.f32 %v3596_v40, %v7711_v3  ;;  %v3598_v42 = vmul.f32 0.044715, %v7718_v25  ;;  %v3850_v48 = vmul.f32 0.7978846, %v3786_v0  ;;  %5442 = vtanh.f32 %v3848_v34 }
 0x548   : > { %v5435_v57 = vpop.eup %5434  ;;  %5444 = vtanh.f32 %v3847_v30 }
 0x549   : > { %v5437_v22 = vpop.eup %5436  ;;  %v3662_v61 = vmul.f32 %v3598_v42, %v7718_v25  ;;  %v3430_v15 = vpop.f32.mrb[68].mxu0  ;;  %v3971_v24 = vadd.f32 1.0, %v5435_v57  ;;  %5446 = vtanh.f32 %v3850_v48  ;;  %v3724_v19 = vmul.f32 %v3660_v16, %v7711_v3 }
 0x54a   : > { %v5439_v47 = vpop.eup %5438  ;;  %v3432_v28 = vpop.f32.mrb[69].mxu0  ;;  %v3972_v4 = vadd.f32 1.0, %v5437_v22  ;;  %5448 = vtanh.f32 %v3849_v35  ;;  %v7742_v43 = vadd.f32 %v3430_v15, %v7481_v59  ;;  %v3659_v35 = vmul.f32 %v3595_v13, %v7722_v53 }
 0x54b   : > { %v5441_v21 = vpop.eup %5440  ;;  %v3726_v54 = vmul.f32 %v3662_v61, %v7718_v25  ;;  %v7739_v46 = vadd.f32 %v3432_v28, %v7483_v17  ;;  %v3434_v2 = vpop.f32.mrb[70].mxu0  ;;  %v3973_v33 = vadd.f32 1.0, %v5439_v47  ;;  %v4035_v34 = vmul.f32 %v3971_v24, %v3523_v45 }
 0x54c   : > { %v3436_v10 = vpop.f32.mrb[71].mxu0  ;;  %v3974_v31 = vadd.f32 1.0, %v5441_v21  ;;  %v4036_v16 = vmul.f32 %v3972_v4, %v3524_v9  ;;  %v3788_v48 = vadd.f32 %v3724_v19, %v7711_v3  ;;  %v3661_v57 = vmul.f32 %v3597_v14, %v7725_v49 }
 0x54d   : > { %v3600_v40 = vmul.f32 0.044715, %v7739_v46  ;;  %v7748_v0 = vadd.f32 %v3436_v10, %v7483_v17  ;;  %v4037_v30 = vmul.f32 %v3973_v33, %v3525_v50  ;;  %v3790_v55 = vadd.f32 %v3726_v54, %v7718_v25 }
 0x54e   : > { %v4038_v42 = vmul.f32 %v3974_v31, %v3526_v60  ;;  %v3599_v61 = vmul.f32 0.044715, %v7742_v43  ;;  %v3527_v47 = vmul.f32 0.5, %v7682_v41  ;;  %v3852_v45 = vmul.f32 0.7978846, %v3788_v48 }
 0x54f   : > { %v3602_v22 = vmul.f32 0.044715, %v7748_v0  ;;  %v4087_v12 = vpack.c.bf16 %v4037_v30, %v4035_v34  ;;  %v3664_v24 = vmul.f32 %v3600_v40, %v7739_v46  ;;  %v7759_v9 = vadd.f32 %v3434_v2, %v7481_v59 }
 0x550   : > { %v4088_v15 = vpack.c.bf16 %v4038_v42, %v4036_v16  ;;  %v3529_v13 = vmul.f32 0.5, %v7692_v5  ;;  %v3854_v19 = vmul.f32 0.7978846, %v3790_v55  ;;  %v3723_v4 = vmul.f32 %v3659_v35, %v7722_v53 }
 0x551   : > { %v5443_v50 = vpop.eup %5442  ;;  %v3440_v60 = vpop.f32.mrb[72].mxu0  ;;  %v3666_v21 = vmul.f32 %v3602_v22, %v7748_v0  ;;  %5450 = vtanh.f32 %v3852_v45  ;;  %v3725_v33 = vmul.f32 %v3661_v57, %v7725_v49  ;;  %v7766_v31 = vmul.f32 0.5, %v7722_v53 }
 0x552   : > { %v5445_v28 = vpop.eup %5444  ;;  %v3442_v14 = vpop.f32.mrb[73].mxu0  ;;  %4322 = vmatprep.mubr.bf16.mxu1 %v4088_v15  ;;  %v3976_v54 = vadd.f32 1.0, %v5443_v50  ;;  %5452 = vtanh.f32 %v3854_v19  ;;  %v3663_v40 = vmul.f32 %v3599_v61, %v7742_v43  ;;  %v7770_v34 = vadd.f32 %v3440_v60, %v7481_v59 }
 0x553   : > { %v5447_v41 = vpop.eup %5446  ;;  %v3444_v10 = vpop.f32.mrb[74].mxu0  ;;  %4323 = vmatmul.mubr.bf16.gmra.mrb[56].mxu1 %v4087_v12  ;;  %v3975_v2 = vadd.f32 1.0, %v5445_v28  ;;  %v7773_v30 = vadd.f32 %v3442_v14, %v7483_v17  ;;  %v3728_v42 = vmul.f32 %v3664_v24, %v7739_v46  ;;  %v3601_v48 = vmul.f32 0.044715, %v7759_v9 }
 0x554   : > { %v5449_v5 = vpop.eup %5448  ;;  %v3446_v35 = vpop.f32.mrb[75].mxu0  ;;  %v3978_v16 = vadd.f32 1.0, %v5447_v41  ;;  %v7778_v57 = vadd.f32 %v3444_v10, %v7481_v59  ;;  %v3730_v12 = vmul.f32 %v3666_v21, %v7748_v0  ;;  %v4040_v55 = vmul.f32 %v3976_v54, %v3528_v18 }
 0x555   : > { %v3977_v22 = vadd.f32 1.0, %v5449_v5  ;;  %v3787_v15 = vadd.f32 %v3723_v4, %v7722_v53  ;;  %v7783_v45 = vadd.f32 %v3446_v35, %v7483_v17  ;;  %v4039_v50 = vmul.f32 %v3975_v2, %v3527_v47 }
 0x556   : > { %v4042_v61 = vmul.f32 %v3978_v16, %v3530_v58  ;;  %v3789_v19 = vadd.f32 %v3725_v33, %v7725_v49  ;;  %v3603_v24 = vmul.f32 0.044715, %v7770_v34  ;;  %v3604_v28 = vmul.f32 0.044715, %v7773_v30 }
 0x557   : > { %v4041_v60 = vmul.f32 %v3977_v22, %v3529_v13  ;;  %v3851_v41 = vmul.f32 0.7978846, %v3787_v15  ;;  %v3605_v10 = vmul.f32 0.044715, %v7778_v57  ;;  %v3532_v58 = vmul.f32 0.5, %v7711_v3 }
 0x558   : > { %v4090_v14 = vpack.c.bf16 %v4042_v61, %v4040_v55  ;;  %v3853_v53 = vmul.f32 0.7978846, %v3789_v19  ;;  %v3665_v4 = vmul.f32 %v3601_v48, %v7759_v9  ;;  %v3534_v54 = vmul.f32 0.5, %v7718_v25 }
 0x559   : > { %v3450_v21 = vpop.f32.mrb[76].mxu0  ;;  %v4089_v18 = vpack.c.bf16 %v4041_v60, %v4039_v50  ;;  %5454 = vtanh.f32 %v3851_v41  ;;  %v3727_v33 = vmul.f32 %v3663_v40, %v7742_v43  ;;  %v3606_v2 = vmul.f32 0.044715, %v7783_v45 }
 0x55a   : > { %v7792_v47 = vadd.f32 %v3450_v21, %v7481_v59  ;;  %v3452_v13 = vpop.f32.mrb[77].mxu0  ;;  %4330 = vmatprep.mubr.bf16.mxu1 %v4090_v14  ;;  %5456 = vtanh.f32 %v3853_v53  ;;  %v3667_v16 = vmul.f32 %v3603_v24, %v7770_v34  ;;  %v3533_v22 = vmul.f32 0.5, %v7725_v49 }
 0x55b   : > { %v7798_v5 = vadd.f32 %v3452_v13, %v7483_v17  ;;  %v3454_v35 = vpop.f32.mrb[78].mxu0  ;;  %4331 = vmatmul.mubr.bf16.gmra.mrb[60].mxu1 %v4089_v18  ;;  %v5451_v3 = vpop.eup %5450  ;;  %v3792_v55 = vadd.f32 %v3728_v42, %v7739_v46  ;;  %v3794_v25 = vadd.f32 %v3730_v12, %v7748_v0  ;;  %v3668_v40 = vmul.f32 %v3604_v28, %v7773_v30 }
 0x55c   : > { %v3456_v48 = vpop.f32.mrb[79].mxu0  ;;  %v5453_v61 = vpop.eup %5452  ;;  %v3669_v15 = vmul.f32 %v3605_v10, %v7778_v57  ;;  %v7807_v50 = vadd.f32 %v3454_v35, %v7481_v59  ;;  %v3980_v60 = vadd.f32 1.0, %v5451_v3  ;;  %v3729_v19 = vmul.f32 %v3665_v4, %v7759_v9 }
 0x55d   : > { %v3607_v24 = vmul.f32 0.044715, %v7792_v47  ;;  %v3982_v14 = vadd.f32 1.0, %v5453_v61  ;;  %v3856_v41 = vmul.f32 0.7978846, %v3792_v55  ;;  %v3670_v49 = vmul.f32 %v3606_v2, %v7783_v45 }
 0x55e   : > { %v3608_v42 = vmul.f32 0.044715, %v7798_v5  ;;  %v7814_v12 = vadd.f32 %v3456_v48, %v7483_v17  ;;  %v3858_v28 = vmul.f32 0.7978846, %v3794_v25  ;;  %v7817_v10 = vmul.f32 %v3667_v16, %v7770_v34 }
 0x55f   : > { %v4044_v21 = vmul.f32 %v3980_v60, %v3532_v58  ;;  %v4046_v18 = vmul.f32 %v3982_v14, %v3534_v54  ;;  %5458 = vtanh.f32 %v3856_v41  ;;  %v3732_v53 = vmul.f32 %v3668_v40, %v7773_v30 }
 0x560   : > { %v7821_v4 = vmul.f32 %v3669_v15, %v7778_v57  ;;  %v3609_v13 = vmul.f32 0.044715, %v7807_v50  ;;  %5460 = vtanh.f32 %v3858_v28  ;;  %v3671_v35 = vmul.f32 %v3607_v24, %v7792_v47 }
 0x561   : > { %v3460_v2 = vpop.f32.mrb[80].mxu0  ;;  %v4092_v48 = vpack.c.bf16 %v4046_v18, %v4044_v21  ;;  %v3536_v55 = vmul.f32 0.5, %v7739_v46  ;;  %v3791_v16 = vadd.f32 %v3727_v33, %v7742_v43  ;;  %v3734_v58 = vmul.f32 %v3670_v49, %v7783_v45 }
 0x562   : > { %v3462_v3 = vpop.f32.mrb[81].mxu0  ;;  %v3672_v54 = vmul.f32 %v3608_v42, %v7798_v5  ;;  %v3610_v25 = vmul.f32 0.044715, %v7814_v12  ;;  %v3793_v40 = vadd.f32 %v3729_v19, %v7759_v9  ;;  %v7832_v60 = vadd.f32 %v3460_v2, %v7481_v59 }
 0x563   : > { %v3464_v61 = vpop.f32.mrb[82].mxu0  ;;  %v5455_v15 = vpop.eup %5454  ;;  %4338 = vmatprep.mubr.bf16.mxu1 %v4092_v48  ;;  %v3538_v14 = vmul.f32 0.5, %v7748_v0  ;;  %v7836_v46 = vmul.f32 0.5, %v7742_v43  ;;  %v3855_v33 = vmul.f32 0.7978846, %v3791_v16  ;;  %v3673_v49 = vmul.f32 %v3609_v13, %v7807_v50 }
 0x564   : > { %v3466_v24 = vpop.f32.mrb[83].mxu0  ;;  %v5457_v41 = vpop.eup %5456  ;;  %v7840_v42 = vadd.f32 %v3462_v3, %v7483_v17  ;;  %v3979_v28 = vadd.f32 1.0, %v5455_v15  ;;  %v3857_v19 = vmul.f32 0.7978846, %v3793_v40  ;;  %v7843_v21 = vmul.f32 %v3671_v35, %v7792_v47 }
 0x565   : > { %v7846_v18 = vadd.f32 %v3464_v61, %v7481_v59  ;;  %v3981_v2 = vadd.f32 1.0, %v5457_v41  ;;  %5462 = vtanh.f32 %v3855_v33  ;;  %v7849_v43 = vmul.f32 %v3672_v54, %v7798_v5 }
 0x566   : > { %v3674_v0 = vmul.f32 %v3610_v25, %v7814_v12  ;;  %v7853_v13 = vadd.f32 %v3466_v24, %v7483_v17  ;;  %5464 = vtanh.f32 %v3857_v19  ;;  %v3611_v3 = vmul.f32 0.044715, %v7832_v60 }
 0x567   : > { %v4043_v48 = vmul.f32 %v3979_v28, %v7766_v31  ;;  %v4045_v35 = vmul.f32 %v3981_v2, %v3533_v22  ;;  %v3796_v16 = vadd.f32 %v3732_v53, %v7773_v30  ;;  %v7859_v61 = vmul.f32 %v3673_v49, %v7807_v50 }
 0x568   : > { %v3612_v40 = vmul.f32 0.044715, %v7840_v42  ;;  %v3537_v15 = vmul.f32 0.5, %v7759_v9  ;;  %v3798_v25 = vadd.f32 %v3734_v58, %v7783_v45  ;;  %v3613_v33 = vmul.f32 0.044715, %v7846_v18 }
 0x569   : > { %v3470_v54 = vpop.f32.mrb[84].mxu0  ;;  %v5459_v24 = vpop.eup %5458  ;;  %v4091_v41 = vpack.c.bf16 %v4045_v35, %v4043_v48  ;;  %v3860_v22 = vmul.f32 0.7978846, %v3796_v16  ;;  %v3738_v49 = vmul.f32 %v3674_v0, %v7814_v12  ;;  %v3614_v28 = vmul.f32 0.044715, %v7853_v13 }
 0x56a   : > { %v7866_v19 = vadd.f32 %v3470_v54, %v7481_v59  ;;  %v3472_v31 = vpop.f32.mrb[85].mxu0  ;;  %v5461_v53 = vpop.eup %5460  ;;  %v3984_v2 = vadd.f32 1.0, %v5459_v24  ;;  %v3862_v37 = vmul.f32 0.7978846, %v3798_v25  ;;  %v3675_v9 = vmul.f32 %v3611_v3, %v7832_v60 }
 0x56b   : > { %v3474_v36 = vpop.f32.mrb[86].mxu0  ;;  %4339 = vmatmul.mubr.bf16.gmra.mrb[64].mxu1 %v4091_v41  ;;  %v7872_v58 = vadd.f32 %v3472_v31, %v7483_v17  ;;  %v3986_v48 = vadd.f32 1.0, %v5461_v53  ;;  %5466 = vtanh.f32 %v3860_v22  ;;  %v3676_v54 = vmul.f32 %v3612_v40, %v7840_v42 }
 0x56c   : > { %v3476_v35 = vpop.f32.mrb[87].mxu0  ;;  %v7876_v16 = vadd.f32 %v3474_v36, %v7481_v59  ;;  %v3540_v0 = vmul.f32 0.5, %v7773_v30  ;;  %5468 = vtanh.f32 %v3862_v37  ;;  %v3677_v24 = vmul.f32 %v3613_v33, %v7846_v18 }
 0x56d   : > { %v3615_v25 = vmul.f32 0.044715, %v7866_v19  ;;  %v4048_v3 = vmul.f32 %v3984_v2, %v3536_v55  ;;  %v4050_v41 = vmul.f32 %v3986_v48, %v3538_v14  ;;  %v3678_v31 = vmul.f32 %v3614_v28, %v7853_v13 }
 0x56e   : > { %v7883_v53 = vadd.f32 %v3476_v35, %v7483_v17  ;;  %v3795_v40 = vadd.f32 %v7817_v10, %v7770_v34  ;;  %v3797_v36 = vadd.f32 %v7821_v4, %v7778_v57  ;;  %v7890_v37 = vmul.f32 %v3675_v9, %v7832_v60 }
 0x56f   : > { %v5463_v22 = vpop.eup %5462  ;;  %v3616_v30 = vmul.f32 0.044715, %v7872_v58  ;;  %v4094_v33 = vpack.c.bf16 %v4050_v41, %v4048_v3  ;;  %v3542_v55 = vmul.f32 0.5, %v7783_v45  ;;  %v3740_v28 = vmul.f32 %v3676_v54, %v7840_v42 }
 0x570   : > { %v5465_v14 = vpop.eup %5464  ;;  %v3617_v2 = vmul.f32 0.044715, %v7876_v16  ;;  %v3983_v48 = vadd.f32 1.0, %v5463_v22  ;;  %v3859_v10 = vmul.f32 0.7978846, %v3795_v40  ;;  %v3679_v51 = vmul.f32 %v3615_v25, %v7866_v19 }
 0x571   : > { %v3480_v35 = vpop.f32.mrb[88].mxu0  ;;  %4346 = vmatprep.mubr.bf16.mxu1 %v4094_v33  ;;  %v3985_v4 = vadd.f32 1.0, %v5465_v14  ;;  %v7898_v9 = vmul.f32 0.5, %v7770_v34  ;;  %v3861_v6 = vmul.f32 0.7978846, %v3797_v36  ;;  %v3741_v3 = vmul.f32 %v3677_v24, %v7846_v18 }
 0x572   : > { %v3482_v23 = vpop.f32.mrb[89].mxu0  ;;  %v3742_v45 = vmul.f32 %v3678_v31, %v7853_v13  ;;  %v3618_v54 = vmul.f32 0.044715, %v7883_v53  ;;  %5470 = vtanh.f32 %v3859_v10  ;;  %v4047_v22 = vmul.f32 %v3983_v48, %v7836_v46 }
 0x573   : > { %v3484_v41 = vpop.f32.mrb[90].mxu0  ;;  %v4049_v40 = vmul.f32 %v3985_v4, %v3537_v15  ;;  %v3541_v25 = vmul.f32 0.5, %v7778_v57  ;;  %5472 = vtanh.f32 %v3861_v6  ;;  %v3680_v14 = vmul.f32 %v3616_v30, %v7872_v58 }
 0x574   : > { %v3486_v33 = vpop.f32.mrb[91].mxu0  ;;  %v3681_v34 = vmul.f32 %v3617_v2, %v7876_v16  ;;  %v7908_v36 = vadd.f32 %v3482_v23, %v7483_v17  ;;  %v3800_v24 = vadd.f32 %v7849_v43, %v7798_v5  ;;  %v3743_v10 = vmul.f32 %v3679_v51, %v7866_v19 }
 0x575   : > { %v5467_v31 = vpop.eup %5466  ;;  %v4093_v38 = vpack.c.bf16 %v4049_v40, %v4047_v22  ;;  %v7914_v46 = vadd.f32 %v3486_v33, %v7483_v17  ;;  %v3802_v6 = vadd.f32 %v3738_v49, %v7814_v12  ;;  %v3682_v15 = vmul.f32 %v3618_v54, %v7883_v53 }
 0x576   : > { %v5469_v57 = vpop.eup %5468  ;;  %v7919_v30 = vadd.f32 %v3480_v35, %v7481_v59  ;;  %v3988_v23 = vadd.f32 1.0, %v5467_v31  ;;  %v3864_v2 = vmul.f32 0.7978846, %v3800_v24  ;;  %v7922_v43 = vadd.f32 %v3484_v41, %v7481_v59 }
 0x577   : > { %4347 = vmatmul.mubr.bf16.gmra.mrb[68].mxu1 %v4093_v38  ;;  %v3990_v48 = vadd.f32 1.0, %v5469_v57  ;;  %v3544_v51 = vmul.f32 0.5, %v7798_v5  ;;  %v3866_v4 = vmul.f32 0.7978846, %v3802_v6  ;;  %v3744_v22 = vmul.f32 %v3680_v14, %v7872_v58 }
 0x578   : > { %v3745_v49 = vmul.f32 %v3681_v34, %v7876_v16  ;;  %v3620_v40 = vmul.f32 0.044715, %v7908_v36  ;;  %5474 = vtanh.f32 %v3864_v2  ;;  %v4052_v54 = vmul.f32 %v3988_v23, %v3540_v0 }
 0x579   : > { %v4054_v35 = vmul.f32 %v3990_v48, %v3542_v55  ;;  %v3622_v33 = vmul.f32 0.044715, %v7914_v46  ;;  %5476 = vtanh.f32 %v3866_v4  ;;  %v3746_v38 = vmul.f32 %v3682_v15, %v7883_v53 }
 0x57a   : > { %v3619_v41 = vmul.f32 0.044715, %v7919_v30  ;;  %v3799_v5 = vadd.f32 %v7843_v21, %v7792_v47  ;;  %v3801_v14 = vadd.f32 %v7859_v61, %v7807_v50  ;;  %v3621_v34 = vmul.f32 0.044715, %v7922_v43 }
 0x57b   : > { %v4096_v24 = vpack.c.bf16 %v4054_v35, %v4052_v54  ;;  %v3546_v31 = vmul.f32 0.5, %v7814_v12  ;;  %v3804_v0 = vadd.f32 %v3740_v28, %v7840_v42  ;;  %v3684_v6 = vmul.f32 %v3620_v40, %v7908_v36 }
 0x57c   : > { %v5471_v55 = vpop.eup %5470  ;;  %v3863_v57 = vmul.f32 0.7978846, %v3799_v5  ;;  %v3865_v15 = vmul.f32 0.7978846, %v3801_v14  ;;  %v3806_v23 = vadd.f32 %v3742_v45, %v7853_v13  ;;  %v3686_v48 = vmul.f32 %v3622_v33, %v7914_v46 }
 0x57d   : > { %v5473_v2 = vpop.eup %5472  ;;  %4354 = vmatprep.mubr.bf16.mxu1 %v4096_v24  ;;  %v3987_v21 = vadd.f32 1.0, %v5471_v55  ;;  %v3868_v61 = vmul.f32 0.7978846, %v3804_v0  ;;  %v3803_v4 = vadd.f32 %v7890_v37, %v7832_v60  ;;  %v3805_v28 = vadd.f32 %v3741_v3, %v7846_v18 }
 0x57e   : > { %v3989_v54 = vadd.f32 1.0, %v5473_v2  ;;  %5478 = vtanh.f32 %v3863_v57  ;;  %v3870_v12 = vmul.f32 0.7978846, %v3806_v23  ;;  %v3683_v40 = vmul.f32 %v3619_v41, %v7919_v30 }
 0x57f   : > { %v3685_v35 = vmul.f32 %v3621_v34, %v7922_v43  ;;  %5480 = vtanh.f32 %v3865_v15  ;;  %v3867_v45 = vmul.f32 0.7978846, %v3803_v4  ;;  %v4051_v5 = vmul.f32 %v3987_v21, %v7898_v9 }
 0x580   : > { %v4053_v14 = vmul.f32 %v3989_v54, %v3541_v25  ;;  %5482 = vtanh.f32 %v3868_v61  ;;  %v3869_v33 = vmul.f32 0.7978846, %v3805_v28  ;;  %v3748_v24 = vmul.f32 %v3684_v6, %v7908_v36 }
 0x581   : > { %5484 = vtanh.f32 %v3870_v12  ;;  %v3808_v37 = vadd.f32 %v3744_v22, %v7872_v58  ;;  %v3810_v0 = vadd.f32 %v3746_v38, %v7883_v53  ;;  %v3750_v41 = vmul.f32 %v3686_v48, %v7914_v46 }
 0x582   : > { %v5475_v55 = vpop.eup %5474  ;;  %v4095_v3 = vpack.c.bf16 %v4053_v14, %v4051_v5  ;;  %5486 = vtanh.f32 %v3867_v45  ;;  %v3807_v34 = vadd.f32 %v3743_v10, %v7866_v19  ;;  %v3747_v23 = vmul.f32 %v3683_v40, %v7919_v30 }
 0x583   : > { %v5477_v57 = vpop.eup %5476  ;;  %v3992_v15 = vadd.f32 1.0, %v5475_v55  ;;  %5488 = vtanh.f32 %v3869_v33  ;;  %v3872_v9 = vmul.f32 0.7978846, %v3808_v37  ;;  %v3874_v25 = vmul.f32 0.7978846, %v3810_v0 }
 0x584   : > { %4355 = vmatmul.mubr.bf16.gmra.mrb[72].mxu1 %v4095_v3  ;;  %v3994_v6 = vadd.f32 1.0, %v5477_v57  ;;  %v3809_v22 = vadd.f32 %v3745_v49, %v7876_v16  ;;  %v3871_v2 = vmul.f32 0.7978846, %v3807_v34  ;;  %v3749_v38 = vmul.f32 %v3685_v35, %v7922_v43 }
 0x585   : > { %v4056_v21 = vmul.f32 %v3992_v15, %v3544_v51  ;;  %5490 = vtanh.f32 %v3872_v9  ;;  %v3812_v48 = vadd.f32 %v3748_v24, %v7908_v36  ;;  %v3814_v4 = vadd.f32 %v3750_v41, %v7914_v46 }
 0x586   : > { %v4058_v61 = vmul.f32 %v3994_v6, %v3546_v31  ;;  %5492 = vtanh.f32 %v3874_v25  ;;  %v3873_v10 = vmul.f32 0.7978846, %v3809_v22  ;;  %v3811_v49 = vadd.f32 %v3747_v23, %v7919_v30 }
 0x587   : > { %5494 = vtanh.f32 %v3871_v2  ;;  %v3876_v54 = vmul.f32 0.7978846, %v3812_v48  ;;  %v3878_v40 = vmul.f32 0.7978846, %v3814_v4  ;;  %v3543_v35 = vmul.f32 0.5, %v7792_v47 }
 0x588   : > { %v5479_v12 = vpop.eup %5478  ;;  %v4098_v28 = vpack.c.bf16 %v4058_v61, %v4056_v21  ;;  %5496 = vtanh.f32 %v3873_v10  ;;  %v3813_v5 = vadd.f32 %v3749_v38, %v7922_v43  ;;  %v3545_v14 = vmul.f32 0.5, %v7807_v50 }
 0x589   : > { %v5481_v45 = vpop.eup %5480  ;;  %v3991_v51 = vadd.f32 1.0, %v5479_v12  ;;  %5498 = vtanh.f32 %v3876_v54  ;;  %v3875_v24 = vmul.f32 0.7978846, %v3811_v49  ;;  %v3548_v0 = vmul.f32 0.5, %v7840_v42 }
 0x58a   : > { %v5483_v31 = vpop.eup %5482  ;;  %4362 = vmatprep.mubr.bf16.mxu1 %v4098_v28  ;;  %v3993_v33 = vadd.f32 1.0, %v5481_v45  ;;  %5500 = vtanh.f32 %v3878_v40  ;;  %v3550_v55 = vmul.f32 0.5, %v7853_v13  ;;  %v3877_v41 = vmul.f32 0.7978846, %v3813_v5 }
 0x58b   : > { %v5485_v37 = vpop.eup %5484  ;;  %v3996_v3 = vadd.f32 1.0, %v5483_v31  ;;  %v4055_v47 = vmul.f32 %v3991_v51, %v3543_v35  ;;  %5502 = vtanh.f32 %v3875_v24  ;;  %v3547_v25 = vmul.f32 0.5, %v7832_v60 }
 0x58c   : > { %v5487_v34 = vpop.eup %5486  ;;  %v4057_v57 = vmul.f32 %v3993_v33, %v3545_v14  ;;  %v3998_v15 = vadd.f32 1.0, %v5485_v37  ;;  %v3549_v50 = vmul.f32 0.5, %v7846_v18  ;;  %5504 = vtanh.f32 %v3877_v41 }
 0x58d   : > { %v5489_v9 = vpop.eup %5488  ;;  %v3995_v23 = vadd.f32 1.0, %v5487_v34  ;;  %v4060_v22 = vmul.f32 %v3996_v3, %v3548_v0  ;;  %v3552_v54 = vmul.f32 0.5, %v7872_v58  ;;  %v3554_v60 = vmul.f32 0.5, %v7883_v53 }
 0x58e   : > { %v4097_v6 = vpack.c.bf16 %v4057_v57, %v4055_v47  ;;  %v4062_v2 = vmul.f32 %v3998_v15, %v3550_v55  ;;  %v3997_v42 = vadd.f32 1.0, %v5489_v9  ;;  %v3551_v40 = vmul.f32 0.5, %v7866_v19 }
 0x58f   : > { %v5491_v38 = vpop.eup %5490  ;;  %v4059_v48 = vmul.f32 %v3995_v23, %v3547_v25  ;;  %v3553_v5 = vmul.f32 0.5, %v7876_v16  ;;  %v3556_v33 = vmul.f32 0.5, %v7908_v36  ;;  %v3558_v58 = vmul.f32 0.5, %v7914_v46 }
 0x590   : > { %v5493_v13 = vpop.eup %5492  ;;  %4363 = vmatmul.mubr.bf16.gmra.mrb[76].mxu1 %v4097_v6  ;;  %v4100_v21 = vpack.c.bf16 %v4062_v2, %v4060_v22  ;;  %v4061_v61 = vmul.f32 %v3997_v42, %v3549_v50  ;;  %v4000_v10 = vadd.f32 1.0, %v5491_v38  ;;  %v3555_v34 = vmul.f32 0.5, %v7919_v30 }
 0x591   : > { %v5495_v4 = vpop.eup %5494  ;;  %v4002_v12 = vadd.f32 1.0, %v5493_v13  ;;  %v3557_v50 = vmul.f32 0.5, %v7922_v43 }
 0x592   : > { %v5497_v18 = vpop.eup %5496  ;;  %4370 = vmatprep.mubr.bf16.mxu1 %v4100_v21  ;;  %v4099_v28 = vpack.c.bf16 %v4061_v61, %v4059_v48  ;;  %v3999_v49 = vadd.f32 1.0, %v5495_v4  ;;  %v4064_v35 = vmul.f32 %v4000_v10, %v3552_v54 }
 0x593   : > { %v5499_v45 = vpop.eup %5498  ;;  %v4066_v51 = vmul.f32 %v4002_v12, %v3554_v60  ;;  %v4001_v31 = vadd.f32 1.0, %v5497_v18 }
 0x594   : > { %v5501_v14 = vpop.eup %5500  ;;  %v4004_v24 = vadd.f32 1.0, %v5499_v45  ;;  %v4063_v37 = vmul.f32 %v3999_v49, %v3551_v40 }
 0x595   : > { %v4102_v53 = vpack.c.bf16 %v4066_v51, %v4064_v35  ;;  %v4065_v0 = vmul.f32 %v4001_v31, %v3553_v5  ;;  %v4006_v55 = vadd.f32 1.0, %v5501_v14  ;;  %v5503_v41 = vpop.eup %5502 }
 0x596   : > { %v3490_v3 = vpop.f32.mrb[92].mxu0  ;;  %v4068_v19 = vmul.f32 %v4004_v24, %v3556_v33  ;;  %v5505_v16 = vpop.eup %5504  ;;  %v4003_v25 = vadd.f32 1.0, %v5503_v41 }
 0x597   : > { %v3491_v47 = vadd.f32 %v3490_v3, %v7481_v59  ;;  %v3492_v57 = vpop.f32.mrb[93].mxu0  ;;  %v4101_v15 = vpack.c.bf16 %v4065_v0, %v4063_v37  ;;  %v4070_v9 = vmul.f32 %v4006_v55, %v3558_v58  ;;  %v4005_v23 = vadd.f32 1.0, %v5505_v16 }
 0x598   : > { %v3493_v36 = vadd.f32 %v3492_v57, %v7483_v17  ;;  %v3494_v46 = vpop.f32.mrb[94].mxu0  ;;  %4371 = vmatmul.mubr.bf16.gmra.mrb[80].mxu1 %v4099_v28  ;;  %v4067_v13 = vmul.f32 %v4003_v25, %v3555_v34 }
 0x599   : > { %v3623_v6 = vmul.f32 0.044715, %v3491_v47  ;;  %v3495_v22 = vadd.f32 %v3494_v46, %v7481_v59  ;;  %v3496_v2 = vpop.f32.mrb[95].mxu0  ;;  %4378 = vmatprep.mubr.bf16.mxu1 %v4102_v53  ;;  %v4104_v30 = vpack.c.bf16 %v4070_v9, %v4068_v19  ;;  %v4069_v21 = vmul.f32 %v4005_v23, %v3557_v50  ;;  %v7980_v23 = vld [vmem:[%s8214_s12] ss:$0 sm:$0xff] }
 0x59a   : > { %v3624_v42 = vmul.f32 0.044715, %v3493_v36  ;;  %v3497_v38 = vadd.f32 %v3496_v2, %v7483_v17  ;;  %v3559_v0 = vmul.f32 0.5, %v3491_v47  ;;  %v3560_v41 = vmul.f32 0.5, %v3493_v36 }
 0x59b   : > { %v3687_v48 = vmul.f32 %v3623_v6, %v3491_v47  ;;  %v3625_v61 = vmul.f32 0.044715, %v3495_v22  ;;  %v4103_v54 = vpack.c.bf16 %v4069_v21, %v4067_v13  ;;  %v3561_v55 = vmul.f32 0.5, %v3495_v22 }
 0x59c   : > { %v3688_v10 = vmul.f32 %v3624_v42, %v3493_v36  ;;  %v3626_v4 = vmul.f32 0.044715, %v3497_v38  ;;  %v3562_v19 = vmul.f32 0.5, %v3497_v38 }
 0x59d   : > { %v3751_v60 = vmul.f32 %v3687_v48, %v3491_v47  ;;  %v3689_v12 = vmul.f32 %v3625_v61, %v3495_v22 }
 0x59e   : > { %v3752_v43 = vmul.f32 %v3688_v10, %v3493_v36  ;;  %v3690_v18 = vmul.f32 %v3626_v4, %v3497_v38 }
 0x59f   : > { %v3753_v28 = vmul.f32 %v3689_v12, %v3495_v22  ;;  %v3815_v40 = vadd.f32 %v3751_v60, %v3491_v47  ;;  %v8215_v60 = vld [vmem:[#allocation19_spill] sm:$0xff] }
 0x5a0   : > { %v3754_v59 = vmul.f32 %v3690_v18, %v3497_v38  ;;  %v3816_v49 = vadd.f32 %v3752_v43, %v3493_v36  ;;  %4379 = vmatmul.mubr.bf16.gmra.mrb[84].mxu1 %v4101_v15  ;;  %v8216_v18 = vld [vmem:[#allocation20_spill] sm:$0xff] }
 0x5a1   : > { %v3817_v45 = vadd.f32 %v3753_v28, %v3495_v22  ;;  %v3879_v35 = vmul.f32 0.7978846, %v3815_v40  ;;  %4386 = vmatprep.mubr.bf16.mxu1 %v4104_v30 }
 0x5a2   : > { %v3818_v17 = vadd.f32 %v3754_v59, %v3497_v38  ;;  %v3880_v51 = vmul.f32 0.7978846, %v3816_v49 }
 0x5a3   : > { %v3881_v5 = vmul.f32 0.7978846, %v3817_v45  ;;  %5506 = vtanh.f32 %v3879_v35 }
 0x5a4   : > { %v3882_v31 = vmul.f32 0.7978846, %v3818_v17  ;;  %5508 = vtanh.f32 %v3880_v51  ;;  %v8217_v51 = vld [vmem:[#allocation21_spill] sm:$0xff] }
 0x5a5   : > { %5510 = vtanh.f32 %v3881_v5 }
 0x5a6   : > { %5512 = vtanh.f32 %v3882_v31 }
 0x5a8   : > { %4387 = vmatmul.mubr.bf16.gmra.mrb[88].mxu1 %v4103_v54 }
 0x5ad   : > { %v5507_v14 = vpop.eup %5506 }
 0x5ae   : > { %v5509_v33 = vpop.eup %5508  ;;  %v4007_v58 = vadd.f32 1.0, %v5507_v14  ;;  %v8218_v14 = vld [vmem:[#allocation22_spill] sm:$0xff] }
 0x5af   : > { %v5511_v24 = vpop.eup %5510  ;;  %v4008_v53 = vadd.f32 1.0, %v5509_v33 }
 0x5b0   : > { %v5513_v37 = vpop.eup %5512  ;;  %v4009_v3 = vadd.f32 1.0, %v5511_v24  ;;  %v4071_v57 = vmul.f32 %v4007_v58, %v3559_v0 }
 0x5b1   : > { %v4010_v34 = vadd.f32 1.0, %v5513_v37  ;;  %v4072_v15 = vmul.f32 %v4008_v53, %v3560_v41 }
 0x5b2   : > { %v4073_v16 = vmul.f32 %v4009_v3, %v3561_v55 }
 0x5b3   : > { %v4074_v9 = vmul.f32 %v4010_v34, %v3562_v19 }
 0x5b4   : > { %v4105_v25 = vpack.c.bf16 %v4073_v16, %v4071_v57 }
 0x5b5   : > { %v4106_v46 = vpack.c.bf16 %v4074_v9, %v4072_v15 }
 0x5b7   : > { %4394 = vmatprep.mubr.bf16.mxu1 %v4106_v46 }
 0x5b8   : > { %4395 = vmatmul.mubr.bf16.gmra.mrb[92].mxu1 %v4105_v25 }
 0x5cd   : > { %v4802_v50 = vpop.f32.mrb[32].mxu1 }
 0x5ce   : > { %v4803_v47 = vpop.f32.mrb[33].mxu1 }
 0x5cf   : > { %v4804_v6 = vadd.f32 %v4803_v47, %v4802_v50  ;;  %v4805_v36 = vpop.f32.mrb[34].mxu1 }
 0x5d0   : > { %v4806_v22 = vpop.f32.mrb[35].mxu1 }
 0x5d1   : > { %v4277_v2 = vadd.f32 %v4804_v6, %v7980_v23  ;;  %v4807_v30 = vadd.f32 %v4806_v22, %v4805_v36 }
 0x5d3   : > { %v4403_v42 = vadd.f32 %v4277_v2, %v6963_v44  ;;  %v4280_v38 = vadd.f32 %v4807_v30, %v7980_v23 }
 0x5d5   : > { %4435 = vst [vmem:[%s7987_s25] sm:$0xff] %v4403_v42  ;;  %v4404_v13 = vadd.f32 %v4280_v38, %v6970_v8  ;;  %v4808_v21 = vpop.f32.mrb[36].mxu1 }
 0x5d6   : > { %v4809_v48 = vpop.f32.mrb[37].mxu1 }
 0x5d7   : > { %4436 = vst [vmem:[%s7987_s25 + $0x8] sm:$0xff] %v4404_v13  ;;  %v4810_v61 = vadd.f32 %v4809_v48, %v4808_v21  ;;  %v4811_v10 = vpop.f32.mrb[38].mxu1 }
 0x5d8   : > { %v4812_v4 = vpop.f32.mrb[39].mxu1 }
 0x5d9   : > { %v4285_v44 = vadd.f32 %v4810_v61, %v7980_v23  ;;  %v4813_v54 = vadd.f32 %v4812_v4, %v4811_v10 }
 0x5db   : > { %v4405_v12 = vadd.f32 %v4285_v44, %v8215_v60  ;;  %v4288_v43 = vadd.f32 %v4813_v54, %v7980_v23 }
 0x5dd   : > { %4437 = vst [vmem:[%s7987_s25 + $0x10] sm:$0xff] %v4405_v12  ;;  %v4406_v28 = vadd.f32 %v4288_v43, %v8216_v18 }
 0x5df   : > { %4438 = vst [vmem:[%s7987_s25 + $0x18] sm:$0xff] %v4406_v28 }
 0x5e5   : > { %v4814_v8 = vpop.f32.mrb[40].mxu1 }
 0x5e6   : > { %v4815_v40 = vpop.f32.mrb[41].mxu1 }
 0x5e7   : > { %v4816_v59 = vadd.f32 %v4815_v40, %v4814_v8  ;;  %v4817_v49 = vpop.f32.mrb[42].mxu1 }
 0x5e8   : > { %v4818_v45 = vpop.f32.mrb[43].mxu1 }
 0x5e9   : > { %v4293_v35 = vadd.f32 %v4816_v59, %v7980_v23  ;;  %v4819_v17 = vadd.f32 %v4818_v45, %v4817_v49 }
 0x5eb   : > { %v4407_v5 = vadd.f32 %v4293_v35, %v8217_v51  ;;  %v4296_v31 = vadd.f32 %v4819_v17, %v7980_v23 }
 0x5ed   : > { %4439 = vst [vmem:[%s7987_s25 + $0x20] sm:$0xff] %v4407_v5  ;;  %v4408_v33 = vadd.f32 %v4296_v31, %v8218_v14 }
 0x5ef   : > { %4440 = vst [vmem:[%s7987_s25 + $0x28] sm:$0xff] %v4408_v33 }
 0x5f1   : > { %v4820_v58 = vpop.f32.mrb[44].mxu1 }
 0x5f2   : > { %v4821_v24 = vpop.f32.mrb[45].mxu1 }
 0x5f3   : > { %v4822_v53 = vadd.f32 %v4821_v24, %v4820_v58  ;;  %v4823_v37 = vpop.f32.mrb[46].mxu1 }
 0x5f4   : > { %v4824_v0 = vpop.f32.mrb[47].mxu1 }
 0x5f5   : > { %v4301_v55 = vadd.f32 %v4822_v53, %v7980_v23  ;;  %v4825_v3 = vadd.f32 %v4824_v0, %v4823_v37 }
 0x5f7   : > { %v4409_v41 = vadd.f32 %v4301_v55, %v6980_v56  ;;  %v4304_v19 = vadd.f32 %v4825_v3, %v7980_v23 }
 0x5f9   : > { %4441 = vst [vmem:[%s7987_s25 + $0x30] sm:$0xff] %v4409_v41  ;;  %v4410_v34 = vadd.f32 %v4304_v19, %v6983_v27  ;;  %v4826_v57 = vpop.f32.mrb[48].mxu1  ;;  %v8219_v19 = vld [vmem:[#allocation23_spill] sm:$0xff] }
 0x5fa   : > { %v4827_v16 = vpop.f32.mrb[49].mxu1 }
 0x5fb   : > { %4442 = vst [vmem:[%s7987_s25 + $0x38] sm:$0xff] %v4410_v34  ;;  %v4828_v15 = vadd.f32 %v4827_v16, %v4826_v57  ;;  %v4829_v9 = vpop.f32.mrb[50].mxu1 }
 0x5fc   : > { %v4830_v25 = vpop.f32.mrb[51].mxu1 }
 0x5fd   : > { %v4309_v46 = vadd.f32 %v4828_v15, %v7980_v23  ;;  %v4831_v50 = vadd.f32 %v4830_v25, %v4829_v9 }
 0x5ff   : > { %v4411_v47 = vadd.f32 %v4309_v46, %v7026_v29  ;;  %v4312_v56 = vadd.f32 %v4831_v50, %v7980_v23  ;;  %v8220_v50 = vld [vmem:[#allocation25_spill] sm:$0xff] }
 0x601   : > { %4443 = vst [vmem:[%s7987_s25 + $0x40] sm:$0xff] %v4411_v47  ;;  %v4412_v6 = vadd.f32 %v4312_v56, %v7041_v1  ;;  %v4832_v36 = vpop.f32.mrb[52].mxu1  ;;  %v8221_v56 = vld [vmem:[#allocation24_spill] sm:$0xff] }
 0x602   : > { %v4833_v27 = vpop.f32.mrb[53].mxu1 }
 0x603   : > { %4444 = vst [vmem:[%s7987_s25 + $0x48] sm:$0xff] %v4412_v6  ;;  %v4834_v22 = vadd.f32 %v4833_v27, %v4832_v36  ;;  %v4835_v2 = vpop.f32.mrb[54].mxu1 }
 0x604   : > { %v4836_v30 = vpop.f32.mrb[55].mxu1 }
 0x605   : > { %v4317_v42 = vadd.f32 %v4834_v22, %v7980_v23  ;;  %v4837_v38 = vadd.f32 %v4836_v30, %v4835_v2 }
 0x607   : > { %v4413_v13 = vadd.f32 %v4317_v42, %v7016_v39  ;;  %v4320_v29 = vadd.f32 %v4837_v38, %v7980_v23 }
 0x609   : > { %4445 = vst [vmem:[%s7987_s25 + $0x50] sm:$0xff] %v4413_v13  ;;  %v4414_v21 = vadd.f32 %v4320_v29, %v7019_v62  ;;  %v8222_v13 = vld [vmem:[#allocation27_spill] sm:$0xff] }
 0x60b   : > { %4446 = vst [vmem:[%s7987_s25 + $0x58] sm:$0xff] %v4414_v21 }
 0x626   : > { %v4838_v1 = vpop.f32.mrb[56].mxu1 }
 0x627   : > { %v4839_v48 = vpop.f32.mrb[57].mxu1 }
 0x628   : > { %v4840_v61 = vadd.f32 %v4839_v48, %v4838_v1  ;;  %v4841_v10 = vpop.f32.mrb[58].mxu1  ;;  %v8223_v1 = vld [vmem:[#allocation26_spill] sm:$0xff] }
 0x629   : > { %v4842_v4 = vpop.f32.mrb[59].mxu1 }
 0x62a   : > { %v4325_v44 = vadd.f32 %v4840_v61, %v7980_v23  ;;  %v4843_v54 = vadd.f32 %v4842_v4, %v4841_v10 }
 0x62c   : > { %v4415_v60 = vadd.f32 %v4325_v44, %v7102_v26  ;;  %v4328_v39 = vadd.f32 %v4843_v54, %v7980_v23 }
 0x62e   : > { %4447 = vst [vmem:[%s7987_s25 + $0x60] sm:$0xff] %v4415_v60  ;;  %v4416_v12 = vadd.f32 %v4328_v39, %v7105_v20  ;;  %v4844_v43 = vpop.f32.mrb[60].mxu1 }
 0x62f   : > { %v4845_v62 = vpop.f32.mrb[61].mxu1 }
 0x630   : > { %4448 = vst [vmem:[%s7987_s25 + $0x68] sm:$0xff] %v4416_v12  ;;  %v4846_v18 = vadd.f32 %v4845_v62, %v4844_v43  ;;  %v4847_v28 = vpop.f32.mrb[62].mxu1  ;;  %v8224_v12 = vld [vmem:[#allocation29_spill] sm:$0xff] }
 0x631   : > { %v4848_v8 = vpop.f32.mrb[63].mxu1 }
 0x632   : > { %v4333_v40 = vadd.f32 %v4846_v18, %v7980_v23  ;;  %v4849_v59 = vadd.f32 %v4848_v8, %v4847_v28  ;;  %v8225_v18 = vld [vmem:[#allocation28_spill] sm:$0xff] }
 0x634   : > { %v4417_v49 = vadd.f32 %v4333_v40, %v7123_v63  ;;  %v4336_v26 = vadd.f32 %v4849_v59, %v7980_v23 }
 0x636   : > { %4449 = vst [vmem:[%s7987_s25 + $0x70] sm:$0xff] %v4417_v49  ;;  %v4418_v45 = vadd.f32 %v4336_v26, %v7126_v32 }
 0x638   : > { %4450 = vst [vmem:[%s7987_s25 + $0x78] sm:$0xff] %v4418_v45 }
 0x63e   : > { %v4850_v20 = vpop.f32.mrb[64].mxu1 }
 0x63f   : > { %v4851_v35 = vpop.f32.mrb[65].mxu1 }
 0x640   : > { %v4852_v17 = vadd.f32 %v4851_v35, %v4850_v20  ;;  %v4853_v51 = vpop.f32.mrb[66].mxu1  ;;  %v8226_v35 = vld [vmem:[#allocation31_spill] sm:$0xff] }
 0x641   : > { %v4854_v5 = vpop.f32.mrb[67].mxu1 }
 0x642   : > { %v4341_v31 = vadd.f32 %v4852_v17, %v7980_v23  ;;  %v4855_v14 = vadd.f32 %v4854_v5, %v4853_v51  ;;  %v8227_v5 = vld [vmem:[#allocation30_spill] sm:$0xff] }
 0x644   : > { %v4419_v33 = vadd.f32 %v4341_v31, %v7138_v7  ;;  %v4344_v63 = vadd.f32 %v4855_v14, %v7980_v23 }
 0x646   : > { %4451 = vst [vmem:[%s7987_s25 + $0x80] sm:$0xff] %v4419_v33  ;;  %v4420_v58 = vadd.f32 %v4344_v63, %v7135_v11 }
 0x648   : > { %4452 = vst [vmem:[%s7987_s25 + $0x88] sm:$0xff] %v4420_v58 }
 0x64a   : > { %v4856_v32 = vpop.f32.mrb[68].mxu1 }
 0x64b   : > { %v4857_v24 = vpop.f32.mrb[69].mxu1 }
 0x64c   : > { %v4858_v53 = vadd.f32 %v4857_v24, %v4856_v32  ;;  %v4859_v37 = vpop.f32.mrb[70].mxu1 }
 0x64d   : > { %v4860_v0 = vpop.f32.mrb[71].mxu1 }
 0x64e   : > { %v4349_v55 = vadd.f32 %v4858_v53, %v7980_v23  ;;  %v4861_v3 = vadd.f32 %v4860_v0, %v4859_v37  ;;  %v8228_v37 = vld [vmem:[#allocation33_spill] sm:$0xff] }
 0x650   : > { %v4421_v41 = vadd.f32 %v4349_v55, %v7151_v52  ;;  %v4352_v7 = vadd.f32 %v4861_v3, %v7980_v23  ;;  %v8229_v3 = vld [vmem:[#allocation32_spill] sm:$0xff] }
 0x652   : > { %4453 = vst [vmem:[%s7987_s25 + $0x90] sm:$0xff] %v4421_v41  ;;  %v4422_v34 = vadd.f32 %v4352_v7, %v8219_v19 }
 0x654   : > { %4454 = vst [vmem:[%s7987_s25 + $0x98] sm:$0xff] %v4422_v34 }
 0x657   : > { %v4862_v11 = vpop.f32.mrb[72].mxu1 }
 0x658   : > { %v4863_v57 = vpop.f32.mrb[73].mxu1 }
 0x659   : > { %v4864_v16 = vadd.f32 %v4863_v57, %v4862_v11  ;;  %v4865_v15 = vpop.f32.mrb[74].mxu1 }
 0x65a   : > { %v4866_v9 = vpop.f32.mrb[75].mxu1 }
 0x65b   : > { %v4357_v25 = vadd.f32 %v4864_v16, %v7980_v23  ;;  %v4867_v46 = vadd.f32 %v4866_v9, %v4865_v15  ;;  %v8230_v9 = vld [vmem:[#allocation35_spill] sm:$0xff] }
 0x65d   : > { %v4423_v47 = vadd.f32 %v4357_v25, %v8220_v50  ;;  %v4360_v52 = vadd.f32 %v4867_v46, %v7980_v23  ;;  %v8232_v50 = vld [vmem:[#allocation34_spill] sm:$0xff] }
 0x65f   : > { %4455 = vst [vmem:[%s7987_s25 + $0xa0] sm:$0xff] %v4423_v47  ;;  %v4424_v6 = vadd.f32 %v4360_v52, %v8221_v56 }
 0x661   : > { %4456 = vst [vmem:[%s7987_s25 + $0xa8] sm:$0xff] %v4424_v6 }
 0x663   : > { %v4868_v36 = vpop.f32.mrb[76].mxu1 }
 0x664   : > { %v4869_v27 = vpop.f32.mrb[77].mxu1 }
 0x665   : > { %v4870_v22 = vadd.f32 %v4869_v27, %v4868_v36  ;;  %v4871_v2 = vpop.f32.mrb[78].mxu1 }
 0x666   : > { %v4872_v30 = vpop.f32.mrb[79].mxu1 }
 0x667   : > { %v4365_v42 = vadd.f32 %v4870_v22, %v7980_v23  ;;  %v4873_v38 = vadd.f32 %v4872_v30, %v4871_v2 }
 0x669   : > { %v4425_v29 = vadd.f32 %v4365_v42, %v8222_v13  ;;  %v4368_v21 = vadd.f32 %v4873_v38, %v7980_v23 }
 0x66b   : > { %4457 = vst [vmem:[%s7987_s25 + $0xb0] sm:$0xff] %v4425_v29  ;;  %v4426_v48 = vadd.f32 %v4368_v21, %v8223_v1  ;;  %v4874_v61 = vpop.f32.mrb[80].mxu1 }
 0x66c   : > { %v4875_v10 = vpop.f32.mrb[81].mxu1 }
 0x66d   : > { %4458 = vst [vmem:[%s7987_s25 + $0xb8] sm:$0xff] %v4426_v48  ;;  %v4876_v4 = vadd.f32 %v4875_v10, %v4874_v61  ;;  %v4877_v44 = vpop.f32.mrb[82].mxu1 }
 0x66e   : > { %v4878_v54 = vpop.f32.mrb[83].mxu1 }
 0x66f   : > { %v4373_v60 = vadd.f32 %v4876_v4, %v7980_v23  ;;  %v4879_v39 = vadd.f32 %v4878_v54, %v4877_v44 }
 0x671   : > { %v4427_v43 = vadd.f32 %v4373_v60, %v8224_v12  ;;  %v4376_v62 = vadd.f32 %v4879_v39, %v7980_v23 }
 0x673   : > { %4459 = vst [vmem:[%s7987_s25 + $0xc0] sm:$0xff] %v4427_v43  ;;  %v4428_v28 = vadd.f32 %v4376_v62, %v8225_v18  ;;  %v4880_v8 = vpop.f32.mrb[84].mxu1 }
 0x674   : > { %v4881_v40 = vpop.f32.mrb[85].mxu1 }
 0x675   : > { %4460 = vst [vmem:[%s7987_s25 + $0xc8] sm:$0xff] %v4428_v28  ;;  %v4882_v59 = vadd.f32 %v4881_v40, %v4880_v8  ;;  %v4883_v49 = vpop.f32.mrb[86].mxu1 }
 0x676   : > { %v4884_v26 = vpop.f32.mrb[87].mxu1 }
 0x677   : > { %v4381_v45 = vadd.f32 %v4882_v59, %v7980_v23  ;;  %v4885_v20 = vadd.f32 %v4884_v26, %v4883_v49 }
 0x679   : > { %v4429_v17 = vadd.f32 %v4381_v45, %v8226_v35  ;;  %v4384_v51 = vadd.f32 %v4885_v20, %v7980_v23 }
 0x67b   : > { %4461 = vst [vmem:[%s7987_s25 + $0xd0] sm:$0xff] %v4429_v17  ;;  %v4430_v31 = vadd.f32 %v4384_v51, %v8227_v5  ;;  %v4886_v14 = vpop.f32.mrb[88].mxu1 }
 0x67c   : > { %v4887_v33 = vpop.f32.mrb[89].mxu1 }
 0x67d   : > { %4462 = vst [vmem:[%s7987_s25 + $0xd8] sm:$0xff] %v4430_v31  ;;  %v4888_v63 = vadd.f32 %v4887_v33, %v4886_v14  ;;  %v4889_v58 = vpop.f32.mrb[90].mxu1 }
 0x67e   : > { %v4890_v32 = vpop.f32.mrb[91].mxu1 }
 0x67f   : > { %v4389_v24 = vadd.f32 %v4888_v63, %v7980_v23  ;;  %v4891_v53 = vadd.f32 %v4890_v32, %v4889_v58 }
 0x681   : > { %v4431_v0 = vadd.f32 %v4389_v24, %v8228_v37  ;;  %v4392_v55 = vadd.f32 %v4891_v53, %v7980_v23 }
 0x683   : > { %4463 = vst [vmem:[%s7987_s25 + $0xe0] sm:$0xff] %v4431_v0  ;;  %v4432_v41 = vadd.f32 %v4392_v55, %v8229_v3 }
 0x685   : > { %4464 = vst [vmem:[%s7987_s25 + $0xe8] sm:$0xff] %v4432_v41 }
 0x68b   : > { %v4892_v7 = vpop.f32.mrb[92].mxu1 }
 0x68c   : > { %v4893_v19 = vpop.f32.mrb[93].mxu1 }
 0x68d   : > { %v4894_v34 = vadd.f32 %v4893_v19, %v4892_v7  ;;  %v4895_v11 = vpop.f32.mrb[94].mxu1 }
 0x68e   : > { %v4896_v57 = vpop.f32.mrb[95].mxu1 }
 0x68f   : > { %v4397_v16 = vadd.f32 %v4894_v34, %v7980_v23  ;;  %v4897_v15 = vadd.f32 %v4896_v57, %v4895_v11 }
 0x691   : > { %v4433_v25 = vadd.f32 %v4397_v16, %v8230_v9  ;;  %v4400_v46 = vadd.f32 %v4897_v15, %v7980_v23 }
 0x693   : > { %4465 = vst [vmem:[%s7987_s25 + $0xf0] sm:$0xff] %v4433_v25  ;;  %v4434_v47 = vadd.f32 %v4400_v46, %v8232_v50 }
 0x695   : > { %4466 = vst [vmem:[%s7987_s25 + $0xf8] sm:$0xff] %v4434_v47 }
 0x696   : > { %5707 = shalt.err (!%p5704_p13)
}
 0x697   : > { %s5708_s21 = scalar_lea.hbm %s8084_s30, 4096  ;;  %s5712_s15 = scalar_lea.hbm %s8231_s10, 8192 }
 0x698   : > { %p5709_p0 = scmp.ne.s32.totalorder %s8084_s30, %s5708_s21  ;;  %p5713_p9 = scmp.lt.u32.totalorder %s8084_s30, %s8231_s10 }
 0x699   : > { %p5714_p12 = scmp.lt.u32.totalorder %s5712_s15, %s5708_s21  ;;  %p5716_p4 = scmp.lt.u32.totalorder %s5708_s21, %s8084_s30 }
 0x69a   : > { %p5710_p5 = pnand %p5709_p0, %p6011_p1 }
 0x69b   : > { %p5715_p2 = por %p5714_p12, %p5713_p9 }
 0x69c   : > { %p5711_p11 = pneg %p5710_p5 }
 0x69d   : > { %p5717_p6 = por %p5716_p4, %p5715_p2 }
 0x69f   : > { %p5718_p8 = pnand %p5717_p6, %p5711_p11 }
 0x6a1   : > { %5721 = shalt.err (!%p5718_p8)
}
 0x6a2   : > { %s5781_s23 = smov 128   ;;  %s5782_s13 = smov 8  }
 0x6a3   : > { %5044 = dma.vmem_to_hbm [thread:$0]  (%p6011_p1), %s8086_s14, 4096, %s8084_s30, %s4468_s29, %s5781_s23, %s5781_s23, %s5782_s13  }
 0x6a4 PF: > { %s8233_s3 = sld [smem:[#allocation17_spill]]  ;;  %s8234_s18 = sld [smem:[#allocation18_spill]] }
 0x6a5   : > { %p8236_p7 = scmp.ge.s32.totalorder %s5768_s28, 2 }
 0x6aa   : > { %s4497_s12 = sand.u32 1, %s8233_s3   ;;  %p8235_p3 = scmp.ne.s32.totalorder %s8234_s18, 0 }
 0x6ab   : > { %s4498_s21 = scalar_lea.sflag [#allocation5], %s4497_s12 }
 0x6ac   : > { %p5064_p10 = pnand %p8236_p7, %p8235_p3 }
 0x6ae   : > { %5751 = dma.done.wait (!%p5064_p10), %s4498_s21, 4096  }
 0x6af   : > { %5753 = vsyncadd (!%p5064_p10), %s4498_s21, 4294963200  ;;  %p28_p13 = scmp.ge.s32.totalorder %s6001_s19, 4   ;;  %s8237_s25 = smov %s5760_s26 }
 0x6b0   : > { %s8238_s26 = smov %s5764_s27  ;;  %s8239_s27 = smov %s6017_s24 }
 0x6b1   : > { %s8240_s28 = smov %s6001_s19  ;;  %30 = sbr.rel (!%p28_p13) target bundleno = 12 (0xc), region = 136 }
 0x6b8   :  { %4503 = vsyncpa [#allocation4], 1 }
 0x6b9   :  { %4505 = vsyncpa [#allocation4 + $0x1], 1 }
 0x6ba   :  { %4506 = vsyncpa [#allocation7], 1 }
 0x6bb   :  { %4507 = vsyncpa [#allocation10], 1 }
 0x6bc   :  { %4508 = vsyncpa [#allocation5], 1 }
 0x6bd   :  { %4510 = vsyncpa [#allocation5 + $0x1], 1 }

</bundles_post_ra>
